<compile_context>
chip_gen: v7x
topology: tpu7x:2x2x1
jax: 0.10.0
libtpu: 0.0.40
codegen_flags: <defaults>
</compile_context>

<pallas_src>
import functools

import jax
import jax.numpy as jnp
import numpy as np
from jax import lax
from jax.experimental import pallas as pl
from jax.experimental.pallas import tpu as pltpu

_EPS = 1e-5


def _basic_block_kernel(*refs, N, H, W, Cin, Cp, has_proj):
    """Entire BasicBlock forward (stride=1) in one kernel invocation.

    refs = (x, w1, g1, b1, w2, g2, b2, [ws, gs, bs], out, col_scratch)
    """
    if has_proj:
        (x_ref, w1_ref, g1_ref, b1_ref, w2_ref, g2_ref, b2_ref,
         ws_ref, gs_ref, bs_ref, out_ref, col_ref) = refs
    else:
        (x_ref, w1_ref, g1_ref, b1_ref, w2_ref, g2_ref, b2_ref,
         out_ref, col_ref) = refs
        ws_ref = gs_ref = bs_ref = None

    M = N * H * W
    inv_m = 1.0 / float(M)

    def im2col_kx(src, C):
        # col[:, r, w, kx*C + c] = x_pad[:, r, w + kx, c]  (bf16), where x_pad
        # is `src` zero-padded by 1 in H and W.  Only the kx taps are
        # materialized (3x amplification, not 9x); rows 0 and H+1 carry the ky
        # padding.  Every element in channels [0, 3*C) is written exactly once.
        zrow = jnp.zeros((N, 1, W, 3 * C), jnp.bfloat16)
        zcol = jnp.zeros((N, H, 1, C), jnp.bfloat16)
        col_ref[:, 0:1, :, 0:3 * C] = zrow             # top ky-pad row
        col_ref[:, H + 1:H + 2, :, 0:3 * C] = zrow     # bottom ky-pad row
        body = src[:, :, :, :].astype(jnp.bfloat16)    # read once, bf16, short-lived
        # kx = 0 (dx = -1): shift right, left column from the pad
        col_ref[:, 1:H + 1, :, 0:C] = jnp.concatenate(
            [zcol, body[:, :, 0:W - 1, :]], axis=2)
        # kx = 1 (dx = 0)
        col_ref[:, 1:H + 1, :, C:2 * C] = body
        # kx = 2 (dx = +1): shift left, right column from the pad
        col_ref[:, 1:H + 1, :, 2 * C:3 * C] = jnp.concatenate(
            [body[:, :, 1:W, :], zcol], axis=2)

    def conv3x3(src, C, w_ref):
        # 3 MXU matmuls (one per ky), K = 3*C, bf16 operands read straight from
        # the shared bf16 scratch (no separate cast pass), fp32 accumulation.
        im2col_kx(src, C)
        acc = jnp.zeros((M, Cp), jnp.float32)
        for ky in range(3):
            lhs = col_ref[:, ky:ky + H, :, 0:3 * C].reshape(M, 3 * C)
            acc = acc + jnp.dot(lhs, w_ref[ky], preferred_element_type=jnp.float32)
        return acc

    def bn_train(y, g_ref, b_ref):
        # PyTorch training-mode BatchNorm2d: biased batch stats over (N, H, W).
        # Centered second pass for the variance; all math in fp32.
        mean = jnp.sum(y, axis=0, keepdims=True) * inv_m
        yc = y - mean
        var = jnp.sum(yc * yc, axis=0, keepdims=True) * inv_m
        return yc * (g_ref[...] * lax.rsqrt(var + _EPS)) + b_ref[...]

    # conv1 -> bn1 -> relu   (x_ref is read inside im2col only; not held live)
    out1 = jnp.maximum(bn_train(conv3x3(x_ref, Cin, w1_ref), g1_ref, b1_ref), 0.0)

    # conv2 -> bn2   (reuses the same im2col scratch; conv1's contents are dead)
    y2 = bn_train(conv3x3(out1.reshape(N, H, W, Cp), Cp, w2_ref), g2_ref, b2_ref)

    # shortcut branch: x_ref is (re)read only here, keeping its live range short
    if has_proj:
        sc = jnp.dot(x_ref[...].reshape(M, Cin).astype(jnp.bfloat16), ws_ref[...],
                     preferred_element_type=jnp.float32)
        sc = bn_train(sc, gs_ref, bs_ref)
    else:
        sc = x_ref[...].reshape(M, Cin)                # identity, fp32

    out_ref[...] = jnp.maximum(y2 + sc, 0.0).reshape(N, H, W, Cp).astype(out_ref.dtype)


def _vmem_limit_bytes():
    # Per-generation VMEM budget: ~100 MiB on v5e/v6e (128 MiB physical),
    # ~54 MiB on v7x (64 MiB physical), with headroom for compiler scratch.
    cap = 128 * 1024 * 1024
    try:
        cap = int(getattr(pltpu.get_tpu_info(), "vmem_capacity_bytes", cap))
    except Exception:
        pass
    return min(int(cap * 0.85), 100 * 1024 * 1024)


def basic_block_pallas_nhwc(x_nhwc, params, stride=1):
    """Copy-free NHWC entry point (preferred: keep the whole net in NHWC)."""
    if stride != 1:
        # TODO(synk): stride>1 needs strided im2col windows with boundary handling.
        raise NotImplementedError("basic_block_pallas currently supports stride=1 only")

    N, H, W, Cin = x_nhwc.shape
    Cp = params["w1"].shape[-1]
    has_proj = Cin != Cp
    Cmax = max(Cin, Cp)
    M = N * H * W

    def pack3x3(w):
        # (3, 3, C, Cout) HWIO -> (3, 3*C, Cout) bf16; ky on the leading axis,
        # (kx, cin) minor ordering matches the im2col channel packing.
        return w.reshape(3, 3 * w.shape[2], w.shape[3]).astype(jnp.bfloat16)

    inputs = [
        x_nhwc.astype(jnp.float32),
        pack3x3(params["w1"]),
        params["g1"].reshape(1, Cp).astype(jnp.float32),
        params["b1"].reshape(1, Cp).astype(jnp.float32),
        pack3x3(params["w2"]),
        params["g2"].reshape(1, Cp).astype(jnp.float32),
        params["b2"].reshape(1, Cp).astype(jnp.float32),
    ]
    if has_proj:
        inputs += [
            params["ws"].reshape(Cin, Cp).astype(jnp.bfloat16),
            params["gs"].reshape(1, Cp).astype(jnp.float32),
            params["bs"].reshape(1, Cp).astype(jnp.float32),
        ]

    def full_spec(a):
        # Whole-array block (block shape == array shape satisfies tiling rules).
        return pl.BlockSpec(a.shape, lambda i, nd=a.ndim: (0,) * nd)

    kernel = functools.partial(_basic_block_kernel, N=N, H=H, W=W,
                               Cin=Cin, Cp=Cp, has_proj=has_proj)

    flops = 2 * M * (9 * Cin) * Cp + 2 * M * (9 * Cp) * Cp
    if has_proj:
        flops += 2 * M * Cin * Cp
    bytes_accessed = sum(int(a.size) * a.dtype.itemsize for a in inputs) + M * Cp * 4
    cost = pl.CostEstimate(flops=flops,
                           transcendentals=(3 if has_proj else 2) * Cp,
                           bytes_accessed=bytes_accessed)

    return pl.pallas_call(
        kernel,
        grid=(1,),
        in_specs=[full_spec(a) for a in inputs],
        out_specs=pl.BlockSpec((N, H, W, Cp), lambda i: (0, 0, 0, 0)),
        out_shape=jax.ShapeDtypeStruct((N, H, W, Cp), jnp.float32),
        scratch_shapes=[pltpu.VMEM((N, H + 2, W, 3 * Cmax), jnp.bfloat16)],
        compiler_params=pltpu.CompilerParams(
            dimension_semantics=("arbitrary",),
            vmem_limit_bytes=_vmem_limit_bytes()),
        cost_estimate=cost,
    )(*inputs)


def basic_block_pallas(x_nchw, params, stride=1):
    # NCHW<->NHWC glue for PyTorch-style callers.  NOTE: both transposes are
    # full HBM round trips outside the kernel; prefer basic_block_pallas_nhwc.
    x = jnp.transpose(x_nchw, (0, 2, 3, 1))
    out = basic_block_pallas_nhwc(x, params, stride=stride)
    return jnp.transpose(out, (0, 3, 1, 2))


# ------------------------- pure-JAX reference -------------------------------
def _bn_ref(y, g, b):
    mean = jnp.mean(y, axis=(0, 1, 2), keepdims=True)
    var = jnp.mean((y - mean) ** 2, axis=(0, 1, 2), keepdims=True)
    return (y - mean) * lax.rsqrt(var + _EPS) * g.reshape(1, 1, 1, -1) + b.reshape(1, 1, 1, -1)


def basic_block_ref(x_nchw, params, stride=1):
    N, Cin, H, W = x_nchw.shape
    Cp = params["w1"].shape[-1]
    has_proj = (stride != 1) or (Cin != Cp)
    x = jnp.transpose(x_nchw, (0, 2, 3, 1))
    dn = ("NHWC", "HWIO", "NHWC")
    y = lax.conv_general_dilated(x, params["w1"], (stride, stride),
                                 ((1, 1), (1, 1)), dimension_numbers=dn)
    y = jax.nn.relu(_bn_ref(y, params["g1"], params["b1"]))
    y = lax.conv_general_dilated(y, params["w2"], (1, 1),
                                 ((1, 1), (1, 1)), dimension_numbers=dn)
    y = _bn_ref(y, params["g2"], params["b2"])
    if has_proj:
        sc = lax.conv_general_dilated(x, params["ws"], (stride, stride),
                                      "VALID", dimension_numbers=dn)
        sc = _bn_ref(sc, params["gs"], params["bs"])
    else:
        sc = x
    return jnp.transpose(jax.nn.relu(y + sc), (0, 3, 1, 2))


# ------------------------- deterministic params -----------------------------
def make_params(key, in_planes, planes, stride=1):
    ks = jax.random.split(key, 8)
    p = {
        "w1": 0.2 * jax.random.normal(ks[0], (3, 3, in_planes, planes), jnp.float32),
        "w2": 0.2 * jax.random.normal(ks[1], (3, 3, planes, planes), jnp.float32),
        "g1": 1.0 + 0.1 * jax.random.normal(ks[2], (planes,), jnp.float32),
        "b1": 0.1 * jax.random.normal(ks[3], (planes,), jnp.float32),
        "g2": 1.0 + 0.1 * jax.random.normal(ks[4], (planes,), jnp.float32),
        "b2": 0.1 * jax.random.normal(ks[5], (planes,), jnp.float32),
    }
    if stride != 1 or in_planes != planes:
        p["ws"] = 0.2 * jax.random.normal(ks[6], (1, 1, in_planes, planes), jnp.float32)
        p["gs"] = jnp.ones((planes,), jnp.float32)
        p["bs"] = jnp.zeros((planes,), jnp.float32)
    return p


if __name__ == "__main__":
    key = jax.random.PRNGKey(0)
    kx_, kp1, kp2 = jax.random.split(key, 3)
    x = jax.random.normal(kx_, (2, 4, 16, 16), jnp.float32)  # NCHW like PyTorch

    # Tolerance accounts for bf16 MXU operands (fp32 reference): two chained
    # convs + BNs accumulate ~1e-2 absolute error.
    RTOL = ATOL = 3e-2

    # Case 1: identity shortcut (in_planes == planes, stride == 1)
    p1 = make_params(kp1, 4, 4, stride=1)
    out1 = jax.block_until_ready(basic_block_pallas(x, p1, stride=1))
    ref1 = basic_block_ref(x, p1, stride=1)
    assert out1.shape == (2, 4, 16, 16)
    np.testing.assert_allclose(np.asarray(out1), np.asarray(ref1), rtol=RTOL, atol=ATOL)

    # Case 2: projection shortcut (1x1 conv + BN), stride == 1
    p2 = make_params(kp2, 4, 8, stride=1)
    out2 = jax.block_until_ready(basic_block_pallas(x, p2, stride=1))
    ref2 = basic_block_ref(x, p2, stride=1)
    assert out2.shape == (2, 8, 16, 16)
    np.testing.assert_allclose(np.asarray(out2), np.asarray(ref2), rtol=RTOL, atol=ATOL)

    print("KERNEL_OK")
</pallas_src>

<mosaic_0001>
module attributes {stable_mosaic.version = 11 : i64} {
  func.func @_basic_block_kernel(%arg0: i32, %arg1: memref<2x16x16x4xf32, #tpu.memory_space<vmem>>, %arg2: memref<3x12x4xbf16, #tpu.memory_space<vmem>>, %arg3: memref<1x4xf32, #tpu.memory_space<vmem>>, %arg4: memref<1x4xf32, #tpu.memory_space<vmem>>, %arg5: memref<3x12x4xbf16, #tpu.memory_space<vmem>>, %arg6: memref<1x4xf32, #tpu.memory_space<vmem>>, %arg7: memref<1x4xf32, #tpu.memory_space<vmem>>, %arg8: memref<2x16x16x4xf32, #tpu.memory_space<vmem>>, %arg9: memref<2x18x16x12xbf16, #tpu.memory_space<vmem>>) attributes {dimension_semantics = [#tpu.dimension_semantics<arbitrary>], iteration_bounds = array<i64: 1>, scalar_prefetch = 0 : i64, scratch_operands = 1 : i64, tpu.core_type = #tpu.core_type<tc>, window_params = [{pipeline_mode = #tpu.pipeline_mode<synchronous>, transform_indices = @transform_0, window_bounds = array<i64: 2, 16, 16, 4>}, {pipeline_mode = #tpu.pipeline_mode<synchronous>, transform_indices = @transform_1, window_bounds = array<i64: 3, 12, 4>}, {pipeline_mode = #tpu.pipeline_mode<synchronous>, transform_indices = @transform_2, window_bounds = array<i64: 1, 4>}, {pipeline_mode = #tpu.pipeline_mode<synchronous>, transform_indices = @transform_3, window_bounds = array<i64: 1, 4>}, {pipeline_mode = #tpu.pipeline_mode<synchronous>, transform_indices = @transform_4, window_bounds = array<i64: 3, 12, 4>}, {pipeline_mode = #tpu.pipeline_mode<synchronous>, transform_indices = @transform_5, window_bounds = array<i64: 1, 4>}, {pipeline_mode = #tpu.pipeline_mode<synchronous>, transform_indices = @transform_6, window_bounds = array<i64: 1, 4>}, {pipeline_mode = #tpu.pipeline_mode<synchronous>, transform_indices = @transform_7, window_bounds = array<i64: 2, 16, 16, 4>}]} {
    %cst = arith.constant 0.000000e+00 : bf16
    %0 = vector.broadcast %cst : bf16 to vector<2x1x16x12xbf16>
    %cst_0 = arith.constant 0.000000e+00 : bf16
    %1 = vector.broadcast %cst_0 : bf16 to vector<2x16x1x4xbf16>
    %c0 = arith.constant 0 : index
    %c0_1 = arith.constant 0 : index
    %c0_2 = arith.constant 0 : index
    %c0_3 = arith.constant 0 : index
    %2 = vector.load %arg9[%c0, %c0_1, %c0_2, %c0_3] : memref<2x18x16x12xbf16, #tpu.memory_space<vmem>>, vector<2x1x16x12xbf16>
    tpu.vector_store %arg9[%c0, %c0_1, %c0_2, %c0_3], %0 {strides = array<i32>} : memref<2x18x16x12xbf16, #tpu.memory_space<vmem>>, vector<2x1x16x12xbf16>,
    %c0_4 = arith.constant 0 : index
    %c17 = arith.constant 17 : index
    %c0_5 = arith.constant 0 : index
    %c0_6 = arith.constant 0 : index
    %3 = vector.load %arg9[%c0_4, %c17, %c0_5, %c0_6] : memref<2x18x16x12xbf16, #tpu.memory_space<vmem>>, vector<2x1x16x12xbf16>
    tpu.vector_store %arg9[%c0_4, %c17, %c0_5, %c0_6], %0 {strides = array<i32>} : memref<2x18x16x12xbf16, #tpu.memory_space<vmem>>, vector<2x1x16x12xbf16>,
    %c0_7 = arith.constant 0 : index
    %c0_8 = arith.constant 0 : index
    %c0_9 = arith.constant 0 : index
    %c0_10 = arith.constant 0 : index
    %4 = vector.load %arg1[%c0_7, %c0_8, %c0_9, %c0_10] : memref<2x16x16x4xf32, #tpu.memory_space<vmem>>, vector<2x16x16x4xf32>
    %5 = arith.truncf %4 : vector<2x16x16x4xf32> to vector<2x16x16x4xbf16>
    %6 = vector.extract_strided_slice %5 {offsets = [0, 0, 0, 0], sizes = [2, 16, 15, 4], strides = [1, 1, 1, 1]} : vector<2x16x16x4xbf16> to vector<2x16x15x4xbf16>
    %7 = tpu.concatenate %1, %6 in 2 : vector<2x16x1x4xbf16>, vector<2x16x15x4xbf16> -> vector<2x16x16x4xbf16>
    %c0_11 = arith.constant 0 : index
    %c1 = arith.constant 1 : index
    %c0_12 = arith.constant 0 : index
    %c0_13 = arith.constant 0 : index
    %8 = vector.load %arg9[%c0_11, %c1, %c0_12, %c0_13] : memref<2x18x16x12xbf16, #tpu.memory_space<vmem>>, vector<2x16x16x4xbf16>
    tpu.vector_store %arg9[%c0_11, %c1, %c0_12, %c0_13], %7 {strides = array<i32>} : memref<2x18x16x12xbf16, #tpu.memory_space<vmem>>, vector<2x16x16x4xbf16>,
    %c0_14 = arith.constant 0 : index
    %c1_15 = arith.constant 1 : index
    %c0_16 = arith.constant 0 : index
    %c4 = arith.constant 4 : index
    %9 = vector.load %arg9[%c0_14, %c1_15, %c0_16, %c4] : memref<2x18x16x12xbf16, #tpu.memory_space<vmem>>, vector<2x16x16x4xbf16>
    tpu.vector_store %arg9[%c0_14, %c1_15, %c0_16, %c4], %5 {strides = array<i32>} : memref<2x18x16x12xbf16, #tpu.memory_space<vmem>>, vector<2x16x16x4xbf16>,
    %10 = vector.extract_strided_slice %5 {offsets = [0, 0, 1, 0], sizes = [2, 16, 15, 4], strides = [1, 1, 1, 1]} : vector<2x16x16x4xbf16> to vector<2x16x15x4xbf16>
    %11 = tpu.concatenate %10, %1 in 2 : vector<2x16x15x4xbf16>, vector<2x16x1x4xbf16> -> vector<2x16x16x4xbf16>
    %c0_17 = arith.constant 0 : index
    %c1_18 = arith.constant 1 : index
    %c0_19 = arith.constant 0 : index
    %c8 = arith.constant 8 : index
    %12 = vector.load %arg9[%c0_17, %c1_18, %c0_19, %c8] : memref<2x18x16x12xbf16, #tpu.memory_space<vmem>>, vector<2x16x16x4xbf16>
    tpu.vector_store %arg9[%c0_17, %c1_18, %c0_19, %c8], %11 {strides = array<i32>} : memref<2x18x16x12xbf16, #tpu.memory_space<vmem>>, vector<2x16x16x4xbf16>,
    %cst_20 = arith.constant 0.000000e+00 : f32
    %13 = vector.broadcast %cst_20 : f32 to vector<512x4xf32>
    %c0_21 = arith.constant 0 : index
    %c0_22 = arith.constant 0 : index
    %c0_23 = arith.constant 0 : index
    %c0_24 = arith.constant 0 : index
    %14 = vector.load %arg9[%c0_21, %c0_22, %c0_23, %c0_24] : memref<2x18x16x12xbf16, #tpu.memory_space<vmem>>, vector<2x16x16x12xbf16>
    %15 = vector.shape_cast %14 : vector<2x16x16x12xbf16> to vector<512x12xbf16>
    %c0_25 = arith.constant 0 : index
    %c0_26 = arith.constant 0 : index
    %c0_27 = arith.constant 0 : index
    %16 = vector.load %arg2[%c0_25, %c0_26, %c0_27] : memref<3x12x4xbf16, #tpu.memory_space<vmem>>, vector<1x12x4xbf16>
    %17 = vector.shape_cast %16 : vector<1x12x4xbf16> to vector<12x4xbf16>
    %cst_28 = arith.constant dense<0.000000e+00> : vector<512x4xf32>
    %18 = tpu.matmul %15, %17, %cst_28 {dimension_numbers = #tpu.dot_dimension_numbers<[1], [0], [0], [1], [0, 0, 1, 1], [], []>} : vector<512x12xbf16>, vector<12x4xbf16>, vector<512x4xf32> -> vector<512x4xf32>
    %19 = arith.addf %13, %18 : vector<512x4xf32>
    %c0_29 = arith.constant 0 : index
    %c1_30 = arith.constant 1 : index
    %c0_31 = arith.constant 0 : index
    %c0_32 = arith.constant 0 : index
    %20 = vector.load %arg9[%c0_29, %c1_30, %c0_31, %c0_32] : memref<2x18x16x12xbf16, #tpu.memory_space<vmem>>, vector<2x16x16x12xbf16>
    %21 = vector.shape_cast %20 : vector<2x16x16x12xbf16> to vector<512x12xbf16>
    %c1_33 = arith.constant 1 : index
    %c0_34 = arith.constant 0 : index
    %c0_35 = arith.constant 0 : index
    %22 = vector.load %arg2[%c1_33, %c0_34, %c0_35] : memref<3x12x4xbf16, #tpu.memory_space<vmem>>, vector<1x12x4xbf16>
    %23 = vector.shape_cast %22 : vector<1x12x4xbf16> to vector<12x4xbf16>
    %cst_36 = arith.constant dense<0.000000e+00> : vector<512x4xf32>
    %24 = tpu.matmul %21, %23, %cst_36 {dimension_numbers = #tpu.dot_dimension_numbers<[1], [0], [0], [1], [0, 0, 1, 1], [], []>} : vector<512x12xbf16>, vector<12x4xbf16>, vector<512x4xf32> -> vector<512x4xf32>
    %25 = arith.addf %19, %24 : vector<512x4xf32>
    %c0_37 = arith.constant 0 : index
    %c2 = arith.constant 2 : index
    %c0_38 = arith.constant 0 : index
    %c0_39 = arith.constant 0 : index
    %26 = vector.load %arg9[%c0_37, %c2, %c0_38, %c0_39] : memref<2x18x16x12xbf16, #tpu.memory_space<vmem>>, vector<2x16x16x12xbf16>
    %27 = vector.shape_cast %26 : vector<2x16x16x12xbf16> to vector<512x12xbf16>
    %c2_40 = arith.constant 2 : index
    %c0_41 = arith.constant 0 : index
    %c0_42 = arith.constant 0 : index
    %28 = vector.load %arg2[%c2_40, %c0_41, %c0_42] : memref<3x12x4xbf16, #tpu.memory_space<vmem>>, vector<1x12x4xbf16>
    %29 = vector.shape_cast %28 : vector<1x12x4xbf16> to vector<12x4xbf16>
    %cst_43 = arith.constant dense<0.000000e+00> : vector<512x4xf32>
    %30 = tpu.matmul %27, %29, %cst_43 {dimension_numbers = #tpu.dot_dimension_numbers<[1], [0], [0], [1], [0, 0, 1, 1], [], []>} : vector<512x12xbf16>, vector<12x4xbf16>, vector<512x4xf32> -> vector<512x4xf32>
    %31 = arith.addf %25, %30 : vector<512x4xf32>
    %cst_44 = arith.constant dense<0.000000e+00> : vector<4xf32>
    %32 = vector.multi_reduction <add>, %31, %cst_44 [0] : vector<512x4xf32> to vector<4xf32>
    %33 = vector.shape_cast %32 : vector<4xf32> to vector<1x4xf32>
    %cst_45 = arith.constant 0.001953125 : f32
    %34 = vector.broadcast %cst_45 : f32 to vector<1x4xf32>
    %35 = arith.mulf %33, %34 : vector<1x4xf32>
    %36 = vector.broadcast %35 : vector<1x4xf32> to vector<512x4xf32>
    %37 = arith.subf %31, %36 : vector<512x4xf32>
    %38 = arith.mulf %37, %37 : vector<512x4xf32>
    %cst_46 = arith.constant dense<0.000000e+00> : vector<4xf32>
    %39 = vector.multi_reduction <add>, %38, %cst_46 [0] : vector<512x4xf32> to vector<4xf32>
    %40 = vector.shape_cast %39 : vector<4xf32> to vector<1x4xf32>
    %cst_47 = arith.constant 0.001953125 : f32
    %41 = vector.broadcast %cst_47 : f32 to vector<1x4xf32>
    %42 = arith.mulf %40, %41 : vector<1x4xf32>
    %c0_48 = arith.constant 0 : index
    %c0_49 = arith.constant 0 : index
    %43 = vector.load %arg3[%c0_48, %c0_49] : memref<1x4xf32, #tpu.memory_space<vmem>>, vector<1x4xf32>
    %cst_50 = arith.constant 9.99999974E-6 : f32
    %44 = vector.broadcast %cst_50 : f32 to vector<1x4xf32>
    %45 = arith.addf %42, %44 : vector<1x4xf32>
    %46 = math.rsqrt %45 : vector<1x4xf32>
    %47 = arith.mulf %43, %46 : vector<1x4xf32>
    %48 = vector.broadcast %47 : vector<1x4xf32> to vector<512x4xf32>
    %49 = arith.mulf %37, %48 : vector<512x4xf32>
    %c0_51 = arith.constant 0 : index
    %c0_52 = arith.constant 0 : index
    %50 = vector.load %arg4[%c0_51, %c0_52] : memref<1x4xf32, #tpu.memory_space<vmem>>, vector<1x4xf32>
    %51 = vector.broadcast %50 : vector<1x4xf32> to vector<512x4xf32>
    %52 = arith.addf %49, %51 : vector<512x4xf32>
    %cst_53 = arith.constant 0.000000e+00 : f32
    %53 = vector.broadcast %cst_53 : f32 to vector<512x4xf32>
    %54 = arith.maximumf %52, %53 : vector<512x4xf32>
    %55 = vector.shape_cast %54 : vector<512x4xf32> to vector<2x16x16x4xf32>
    %cst_54 = arith.constant 0.000000e+00 : bf16
    %56 = vector.broadcast %cst_54 : bf16 to vector<2x1x16x12xbf16>
    %cst_55 = arith.constant 0.000000e+00 : bf16
    %57 = vector.broadcast %cst_55 : bf16 to vector<2x16x1x4xbf16>
    %c0_56 = arith.constant 0 : index
    %c0_57 = arith.constant 0 : index
    %c0_58 = arith.constant 0 : index
    %c0_59 = arith.constant 0 : index
    %58 = vector.load %arg9[%c0_56, %c0_57, %c0_58, %c0_59] : memref<2x18x16x12xbf16, #tpu.memory_space<vmem>>, vector<2x1x16x12xbf16>
    tpu.vector_store %arg9[%c0_56, %c0_57, %c0_58, %c0_59], %56 {strides = array<i32>} : memref<2x18x16x12xbf16, #tpu.memory_space<vmem>>, vector<2x1x16x12xbf16>,
    %c0_60 = arith.constant 0 : index
    %c17_61 = arith.constant 17 : index
    %c0_62 = arith.constant 0 : index
    %c0_63 = arith.constant 0 : index
    %59 = vector.load %arg9[%c0_60, %c17_61, %c0_62, %c0_63] : memref<2x18x16x12xbf16, #tpu.memory_space<vmem>>, vector<2x1x16x12xbf16>
    tpu.vector_store %arg9[%c0_60, %c17_61, %c0_62, %c0_63], %56 {strides = array<i32>} : memref<2x18x16x12xbf16, #tpu.memory_space<vmem>>, vector<2x1x16x12xbf16>,
    %60 = arith.truncf %55 : vector<2x16x16x4xf32> to vector<2x16x16x4xbf16>
    %61 = vector.extract_strided_slice %60 {offsets = [0, 0, 0, 0], sizes = [2, 16, 15, 4], strides = [1, 1, 1, 1]} : vector<2x16x16x4xbf16> to vector<2x16x15x4xbf16>
    %62 = tpu.concatenate %57, %61 in 2 : vector<2x16x1x4xbf16>, vector<2x16x15x4xbf16> -> vector<2x16x16x4xbf16>
    %c0_64 = arith.constant 0 : index
    %c1_65 = arith.constant 1 : index
    %c0_66 = arith.constant 0 : index
    %c0_67 = arith.constant 0 : index
    %63 = vector.load %arg9[%c0_64, %c1_65, %c0_66, %c0_67] : memref<2x18x16x12xbf16, #tpu.memory_space<vmem>>, vector<2x16x16x4xbf16>
    tpu.vector_store %arg9[%c0_64, %c1_65, %c0_66, %c0_67], %62 {strides = array<i32>} : memref<2x18x16x12xbf16, #tpu.memory_space<vmem>>, vector<2x16x16x4xbf16>,
    %c0_68 = arith.constant 0 : index
    %c1_69 = arith.constant 1 : index
    %c0_70 = arith.constant 0 : index
    %c4_71 = arith.constant 4 : index
    %64 = vector.load %arg9[%c0_68, %c1_69, %c0_70, %c4_71] : memref<2x18x16x12xbf16, #tpu.memory_space<vmem>>, vector<2x16x16x4xbf16>
    tpu.vector_store %arg9[%c0_68, %c1_69, %c0_70, %c4_71], %60 {strides = array<i32>} : memref<2x18x16x12xbf16, #tpu.memory_space<vmem>>, vector<2x16x16x4xbf16>,
    %65 = vector.extract_strided_slice %60 {offsets = [0, 0, 1, 0], sizes = [2, 16, 15, 4], strides = [1, 1, 1, 1]} : vector<2x16x16x4xbf16> to vector<2x16x15x4xbf16>
    %66 = tpu.concatenate %65, %57 in 2 : vector<2x16x15x4xbf16>, vector<2x16x1x4xbf16> -> vector<2x16x16x4xbf16>
    %c0_72 = arith.constant 0 : index
    %c1_73 = arith.constant 1 : index
    %c0_74 = arith.constant 0 : index
    %c8_75 = arith.constant 8 : index
    %67 = vector.load %arg9[%c0_72, %c1_73, %c0_74, %c8_75] : memref<2x18x16x12xbf16, #tpu.memory_space<vmem>>, vector<2x16x16x4xbf16>
    tpu.vector_store %arg9[%c0_72, %c1_73, %c0_74, %c8_75], %66 {strides = array<i32>} : memref<2x18x16x12xbf16, #tpu.memory_space<vmem>>, vector<2x16x16x4xbf16>,
    %cst_76 = arith.constant 0.000000e+00 : f32
    %68 = vector.broadcast %cst_76 : f32 to vector<512x4xf32>
    %c0_77 = arith.constant 0 : index
    %c0_78 = arith.constant 0 : index
    %c0_79 = arith.constant 0 : index
    %c0_80 = arith.constant 0 : index
    %69 = vector.load %arg9[%c0_77, %c0_78, %c0_79, %c0_80] : memref<2x18x16x12xbf16, #tpu.memory_space<vmem>>, vector<2x16x16x12xbf16>
    %70 = vector.shape_cast %69 : vector<2x16x16x12xbf16> to vector<512x12xbf16>
    %c0_81 = arith.constant 0 : index
    %c0_82 = arith.constant 0 : index
    %c0_83 = arith.constant 0 : index
    %71 = vector.load %arg5[%c0_81, %c0_82, %c0_83] : memref<3x12x4xbf16, #tpu.memory_space<vmem>>, vector<1x12x4xbf16>
    %72 = vector.shape_cast %71 : vector<1x12x4xbf16> to vector<12x4xbf16>
    %cst_84 = arith.constant dense<0.000000e+00> : vector<512x4xf32>
    %73 = tpu.matmul %70, %72, %cst_84 {dimension_numbers = #tpu.dot_dimension_numbers<[1], [0], [0], [1], [0, 0, 1, 1], [], []>} : vector<512x12xbf16>, vector<12x4xbf16>, vector<512x4xf32> -> vector<512x4xf32>
    %74 = arith.addf %68, %73 : vector<512x4xf32>
    %c0_85 = arith.constant 0 : index
    %c1_86 = arith.constant 1 : index
    %c0_87 = arith.constant 0 : index
    %c0_88 = arith.constant 0 : index
    %75 = vector.load %arg9[%c0_85, %c1_86, %c0_87, %c0_88] : memref<2x18x16x12xbf16, #tpu.memory_space<vmem>>, vector<2x16x16x12xbf16>
    %76 = vector.shape_cast %75 : vector<2x16x16x12xbf16> to vector<512x12xbf16>
    %c1_89 = arith.constant 1 : index
    %c0_90 = arith.constant 0 : index
    %c0_91 = arith.constant 0 : index
    %77 = vector.load %arg5[%c1_89, %c0_90, %c0_91] : memref<3x12x4xbf16, #tpu.memory_space<vmem>>, vector<1x12x4xbf16>
    %78 = vector.shape_cast %77 : vector<1x12x4xbf16> to vector<12x4xbf16>
    %cst_92 = arith.constant dense<0.000000e+00> : vector<512x4xf32>
    %79 = tpu.matmul %76, %78, %cst_92 {dimension_numbers = #tpu.dot_dimension_numbers<[1], [0], [0], [1], [0, 0, 1, 1], [], []>} : vector<512x12xbf16>, vector<12x4xbf16>, vector<512x4xf32> -> vector<512x4xf32>
    %80 = arith.addf %74, %79 : vector<512x4xf32>
    %c0_93 = arith.constant 0 : index
    %c2_94 = arith.constant 2 : index
    %c0_95 = arith.constant 0 : index
    %c0_96 = arith.constant 0 : index
    %81 = vector.load %arg9[%c0_93, %c2_94, %c0_95, %c0_96] : memref<2x18x16x12xbf16, #tpu.memory_space<vmem>>, vector<2x16x16x12xbf16>
    %82 = vector.shape_cast %81 : vector<2x16x16x12xbf16> to vector<512x12xbf16>
    %c2_97 = arith.constant 2 : index
    %c0_98 = arith.constant 0 : index
    %c0_99 = arith.constant 0 : index
    %83 = vector.load %arg5[%c2_97, %c0_98, %c0_99] : memref<3x12x4xbf16, #tpu.memory_space<vmem>>, vector<1x12x4xbf16>
    %84 = vector.shape_cast %83 : vector<1x12x4xbf16> to vector<12x4xbf16>
    %cst_100 = arith.constant dense<0.000000e+00> : vector<512x4xf32>
    %85 = tpu.matmul %82, %84, %cst_100 {dimension_numbers = #tpu.dot_dimension_numbers<[1], [0], [0], [1], [0, 0, 1, 1], [], []>} : vector<512x12xbf16>, vector<12x4xbf16>, vector<512x4xf32> -> vector<512x4xf32>
    %86 = arith.addf %80, %85 : vector<512x4xf32>
    %cst_101 = arith.constant dense<0.000000e+00> : vector<4xf32>
    %87 = vector.multi_reduction <add>, %86, %cst_101 [0] : vector<512x4xf32> to vector<4xf32>
    %88 = vector.shape_cast %87 : vector<4xf32> to vector<1x4xf32>
    %cst_102 = arith.constant 0.001953125 : f32
    %89 = vector.broadcast %cst_102 : f32 to vector<1x4xf32>
    %90 = arith.mulf %88, %89 : vector<1x4xf32>
    %91 = vector.broadcast %90 : vector<1x4xf32> to vector<512x4xf32>
    %92 = arith.subf %86, %91 : vector<512x4xf32>
    %93 = arith.mulf %92, %92 : vector<512x4xf32>
    %cst_103 = arith.constant dense<0.000000e+00> : vector<4xf32>
    %94 = vector.multi_reduction <add>, %93, %cst_103 [0] : vector<512x4xf32> to vector<4xf32>
    %95 = vector.shape_cast %94 : vector<4xf32> to vector<1x4xf32>
    %cst_104 = arith.constant 0.001953125 : f32
    %96 = vector.broadcast %cst_104 : f32 to vector<1x4xf32>
    %97 = arith.mulf %95, %96 : vector<1x4xf32>
    %c0_105 = arith.constant 0 : index
    %c0_106 = arith.constant 0 : index
    %98 = vector.load %arg6[%c0_105, %c0_106] : memref<1x4xf32, #tpu.memory_space<vmem>>, vector<1x4xf32>
    %cst_107 = arith.constant 9.99999974E-6 : f32
    %99 = vector.broadcast %cst_107 : f32 to vector<1x4xf32>
    %100 = arith.addf %97, %99 : vector<1x4xf32>
    %101 = math.rsqrt %100 : vector<1x4xf32>
    %102 = arith.mulf %98, %101 : vector<1x4xf32>
    %103 = vector.broadcast %102 : vector<1x4xf32> to vector<512x4xf32>
    %104 = arith.mulf %92, %103 : vector<512x4xf32>
    %c0_108 = arith.constant 0 : index
    %c0_109 = arith.constant 0 : index
    %105 = vector.load %arg7[%c0_108, %c0_109] : memref<1x4xf32, #tpu.memory_space<vmem>>, vector<1x4xf32>
    %106 = vector.broadcast %105 : vector<1x4xf32> to vector<512x4xf32>
    %107 = arith.addf %104, %106 : vector<512x4xf32>
    %c0_110 = arith.constant 0 : index
    %c0_111 = arith.constant 0 : index
    %c0_112 = arith.constant 0 : index
    %c0_113 = arith.constant 0 : index
    %108 = vector.load %arg1[%c0_110, %c0_111, %c0_112, %c0_113] : memref<2x16x16x4xf32, #tpu.memory_space<vmem>>, vector<2x16x16x4xf32>
    %109 = vector.shape_cast %108 : vector<2x16x16x4xf32> to vector<512x4xf32>
    %110 = arith.addf %107, %109 : vector<512x4xf32>
    %cst_114 = arith.constant 0.000000e+00 : f32
    %111 = vector.broadcast %cst_114 : f32 to vector<512x4xf32>
    %112 = arith.maximumf %110, %111 : vector<512x4xf32>
    %113 = vector.shape_cast %112 : vector<512x4xf32> to vector<2x16x16x4xf32>
    %c0_115 = arith.constant 0 : index
    %c0_116 = arith.constant 0 : index
    %c0_117 = arith.constant 0 : index
    %c0_118 = arith.constant 0 : index
    %114 = vector.load %arg8[%c0_115, %c0_116, %c0_117, %c0_118] : memref<2x16x16x4xf32, #tpu.memory_space<vmem>>, vector<2x16x16x4xf32>
    tpu.vector_store %arg8[%c0_115, %c0_116, %c0_117, %c0_118], %113 {strides = array<i32>} : memref<2x16x16x4xf32, #tpu.memory_space<vmem>>, vector<2x16x16x4xf32>,
    return
  }
  func.func @transform_0(%arg0: i32) -> (i32, i32, i32, i32) {
    %c0_i32 = arith.constant 0 : i32
    %c0_i32_0 = arith.constant 0 : i32
    %c0_i32_1 = arith.constant 0 : i32
    %c0_i32_2 = arith.constant 0 : i32
    %c0_i32_3 = arith.constant 0 : i32
    return %c0_i32, %c0_i32_0, %c0_i32_1, %c0_i32_2 : i32, i32, i32, i32
  }
  func.func @transform_1(%arg0: i32) -> (i32, i32, i32) {
    %c0_i32 = arith.constant 0 : i32
    %c0_i32_0 = arith.constant 0 : i32
    %c0_i32_1 = arith.constant 0 : i32
    %c0_i32_2 = arith.constant 0 : i32
    return %c0_i32, %c0_i32_0, %c0_i32_1 : i32, i32, i32
  }
  func.func @transform_2(%arg0: i32) -> (i32, i32) {
    %c0_i32 = arith.constant 0 : i32
    %c0_i32_0 = arith.constant 0 : i32
    %c0_i32_1 = arith.constant 0 : i32
    return %c0_i32, %c0_i32_0 : i32, i32
  }
  func.func @transform_3(%arg0: i32) -> (i32, i32) {
    %c0_i32 = arith.constant 0 : i32
    %c0_i32_0 = arith.constant 0 : i32
    %c0_i32_1 = arith.constant 0 : i32
    return %c0_i32, %c0_i32_0 : i32, i32
  }
  func.func @transform_4(%arg0: i32) -> (i32, i32, i32) {
    %c0_i32 = arith.constant 0 : i32
    %c0_i32_0 = arith.constant 0 : i32
    %c0_i32_1 = arith.constant 0 : i32
    %c0_i32_2 = arith.constant 0 : i32
    return %c0_i32, %c0_i32_0, %c0_i32_1 : i32, i32, i32
  }
  func.func @transform_5(%arg0: i32) -> (i32, i32) {
    %c0_i32 = arith.constant 0 : i32
    %c0_i32_0 = arith.constant 0 : i32
    %c0_i32_1 = arith.constant 0 : i32
    return %c0_i32, %c0_i32_0 : i32, i32
  }
  func.func @transform_6(%arg0: i32) -> (i32, i32) {
    %c0_i32 = arith.constant 0 : i32
    %c0_i32_0 = arith.constant 0 : i32
    %c0_i32_1 = arith.constant 0 : i32
    return %c0_i32, %c0_i32_0 : i32, i32
  }
  func.func @transform_7(%arg0: i32) -> (i32, i32, i32, i32) {
    %c0_i32 = arith.constant 0 : i32
    %c0_i32_0 = arith.constant 0 : i32
    %c0_i32_1 = arith.constant 0 : i32
    %c0_i32_2 = arith.constant 0 : i32
    %c0_i32_3 = arith.constant 0 : i32
    return %c0_i32, %c0_i32_0, %c0_i32_1, %c0_i32_2 : i32, i32, i32, i32
  }
}

</mosaic_0001>

<bundles_post_ra>
// kernel: tpu_custom_call.1
= control target key start
LH: loop header
LB: loop body
LE: loop exit
PB: predicated region body
PF: predicated region fallthrough
CT: control target
= control target key end

     0   :  { %12 = vsyncpa [#allocation4], 0  ;;  %s11827_s0 = inlined_call_operand.hbm [shape: f32[2,16,16,4], index: 0, kind: input, shape index: {}]   ;;  %s11828_s1 = inlined_call_operand.hbm [shape: bf16[3,12,4], index: 1, kind: input, shape index: {}]   ;;  %s11829_s2 = inlined_call_operand.hbm [shape: f32[1,4], index: 2, kind: input, shape index: {}]   ;;  %s11830_s3 = inlined_call_operand.hbm [shape: f32[1,4], index: 3, kind: input, shape index: {}]   ;;  %s11831_s4 = inlined_call_operand.hbm [shape: bf16[3,12,4], index: 4, kind: input, shape index: {}]   ;;  %s11832_s5 = inlined_call_operand.hbm [shape: f32[1,4], index: 5, kind: input, shape index: {}]   ;;  %s11833_s6 = inlined_call_operand.hbm [shape: f32[1,4], index: 6, kind: input, shape index: {}]   ;;  %s11834_s7 = inlined_call_operand.hbm [shape: f32[2,16,16,4], index: 7, kind: output, shape index: {}]  }
   0x1   :  { %13 = vsyncpa [#allocation7], 0 }
   0x2   :  { %14 = vsyncpa [#allocation10], 0 }
   0x3   :  { %15 = vsyncpa [#allocation13], 0 }
   0x4   :  { %16 = vsyncpa [#allocation5], 0  ;;  %s7182_s24 = smov [#allocation6]   ;;  %s6996_s28 = scalar_lea.hbm %s11828_s1, 384 }
   0x5   :  { %s34_s25 = sshll.u32 %s7182_s24, 4  ;;  %p6997_p0 = scmp.ne.s32.totalorder %s11828_s1, %s6996_s28  ;;  %s35_s25 = int_to_ptr.vmem [resolvable:$true] %s34_s25 }
   0x6   :  { %p7000_p1 = scmp.lt.u32.totalorder %s6996_s28, %s11828_s1 }
   0x8   :  { %p7002_p2 = pnand %p7000_p1, %p6997_p0 }
   0xa   :  { %7005 = shalt.err (!%p7002_p2)
}
   0xb   :  { %s7006_s10 = scalar_lea.vmem %s35_s25, 384  ;;  %p7011_p4 = scmp.lt.s32.totalorder %s35_s25, %s35_s25 }
   0xc   :  { %p7007_p3 = scmp.ne.s32.totalorder %s35_s25, %s7006_s10  ;;  %p7012_p5 = scmp.lt.s32.totalorder %s7006_s10, %s7006_s10 }
   0xe   :  { %p7013_p6 = por %p7012_p5, %p7011_p4 }
  0x10   :  { %p7014_p7 = pnand %p7013_p6, %p7007_p3 }
  0x12   :  { %7017 = shalt.err (!%p7014_p7)
}
  0x13   :  { %s7183_s11 = smov 64   ;;  %s7184_s12 = smov 4  }
  0x14   :  { %40 = dma.hbm_to_vmem [thread:$0]  %s11828_s1, 384, %s35_s25, [#allocation7], %s7183_s11, %s7183_s11, %s7184_s12  }
  0x15   :  { %s7185_s15 = smov [#allocation9]   ;;  %s7186_s17 = smov [#allocation12]  }
  0x16   :  { %s57_s16 = sshll.u32 %s7185_s15, 4  ;;  %s79_s18 = sshll.u32 %s7186_s17, 4  ;;  %s58_s16 = int_to_ptr.vmem [resolvable:$true] %s57_s16  ;;  %s80_s18 = int_to_ptr.vmem [resolvable:$true] %s79_s18 }
  0x17   :  { %s7018_s21 = scalar_lea.hbm %s11830_s3, 16 }
  0x18   :  { %p7019_p8 = scmp.ne.s32.totalorder %s11830_s3, %s7018_s21  ;;  %p7022_p9 = scmp.lt.u32.totalorder %s7018_s21, %s11830_s3 }
  0x1a   :  { %p7024_p10 = pnand %p7022_p9, %p7019_p8 }
  0x1c   :  { %7027 = shalt.err (!%p7024_p10)
}
  0x1d   :  { %s7028_s1 = scalar_lea.vmem %s58_s16, 16  ;;  %s7032_s25 = scalar_lea.vmem %s58_s16, 32 }
  0x1e   :  { %p7029_p11 = scmp.ne.s32.totalorder %s58_s16, %s7028_s1  ;;  %p7033_p12 = scmp.lt.s32.totalorder %s58_s16, %s58_s16 }
  0x1f   :  { %p7034_p13 = scmp.lt.s32.totalorder %s7032_s25, %s7028_s1 }
  0x21   :  { %p7035_p0 = por %p7034_p13, %p7033_p12 }
  0x23   :  { %p7036_p1 = pnand %p7035_p0, %p7029_p11 }
  0x25   :  { %7039 = shalt.err (!%p7036_p1)
}
  0x26   :  { %60 = dma.hbm_to_vmem [thread:$0]  %s11830_s3, 16, %s58_s16, [#allocation10]  }
  0x27   :  { %s7040_s8 = scalar_lea.hbm %s11832_s5, 16 }
  0x28   :  { %p7041_p2 = scmp.ne.s32.totalorder %s11832_s5, %s7040_s8  ;;  %p7044_p3 = scmp.lt.u32.totalorder %s7040_s8, %s11832_s5 }
  0x2a   :  { %p7046_p4 = pnand %p7044_p3, %p7041_p2 }
  0x2c   :  { %7049 = shalt.err (!%p7046_p4)
}
  0x2d   :  { %s7050_s15 = scalar_lea.vmem %s80_s18, 16  ;;  %s7054_s17 = scalar_lea.vmem %s80_s18, 32 }
  0x2e   :  { %p7051_p5 = scmp.ne.s32.totalorder %s80_s18, %s7050_s15  ;;  %p7055_p6 = scmp.lt.s32.totalorder %s80_s18, %s80_s18 }
  0x2f   :  { %p7056_p7 = scmp.lt.s32.totalorder %s7054_s17, %s7050_s15 }
  0x31   :  { %p7057_p8 = por %p7056_p7, %p7055_p6 }
  0x33   :  { %p7058_p9 = pnand %p7057_p8, %p7051_p5 }
  0x35   :  { %7061 = shalt.err (!%p7058_p9)
}
  0x36   :  { %82 = dma.hbm_to_vmem [thread:$0]  %s11832_s5, 16, %s80_s18, [#allocation13]  }
  0x37   :  { %s7187_s19 = smov [#allocation3]   ;;  %s7062_s23 = scalar_lea.hbm %s11827_s0, 8192 }
  0x38   :  { %s22_s20 = sshll.u32 %s7187_s19, 4  ;;  %p7063_p10 = scmp.ne.s32.totalorder %s11827_s0, %s7062_s23  ;;  %s23_s20 = int_to_ptr.vmem [resolvable:$true] %s22_s20 }
  0x39   :  { %p7066_p11 = scmp.lt.u32.totalorder %s7062_s23, %s11827_s0 }
  0x3b   :  { %p7068_p12 = pnand %p7066_p11, %p7063_p10 }
  0x3d   :  { %7071 = shalt.err (!%p7068_p12)
}
  0x3e   :  { %s7072_s27 = scalar_lea.vmem %s23_s20, 8192  ;;  %p7077_p0 = scmp.lt.s32.totalorder %s23_s20, %s23_s20 }
  0x3f   :  { %p7073_p13 = scmp.ne.s32.totalorder %s23_s20, %s7072_s27  ;;  %p7078_p1 = scmp.lt.s32.totalorder %s7072_s27, %s7072_s27 }
  0x41   :  { %p7079_p2 = por %p7078_p1, %p7077_p0 }
  0x43   :  { %p7080_p3 = pnand %p7079_p2, %p7073_p13 }
  0x45   :  { %7083 = shalt.err (!%p7080_p3)
}
  0x46   :  { %s7188_s5 = smov 128   ;;  %s7189_s18 = smov 8  }
  0x47   :  { %28 = dma.hbm_to_vmem [thread:$0]  %s11827_s0, 8192, %s23_s20, [#allocation4], %s7188_s5, %s7188_s5, %s7189_s18  }
  0x48   :  { %s7190_s30 = smov [#allocation8]   ;;  %s7191_s9 = smov [#allocation11]  }
  0x49   :  { %s47_s8 = sshll.u32 %s7190_s30, 4  ;;  %s66_s10 = sshll.u32 %s7191_s9, 4  ;;  %s48_s8 = int_to_ptr.vmem [resolvable:$true] %s47_s8  ;;  %s7289_s10 = int_to_ptr.vmem [resolvable:$true] %s66_s10 }
  0x4a   :  { %s7084_s15 = scalar_lea.hbm %s11829_s2, 16 }
  0x4b   :  { %p7085_p4 = scmp.ne.s32.totalorder %s11829_s2, %s7084_s15  ;;  %p7088_p5 = scmp.lt.u32.totalorder %s7084_s15, %s11829_s2 }
  0x4d   :  { %p7090_p6 = pnand %p7088_p5, %p7085_p4 }
  0x4f   :  { %7093 = shalt.err (!%p7090_p6)
}
  0x50   :  { %s7094_s0 = scalar_lea.vmem %s48_s8, 16  ;;  %s7098_s20 = scalar_lea.vmem %s48_s8, 32 }
  0x51   :  { %p7095_p7 = scmp.ne.s32.totalorder %s48_s8, %s7094_s0  ;;  %p7099_p8 = scmp.lt.s32.totalorder %s48_s8, %s48_s8 }
  0x52   :  { %p7100_p9 = scmp.lt.s32.totalorder %s7098_s20, %s7094_s0 }
  0x54   :  { %p7101_p10 = por %p7100_p9, %p7099_p8 }
  0x56   :  { %p7102_p11 = pnand %p7101_p10, %p7095_p7 }
  0x58   :  { %7105 = shalt.err (!%p7102_p11)
}
  0x59   :  { %50 = dma.hbm_to_vmem [thread:$0]  %s11829_s2, 16, %s48_s8, [#allocation7]  }
  0x5a   :  { %s7106_s26 = scalar_lea.hbm %s11831_s4, 384 }
  0x5b   :  { %p7107_p12 = scmp.ne.s32.totalorder %s11831_s4, %s7106_s26  ;;  %p7110_p13 = scmp.lt.u32.totalorder %s7106_s26, %s11831_s4 }
  0x5d   :  { %p7112_p0 = pnand %p7110_p13, %p7107_p12 }
  0x5f   :  { %7115 = shalt.err (!%p7112_p0)
}
  0x60   :  { %s7116_s29 = scalar_lea.vmem %s7289_s10, 384  ;;  %p7121_p2 = scmp.lt.s32.totalorder %s7289_s10, %s7289_s10 }
  0x61   :  { %p7117_p1 = scmp.ne.s32.totalorder %s7289_s10, %s7116_s29  ;;  %p7122_p3 = scmp.lt.s32.totalorder %s7116_s29, %s7116_s29 }
  0x63   :  { %p7123_p4 = por %p7122_p3, %p7121_p2 }
  0x65   :  { %p7124_p5 = pnand %p7123_p4, %p7117_p1 }
  0x67   :  { %7127 = shalt.err (!%p7124_p5)
}
  0x68   :  { %72 = dma.hbm_to_vmem [thread:$0]  %s11831_s4, 384, %s7289_s10, [#allocation10], %s7183_s11, %s7183_s11, %s7184_s12  }
  0x69   :  { %s7192_s8 = smov [#allocation14]   ;;  %s7128_s15 = scalar_lea.hbm %s11833_s6, 16 }
  0x6a   :  { %s89_s9 = sshll.u32 %s7192_s8, 4  ;;  %p7129_p6 = scmp.ne.s32.totalorder %s11833_s6, %s7128_s15  ;;  %s90_s9 = int_to_ptr.vmem [resolvable:$true] %s89_s9 }
  0x6b   :  { %p7132_p7 = scmp.lt.u32.totalorder %s7128_s15, %s11833_s6 }
  0x6d   :  { %p7134_p8 = pnand %p7132_p7, %p7129_p6 }
  0x6f   :  { %7137 = shalt.err (!%p7134_p8)
}
  0x70   :  { %s7138_s0 = scalar_lea.vmem %s90_s9, 16  ;;  %s7142_s4 = scalar_lea.vmem %s90_s9, 32 }
  0x71   :  { %p7139_p9 = scmp.ne.s32.totalorder %s90_s9, %s7138_s0  ;;  %p7143_p10 = scmp.lt.s32.totalorder %s90_s9, %s90_s9 }
  0x72   :  { %p7144_p11 = scmp.lt.s32.totalorder %s7142_s4, %s7138_s0 }
  0x74   :  { %p7145_p12 = por %p7144_p11, %p7143_p10 }
  0x76   :  { %p7146_p13 = pnand %p7145_p12, %p7139_p9 }
  0x78   :  { %7149 = shalt.err (!%p7146_p13)
}
  0x79   :  { %92 = dma.hbm_to_vmem [thread:$0]  %s11833_s6, 16, %s90_s9, [#allocation13]  }
  0x7a   :  { %7172 = dma.done.wait [#allocation4], 8192  }
  0x7b   :  { %7173 = vsyncadd [#allocation4], 4294959104 }
  0x7c   :  { %7174 = dma.done.wait [#allocation7], 400  }
  0x7d   :  { %7175 = vsyncadd [#allocation7], 4294966896 }
  0x7e   :  { %7176 = dma.done.wait [#allocation10], 400  }
  0x7f   :  { %7177 = vsyncadd [#allocation10], 4294966896 }
  0x80   :  { %7178 = dma.done.wait [#allocation13], 32  }
  0x81   :  { %7179 = vsyncadd [#allocation13], 4294967264  ;;  %v121_v0 = vld [vmem:[#allocation3] sm:$0xff]  ;;  %v122_v1 = vld [vmem:[#allocation3 + $0x8] sm:$0xff]  ;;  %vm799_vm0 = vcmask 1047552   ;;  %v11915_v19 = vmov 0 }
  0x82   :  { %v123_v2 = vld [vmem:[#allocation3 + $0x10] sm:$0xff]  ;;  %v7335_v3 = vpack.c.bf16 %v122_v1, %v121_v0  ;;  %v124_v4 = vld [vmem:[#allocation3 + $0x18] sm:$0xff]  ;;  %v125_v5 = vld [vmem:[#allocation3 + $0x20] sm:$0xff]  ;;  %vm800_vm1 = vsmask.f32 7424  ;;  %vm1165_vm3 = vcmask 1045504  }
  0x83   :  { %v126_v6 = vld [vmem:[#allocation3 + $0x28] sm:$0xff]  ;;  %v7337_v7 = vpack.c.bf16 %v124_v4, %v123_v2  ;;  %v127_v9 = vld [vmem:[#allocation3 + $0x30] sm:$0xff]  ;;  %v128_v10 = vld [vmem:[#allocation3 + $0x38] sm:$0xff]  ;;  %vm473_vm4 = vcmask 1040384   ;;  %vm474_vm5 = vsmask.f32 256 }
  0x84   :  { %v7339_v8 = vpack.c.bf16 %v126_v6, %v125_v5  ;;  %574 = vrot.lane.b32.xlu0 %v7335_v3, %s7184_s12  ;;  %v218_v11 = vshrl.u32 %v7335_v3, 16  ;;  %v221_v12 = vshll.u32 %v7335_v3, 16  ;;  %v7345_v13 = vpack.c.bf16 %v128_v10, %v127_v9  ;;  %vm7354_vm2 = vmand %vm799_vm0, %vm800_vm1  ;;  %v129_v22 = vld [vmem:[#allocation3 + $0x40] sm:$0xff]  ;;  %v130_v23 = vld [vmem:[#allocation3 + $0x48] sm:$0xff]  ;;  %s7194_s6 = smov [#allocation15]  }
  0x85   :  { %v225_v14 = vshrl.u32 %v7337_v7, 16  ;;  %v228_v15 = vshll.u32 %v7337_v7, 16  ;;  %v11916_v19 = vsel %vm7354_vm2, 4294967295, %v11915_v19  ;;  %v131_v28 = vld [vmem:[#allocation3 + $0x50] sm:$0xff]  ;;  %v132_v29 = vld [vmem:[#allocation3 + $0x58] sm:$0xff]  ;;  %v7373_v31 = vpack.c.bf16 %v130_v23, %v129_v22  ;;  %v133_v32 = vld [vmem:[#allocation3 + $0x60] sm:$0xff] }
  0x86   :  { %v232_v16 = vshrl.u32 %v7339_v8, 16  ;;  %v235_v17 = vshll.u32 %v7339_v8, 16  ;;  %v703_v18 = vrot.slane %v221_v12, 1  ;;  %11917 = vst [vmem:[#allocation21_spill] sm:$0xff] %v11916_v19  ;;  %v242_v25 = vshll.u32 %v7345_v13, 16  ;;  %v134_v33 = vld [vmem:[#allocation3 + $0x68] sm:$0xff]  ;;  %vm7602_vm7 = vmand %vm473_vm4, %vm474_vm5 }
  0x87   :  { %v705_v20 = vrot.slane %v228_v15, 1  ;;  %v239_v34 = vshrl.u32 %v7345_v13, 16  ;;  %v7383_v37 = vpack.c.bf16 %v132_v29, %v131_v28  ;;  %v249_v38 = vshll.u32 %v7373_v31, 16  ;;  %v135_v46 = vld [vmem:[#allocation3 + $0x70] sm:$0xff]  ;;  %v136_v47 = vld [vmem:[#allocation3 + $0x78] sm:$0xff]  ;;  %v137_v49 = vld [vmem:[#allocation3 + $0x80] sm:$0xff] }
  0x88   :  { %v707_v21 = vrot.slane %v235_v17, 1  ;;  %v704_v24 = vor.u32 %v703_v18, %v218_v11  ;;  %576 = vrot.lane.b32.xlu0 %v7337_v7, %s7184_s12  ;;  %v709_v36 = vrot.slane %v242_v25, 1  ;;  %v246_v40 = vshrl.u32 %v7373_v31, 16  ;;  %v138_v50 = vld [vmem:[#allocation3 + $0x88] sm:$0xff]  ;;  %v139_v61 = vld [vmem:[#allocation3 + $0x90] sm:$0xff]  ;;  %v140_v62 = vld [vmem:[#allocation3 + $0x98] sm:$0xff] }
  0x89   :  { %v706_v26 = vor.u32 %v705_v20, %v225_v14  ;;  %v7389_v41 = vpack.c.bf16 %v134_v33, %v133_v32  ;;  %v711_v42 = vrot.slane %v249_v38, 1  ;;  %v256_v44 = vshll.u32 %v7383_v37, 16  ;;  %v141_v1 = vld [vmem:[#allocation3 + $0xa0] sm:$0xff]  ;;  %v142_v2 = vld [vmem:[#allocation3 + $0xa8] sm:$0xff]  ;;  %v144_v28 = vld [vmem:[#allocation3 + $0xb8] sm:$0xff] }
  0x8a   :  { %v708_v27 = vor.u32 %v707_v21, %v232_v16  ;;  %v802_v30 = vsel %vm7354_vm2, %v704_v24, 0  ;;  %v710_v43 = vor.u32 %v709_v36, %v239_v34  ;;  %v253_v52 = vshrl.u32 %v7383_v37, 16  ;;  %v7427_v4 = vld [vmem:[#allocation6 + $0x8] sm:$0x3f]  }
  0x8b   :  { %866 = vrot.lane.b32.xlu1 %v802_v30, %s7189_s18  ;;  %v803_v35 = vsel %vm7354_vm2, %v706_v26, 0  ;;  %v712_v45 = vor.u32 %v711_v42, %v246_v40  ;;  %v263_v48 = vshll.u32 %v7389_v41, 16  ;;  %v713_v53 = vrot.slane %v256_v44, 1  ;;  %6967 = vmatprep.subr.msk.bf16.mxu0 %vm1165_vm3, %v7427_v4  ;;  %v143_v26 = vld [vmem:[#allocation3 + $0xb0] sm:$0xff]  ;;  %v145_v30 = vld [vmem:[#allocation3 + $0xc0] sm:$0xff]  ;;  %v146_v32 = vld [vmem:[#allocation3 + $0xc8] sm:$0xff] }
  0x8c   :  { %578 = vrot.lane.b32.xlu0 %v7339_v8, %s7184_s12  ;;  %v804_v39 = vsel %vm7354_vm2, %v708_v27, 0  ;;  %v805_v51 = vsel %vm7354_vm2, %v710_v43, 0  ;;  %v7410_v54 = vpack.c.bf16 %v136_v47, %v135_v46  ;;  %v260_v56 = vshrl.u32 %v7389_v41, 16  ;;  %v147_v47 = vld [vmem:[#allocation3 + $0xd0] sm:$0xff] }
  0x8d   :  { %v806_v55 = vsel %vm7354_vm2, %v712_v45, 0  ;;  %v715_v57 = vrot.slane %v263_v48, 1  ;;  %v7417_v58 = vpack.c.bf16 %v138_v50, %v137_v49  ;;  %v714_v59 = vor.u32 %v713_v53, %v253_v52  ;;  %v148_v49 = vld [vmem:[#allocation3 + $0xd8] sm:$0xff]  ;;  %v149_v53 = vld [vmem:[#allocation3 + $0xe0] sm:$0xff] }
  0x8e   :  { %v270_v60 = vshll.u32 %v7410_v54, 16  ;;  %v267_v6 = vshrl.u32 %v7410_v54, 16  ;;  %v7438_v10 = vpack.c.bf16 %v140_v62, %v139_v61  ;;  %v7447_v22 = vpack.c.bf16 %v142_v2, %v141_v1 }
  0x8f   :  { %868 = vrot.lane.b32.xlu1 %v803_v35, %s7189_s18  ;;  %v716_v63 = vor.u32 %v715_v57, %v260_v56  ;;  %v277_v0 = vshll.u32 %v7417_v58, 16  ;;  %v807_v5 = vsel %vm7354_vm2, %v714_v59, 0  ;;  %v274_v20 = vshrl.u32 %v7417_v58, 16 }
  0x90   :  { %870 = vrot.lane.b32.xlu0 %v804_v39, %s7189_s18  ;;  %v717_v9 = vrot.slane %v270_v60, 1  ;;  %v284_v24 = vshll.u32 %v7438_v10, 16  ;;  %v291_v29 = vshll.u32 %v7447_v22, 16  ;;  %v281_v35 = vshrl.u32 %v7438_v10, 16 }
  0x91   :  { %v808_v18 = vsel %vm7354_vm2, %v716_v63, 0  ;;  %v719_v21 = vrot.slane %v277_v0, 1  ;;  %v7466_v39 = vpack.c.bf16 %v144_v28, %v143_v26  ;;  %v288_v43 = vshrl.u32 %v7447_v22, 16 }
  0x92   :  { %v718_v23 = vor.u32 %v717_v9, %v267_v6  ;;  %v721_v36 = vrot.slane %v284_v24, 1  ;;  %v723_v45 = vrot.slane %v291_v29, 1  ;;  %v7473_v46 = vpack.c.bf16 %v146_v32, %v145_v30  ;;  %v151_v9 = vld [vmem:[#allocation3 + $0xf0] sm:$0xff]  ;;  %v153_v30 = vld [vmem:[#allocation3 + $0x100] sm:$0xff]  ;;  %v154_v32 = vld [vmem:[#allocation3 + $0x108] sm:$0xff] }
  0x93   :  { %580 = vrot.lane.b32.xlu1 %v7345_v13, %s7184_s12  ;;  %v720_v27 = vor.u32 %v719_v21, %v274_v20  ;;  %v220_v61 = vrot.slane %v218_v11, 7  ;;  %v7481_v62 = vpack.c.bf16 %v148_v49, %v147_v47  ;;  %v227_v63 = vrot.slane %v225_v14, 7 }
  0x94   :  { %582 = vrot.lane.b32.xlu0 %v7373_v31, %s7184_s12  ;;  %v809_v33 = vsel %vm7354_vm2, %v718_v23, 0  ;;  %v722_v50 = vor.u32 %v721_v36, %v281_v35  ;;  %v724_v57 = vor.u32 %v723_v45, %v288_v43  ;;  %v305_v59 = vshll.u32 %v7473_v46, 16 }
  0x95   :  { %v810_v42 = vsel %vm7354_vm2, %v720_v27, 0  ;;  %v234_v1 = vrot.slane %v232_v16, 7  ;;  %v241_v2 = vrot.slane %v239_v34, 7  ;;  %v248_v11 = vrot.slane %v246_v40, 7 }
  0x96   :  { %v811_v21 = vsel %vm7354_vm2, %v722_v50, 0  ;;  %v295_v14 = vshrl.u32 %v7466_v39, 16  ;;  %v255_v34 = vrot.slane %v253_v52, 7  ;;  %v812_v23 = vsel %vm7354_vm2, %v724_v57, 0 }
  0x97   :  { %872 = vrot.lane.b32.xlu1 %v805_v51, %s7189_s18  ;;  %v298_v51 = vshll.u32 %v7466_v39, 16  ;;  %v302_v26 = vshrl.u32 %v7473_v46, 16  ;;  %v727_v40 = vrot.slane %v305_v59, 1  ;;  %v312_v27 = vshll.u32 %v7481_v62, 16 }
  0x98   :  { %874 = vrot.lane.b32.xlu0 %v806_v55, %s7189_s18  ;;  %v150_v55 = vld [vmem:[#allocation3 + $0xe8] sm:$0xff]  ;;  %v7518_v52 = vor.u32 %v228_v15, %v227_v63  ;;  %v7522_v36 = vor.u32 %v235_v17, %v234_v1  ;;  %v7528_v45 = vor.u32 %v242_v25, %v241_v2  ;;  %v7532_v3 = vor.u32 %v249_v38, %v248_v11 }
  0x99   :  { %v725_v16 = vrot.slane %v298_v51, 1  ;;  %v262_v7 = vrot.slane %v260_v56, 7  ;;  %v269_v15 = vrot.slane %v267_v6, 7  ;;  %v728_v13 = vor.u32 %v727_v40, %v302_v26  ;;  %v158_v63 = vld [vmem:[#allocation3 + $0x128] sm:$0xff]  ;;  %v161_v40 = vld [vmem:[#allocation3 + $0x140] sm:$0xff] }
  0x9a   :  { %v7543_v17 = vpack.c.bf16 %v154_v32, %v153_v30  ;;  %vm509_vm6 = vcmask 31744   ;;  %v276_v25 = vrot.slane %v274_v20, 7  ;;  %v309_v31 = vshrl.u32 %v7481_v62, 16  ;;  %v162_v30 = vld [vmem:[#allocation3 + $0x148] sm:$0xff] }
  0x9b   :  { %584 = vrot.lane.b32.xlu1 %v7383_v37, %s7184_s12  ;;  %v726_v8 = vor.u32 %v725_v16, %v295_v14  ;;  %v729_v38 = vrot.slane %v312_v27, 1  ;;  %v155_v37 = vld [vmem:[#allocation3 + $0x110] sm:$0xff]  ;;  %v283_v47 = vrot.slane %v281_v35, 7  ;;  %v290_v6 = vrot.slane %v288_v43, 7  ;;  %v160_v16 = vld [vmem:[#allocation3 + $0x138] sm:$0xff] }
  0x9c   :  { %586 = vrot.lane.b32.xlu0 %v7389_v41, %s7184_s12  ;;  %v7558_v20 = vor.u32 %v263_v48, %v262_v7  ;;  %v304_v35 = vrot.slane %v302_v26, 7  ;;  %v7566_v43 = vor.u32 %v270_v60, %v269_v15  ;;  %v814_v57 = vsel %vm7354_vm2, %v728_v13, 0  ;;  %v157_v48 = vld [vmem:[#allocation3 + $0x120] sm:$0xff]  ;;  %v164_v15 = vld [vmem:[#allocation3 + $0x158] sm:$0xff] }
  0x9d   :  { %v333_v41 = vshll.u32 %v7543_v17, 16  ;;  %v311_v1 = vrot.slane %v309_v31, 7  ;;  %v730_v2 = vor.u32 %v729_v38, %v309_v31  ;;  %v7582_v60 = vor.u32 %v284_v24, %v283_v47 }
  0x9e   :  { %v7586_v11 = vor.u32 %v291_v29, %v290_v6  ;;  %v330_v29 = vshrl.u32 %v7543_v17, 16  ;;  %v477_v38 = vsel %vm7602_vm7, 0, %v7518_v52  ;;  %v7642_v6 = vld [vmem:[#allocation6] sm:$0x3f]   ;;  %v479_v52 = vsel %vm7602_vm7, 0, %v7528_v45 }
  0x9f   :  { %876 = vrot.lane.b32.xlu1 %v807_v5, %s7189_s18  ;;  %v7491_v5 = vpack.c.bf16 %v150_v55, %v149_v53  ;;  %v297_v53 = vrot.slane %v295_v14, 7  ;;  %v813_v55 = vsel %vm7354_vm2, %v726_v8, 0  ;;  %v159_v14 = vld [vmem:[#allocation3 + $0x130] sm:$0xff]  ;;  %511 = vst.msk [vmem:[#allocation2 + $0x10] sm:$0xff] %vm509_vm6, %v477_v38  ;;  %513 = vst.msk [vmem:[#allocation2 + $0x20] sm:$0xff] %vm509_vm6, %v479_v52  ;;  %vm670_vm8 = vcmask 64544  }
  0xa0   :  { %878 = vrot.lane.b32.xlu0 %v808_v18, %s7189_s18  ;;  %v152_v18 = vld [vmem:[#allocation3 + $0xf8] sm:$0xff]  ;;  %v7618_v26 = vpack.c.bf16 %v160_v16, %v159_v14  ;;  %v163_v8 = vld [vmem:[#allocation3 + $0x150] sm:$0xff]  ;;  %vm962_vm9 = vcmask 97344   ;;  %vm115_vm10 = vcmask 97280  }
  0xa1   :  { %v7510_v28 = vpack.c.bf16 %v152_v18, %v151_v9  ;;  %v316_v49 = vshrl.u32 %v7491_v5, 16 }
  0xa3   :  { %588 = vrot.lane.b32.xlu1 %v7410_v54, %s7184_s12  ;;  %v326_v56 = vshll.u32 %v7510_v28, 16  ;;  %v323_v9 = vshrl.u32 %v7510_v28, 16  ;;  %v7578_v54 = vor.u32 %v277_v0, %v276_v25  ;;  %v318_v0 = vrot.slane %v316_v49, 7 }
  0xa4   :  { %590 = vrot.lane.b32.xlu0 %v7417_v58, %s7184_s12  ;;  %v7595_v58 = vor.u32 %v305_v59, %v304_v35  ;;  %v815_v59 = vsel %vm7354_vm2, %v730_v2, 0  ;;  %v332_v25 = vrot.slane %v330_v29, 7 }
  0xa5   :  { %v733_v18 = vrot.slane %v326_v56, 1  ;;  %v325_v24 = vrot.slane %v323_v9, 7 }
  0xa7   :  { %880 = vrot.lane.b32.xlu1 %v809_v33, %s7189_s18  ;;  %v7514_v33 = vor.u32 %v221_v12, %v220_v61  ;;  %v7539_v12 = vor.u32 %v256_v44, %v255_v34  ;;  %v156_v44 = vld [vmem:[#allocation3 + $0x118] sm:$0xff]  ;;  %v7591_v34 = vor.u32 %v298_v51, %v297_v53  ;;  %v7612_v51 = vor.u32 %v312_v27, %v311_v1 }
  0xa8   :  { %882 = vrot.lane.b32.xlu0 %v810_v42, %s7189_s18  ;;  %v319_v42 = vshll.u32 %v7491_v5, 16  ;;  %v7570_v61 = vpack.c.bf16 %v156_v44, %v155_v37  ;;  %v478_v53 = vsel %vm7602_vm7, 0, %v7522_v36  ;;  %v328_v35 = vor.u32 %v326_v56, %v325_v24 }
  0xa9   :  { %v476_v13 = vsel %vm7602_vm7, 0, %v7514_v33  ;;  %512 = vst.msk [vmem:[#allocation2 + $0x18] sm:$0xff] %vm509_vm6, %v478_v53  ;;  %v1167_v36 = vsel %vm1165_vm3, %v7427_v4, 0  ;;  %v335_v1 = vor.u32 %v333_v41, %v332_v25  ;;  %v172_v53 = vld [vmem:[#allocation3 + $0x198] sm:$0xff] }
  0xaa   :  { %v731_v50 = vrot.slane %v319_v42, 1  ;;  %v337_v7 = vshrl.u32 %v7570_v61, 16  ;;  %510 = vst.msk [vmem:[#allocation2 + $0x8] sm:$0xff] %vm509_vm6, %v476_v13  ;;  %6316 = vmatpush3.bf16.msra.mxu0 %v1167_v36 }
  0xab   :  { %592 = vrot.lane.b32.xlu1 %v7438_v10, %s7184_s12  ;;  %v7598_v10 = vpack.c.bf16 %v158_v63, %v157_v48  ;;  %v165_v48 = vld [vmem:[#allocation3 + $0x160] sm:$0xff]  ;;  %v166_v63 = vld [vmem:[#allocation3 + $0x168] sm:$0xff]  ;;  %6968 = vmatprep.subr.msk.bf16.mxu0 %vm1165_vm3, %v7642_v6 }
  0xac   :  { %594 = vrot.lane.b32.xlu0 %v7447_v22, %s7184_s12  ;;  %v11918_v22 = vmov 0  ;;  %v339_v44 = vrot.slane %v337_v7, 7 }
  0xad   :  { %v11919_v22 = vsel %vm7602_vm7, 4294967295, %v11918_v22  ;;  %v344_v27 = vshrl.u32 %v7598_v10, 16  ;;  %v347_v31 = vshll.u32 %v7598_v10, 16 }
  0xae   :  { %11920 = vst [vmem:[#allocation22_spill] sm:$0xff] %v11919_v22 }
  0xaf   :  { %884 = vrot.lane.b32.xlu1 %v811_v21, %s7189_s18  ;;  %v732_v21 = vor.u32 %v731_v50, %v316_v49  ;;  %v346_v33 = vrot.slane %v344_v27, 7  ;;  %v7644_v49 = vpack.c.bf16 %v162_v30, %v161_v40  ;;  %v7646_v50 = vpack.c.bf16 %v164_v15, %v163_v8 }
  0xb0   :  { %886 = vrot.lane.b32.xlu0 %v812_v23, %s7189_s18  ;;  %v7616_v23 = vor.u32 %v733_v18, %v323_v9  ;;  %v739_v9 = vrot.slane %v347_v31, 1  ;;  %v167_v18 = vld [vmem:[#allocation3 + $0x170] sm:$0xff]  ;;  %v482_v40 = vsel %vm7602_vm7, 0, %v7558_v20 }
  0xb1   :  { %v816_v32 = vsel %vm7354_vm2, %v732_v21, 0  ;;  %v358_v45 = vshrl.u32 %v7644_v49, 16  ;;  %v365_v56 = vshrl.u32 %v7646_v50, 16  ;;  %v168_v21 = vld [vmem:[#allocation3 + $0x178] sm:$0xff]  ;;  %v349_v16 = vor.u32 %v347_v31, %v346_v33  ;;  %516 = vst.msk [vmem:[#allocation2 + $0x38] sm:$0xff] %vm509_vm6, %v482_v40  ;;  %v171_v33 = vld [vmem:[#allocation3 + $0x190] sm:$0xff] }
  0xb2   :  { %v740_v13 = vor.u32 %v739_v9, %v344_v27 }
  0xb3   :  { %596 = vrot.lane.b32.xlu1 %v7466_v39, %s7184_s12  ;;  %v735_v39 = vrot.slane %v333_v41, 1  ;;  %v367_v41 = vrot.slane %v365_v56, 7  ;;  %v494_v15 = vsel %vm7602_vm7, 0, %v349_v16 }
  0xb4   :  { %598 = vrot.lane.b32.xlu0 %v7473_v46, %s7184_s12  ;;  %v340_v46 = vshll.u32 %v7570_v61, 16  ;;  %528 = vst.msk [vmem:[#allocation2 + $0xa8] sm:$0xff] %vm509_vm6, %v494_v15 }
  0xb5   :  { %v7637_v37 = vor.u32 %v735_v39, %v330_v29  ;;  %v361_v29 = vshll.u32 %v7644_v49, 16  ;;  %v7690_v39 = vpack.c.bf16 %v166_v63, %v165_v48 }
  0xb6   :  { %v737_v47 = vrot.slane %v340_v46, 1  ;;  %v342_v2 = vor.u32 %v340_v46, %v339_v44  ;;  %v480_v46 = vsel %vm7602_vm7, 0, %v7532_v3  ;;  %v483_v3 = vsel %vm7602_vm7, 0, %v7566_v43 }
  0xb7   :  { %888 = vrot.lane.b32.xlu1 %v813_v55, %s7189_s18  ;;  %v321_v55 = vor.u32 %v319_v42, %v318_v0  ;;  %v354_v42 = vshll.u32 %v7618_v26, 16  ;;  %v818_v14 = vsel %vm7354_vm2, %v7637_v37, 0  ;;  %v360_v0 = vrot.slane %v358_v45, 7  ;;  %514 = vst.msk [vmem:[#allocation2 + $0x28] sm:$0xff] %vm509_vm6, %v480_v46  ;;  %517 = vst.msk [vmem:[#allocation2 + $0x40] sm:$0xff] %vm509_vm6, %v483_v3  ;;  %v169_v37 = vld [vmem:[#allocation3 + $0x180] sm:$0xff] }
  0xb8   :  { %890 = vrot.lane.b32.xlu0 %v814_v57, %s7189_s18  ;;  %v7674_v4 = vor.u32 %v737_v47, %v337_v7  ;;  %v372_v30 = vshrl.u32 %v7690_v39, 16  ;;  %v486_v43 = vsel %vm7602_vm7, 0, %v7586_v11  ;;  %v489_v7 = vsel %vm7602_vm7, 0, %v7612_v51  ;;  %v170_v47 = vld [vmem:[#allocation3 + $0x188] sm:$0xff] }
  0xb9   :  { %520 = vst.msk [vmem:[#allocation2 + $0x58] sm:$0xff] %vm509_vm6, %v486_v43  ;;  %v490_v11 = vsel %vm7602_vm7, 0, %v321_v55  ;;  %523 = vst.msk [vmem:[#allocation2 + $0x70] sm:$0xff] %vm509_vm6, %v489_v7  ;;  %v493_v51 = vsel %vm7602_vm7, 0, %v342_v2  ;;  %v741_v55 = vrot.slane %v354_v42, 1  ;;  %v743_v36 = vrot.slane %v361_v29, 1 }
  0xba   :  { %524 = vst.msk [vmem:[#allocation2 + $0x78] sm:$0xff] %vm509_vm6, %v490_v11  ;;  %527 = vst.msk [vmem:[#allocation2 + $0xa0] sm:$0xff] %vm509_vm6, %v493_v51  ;;  %v374_v31 = vrot.slane %v372_v30, 7  ;;  %v819_v52 = vsel %vm7354_vm2, %v7674_v4, 0  ;;  %v7786_v63 = vpack.c.bf16 %v170_v47, %v169_v37 }
  0xbb   :  { %600 = vrot.lane.b32.xlu1 %v7481_v62, %s7184_s12  ;;  %v351_v62 = vshrl.u32 %v7618_v26, 16  ;;  %v744_v4 = vor.u32 %v743_v36, %v358_v45  ;;  %v184_v36 = vld [vmem:[#allocation3 + $0x1f8] sm:$0xff] }
  0xbc   :  { %602 = vrot.lane.b32.xlu0 %v7491_v5, %s7184_s12  ;;  %v817_v5 = vsel %vm7354_vm2, %v7616_v23, 0  ;;  %v7698_v23 = vpack.c.bf16 %v168_v21, %v167_v18  ;;  %v173_v21 = vld [vmem:[#allocation3 + $0x1a0] sm:$0xff] }
  0xbd   :  { %v353_v57 = vrot.slane %v351_v62, 7  ;;  %v822_v46 = vsel %vm7354_vm2, %v744_v4, 0 }
  0xbe   :  { %v379_v8 = vshrl.u32 %v7698_v23, 16 }
  0xbf   :  { %892 = vrot.lane.b32.xlu1 %v815_v59, %s7189_s18  ;;  %v356_v24 = vor.u32 %v354_v42, %v353_v57  ;;  %v368_v59 = vshll.u32 %v7646_v50, 16  ;;  %v820_v57 = vsel %vm7354_vm2, %v740_v13, 0  ;;  %v386_v42 = vshrl.u32 %v7786_v63, 16 }
  0xc0   :  { %894 = vrot.lane.b32.xlu0 %v816_v32, %s7189_s18  ;;  %v363_v32 = vor.u32 %v361_v29, %v360_v0  ;;  %v381_v38 = vrot.slane %v379_v8, 7  ;;  %v175_v0 = vld [vmem:[#allocation3 + $0x1b0] sm:$0xff]  ;;  %v389_v29 = vshll.u32 %v7786_v63, 16 }
  0xc1   :  { %v370_v20 = vor.u32 %v368_v59, %v367_v41  ;;  %v495_v25 = vsel %vm7602_vm7, 0, %v356_v24  ;;  %v388_v9 = vrot.slane %v386_v42, 7  ;;  %v176_v41 = vld [vmem:[#allocation3 + $0x1b8] sm:$0xff]  ;;  %v745_v24 = vrot.slane %v368_v59, 1 }
  0xc2   :  { %529 = vst.msk [vmem:[#allocation2 + $0xb0] sm:$0xff] %vm509_vm6, %v495_v25  ;;  %v496_v27 = vsel %vm7602_vm7, 0, %v363_v32  ;;  %v751_v25 = vrot.slane %v389_v29, 1 }
  0xc3   :  { %604 = vrot.lane.b32.xlu1 %v7510_v28, %s7184_s12  ;;  %v481_v28 = vsel %vm7602_vm7, 0, %v7539_v12  ;;  %v485_v12 = vsel %vm7602_vm7, 0, %v7582_v60  ;;  %v488_v60 = vsel %vm7602_vm7, 0, %v7595_v58  ;;  %v492_v58 = vsel %vm7602_vm7, 0, %v335_v1  ;;  %530 = vst.msk [vmem:[#allocation2 + $0xb8] sm:$0xff] %vm509_vm6, %v496_v27 }
  0xc4   :  { %606 = vrot.lane.b32.xlu0 %v7543_v17, %s7184_s12  ;;  %515 = vst.msk [vmem:[#allocation2 + $0x30] sm:$0xff] %vm509_vm6, %v481_v28  ;;  %v484_v17 = vsel %vm7602_vm7, 0, %v7578_v54  ;;  %519 = vst.msk [vmem:[#allocation2 + $0x50] sm:$0xff] %vm509_vm6, %v485_v12  ;;  %v487_v54 = vsel %vm7602_vm7, 0, %v7591_v34  ;;  %v491_v34 = vsel %vm7602_vm7, 0, %v328_v35  ;;  %v497_v44 = vsel %vm7602_vm7, 0, %v370_v20 }
  0xc5   :  { %518 = vst.msk [vmem:[#allocation2 + $0x48] sm:$0xff] %vm509_vm6, %v484_v17  ;;  %521 = vst.msk [vmem:[#allocation2 + $0x60] sm:$0xff] %vm509_vm6, %v487_v54  ;;  %v375_v35 = vshll.u32 %v7690_v39, 16  ;;  %v7788_v1 = vpack.c.bf16 %v172_v53, %v171_v33  ;;  %v391_v40 = vor.u32 %v389_v29, %v388_v9  ;;  %v7820_v12 = vpack.c.bf16 %v176_v41, %v175_v0 }
  0xc6   :  { %522 = vst.msk [vmem:[#allocation2 + $0x68] sm:$0xff] %vm509_vm6, %v488_v60  ;;  %525 = vst.msk [vmem:[#allocation2 + $0x80] sm:$0xff] %vm509_vm6, %v491_v34  ;;  %v177_v60 = vld [vmem:[#allocation3 + $0x1c0] sm:$0xff]  ;;  %v179_v34 = vld [vmem:[#allocation3 + $0x1d0] sm:$0xff]  ;;  %v752_v33 = vor.u32 %v751_v25, %v386_v42 }
  0xc7   :  { %896 = vrot.lane.b32.xlu1 %v817_v5, %s7189_s18  ;;  %526 = vst.msk [vmem:[#allocation2 + $0x98] sm:$0xff] %vm509_vm6, %v492_v58  ;;  %531 = vst.msk [vmem:[#allocation2 + $0xc0] sm:$0xff] %vm509_vm6, %v497_v44  ;;  %v377_v5 = vor.u32 %v375_v35, %v374_v31  ;;  %v393_v2 = vshrl.u32 %v7788_v1, 16  ;;  %v747_v28 = vrot.slane %v375_v35, 1  ;;  %v407_v32 = vshrl.u32 %v7820_v12, 16  ;;  %v180_v58 = vld [vmem:[#allocation3 + $0x1d8] sm:$0xff] }
  0xc8   :  { %898 = vrot.lane.b32.xlu0 %v818_v14, %s7189_s18  ;;  %v500_v7 = vsel %vm7602_vm7, 0, %v391_v40  ;;  %v410_v13 = vshll.u32 %v7820_v12, 16  ;;  %v7848_v27 = vpack.c.bf16 %v180_v58, %v179_v34 }
  0xc9   :  { %v395_v18 = vrot.slane %v393_v2, 7  ;;  %v498_v14 = vsel %vm7602_vm7, 0, %v377_v5  ;;  %v748_v20 = vor.u32 %v747_v28, %v372_v30  ;;  %v409_v54 = vrot.slane %v407_v32, 7  ;;  %534 = vst.msk [vmem:[#allocation2 + $0xd8] sm:$0xff] %vm509_vm6, %v500_v7 }
  0xca   :  { %532 = vst.msk [vmem:[#allocation2 + $0xc8] sm:$0xff] %vm509_vm6, %v498_v14  ;;  %v421_v47 = vshrl.u32 %v7848_v27, 16  ;;  %v424_v42 = vshll.u32 %v7848_v27, 16 }
  0xcb   :  { %608 = vrot.lane.b32.xlu1 %v7570_v61, %s7184_s12  ;;  %v382_v61 = vshll.u32 %v7698_v23, 16 }
  0xcc   :  { %610 = vrot.lane.b32.xlu0 %v7598_v10, %s7184_s12  ;;  %v742_v10 = vor.u32 %v741_v55, %v351_v62  ;;  %v174_v62 = vld [vmem:[#allocation3 + $0x1a8] sm:$0xff]  ;;  %v181_v55 = vld [vmem:[#allocation3 + $0x1e0] sm:$0xff] }
  0xcd   :  { %v384_v48 = vor.u32 %v382_v61, %v381_v38  ;;  %v7818_v17 = vpack.c.bf16 %v174_v62, %v173_v21  ;;  %v749_v51 = vrot.slane %v382_v61, 1  ;;  %v412_v38 = vor.u32 %v410_v13, %v409_v54 }
  0xce   :  { %v821_v45 = vsel %vm7354_vm2, %v742_v10, 0 }
  0xcf   :  { %900 = vrot.lane.b32.xlu1 %v819_v52, %s7189_s18  ;;  %v499_v16 = vsel %vm7602_vm7, 0, %v384_v48  ;;  %v400_v59 = vshrl.u32 %v7818_v17, 16  ;;  %v403_v15 = vshll.u32 %v7818_v17, 16  ;;  %v423_v52 = vrot.slane %v421_v47, 7 }
  0xd0   :  { %902 = vrot.lane.b32.xlu0 %v820_v57, %s7189_s18  ;;  %533 = vst.msk [vmem:[#allocation2 + $0xd0] sm:$0xff] %vm509_vm6, %v499_v16  ;;  %v503_v61 = vsel %vm7602_vm7, 0, %v412_v38  ;;  %v182_v57 = vld [vmem:[#allocation3 + $0x1e8] sm:$0xff] }
  0xd1   :  { %v402_v43 = vrot.slane %v400_v59, 7  ;;  %537 = vst.msk [vmem:[#allocation2 + $0xf0] sm:$0xff] %vm509_vm6, %v503_v61  ;;  %v755_v4 = vrot.slane %v403_v15, 1  ;;  %v215_v21 = vpack.c.bf16 %v182_v57, %v181_v55 }
  0xd3   :  { %612 = vrot.lane.b32.xlu1 %v7618_v26, %s7184_s12  ;;  %v396_v26 = vshll.u32 %v7788_v1, 16  ;;  %v405_v31 = vor.u32 %v403_v15, %v402_v43  ;;  %v428_v16 = vshrl.u32 %v215_v21, 16  ;;  %v756_v0 = vor.u32 %v755_v4, %v400_v59 }
  0xd4   :  { %614 = vrot.lane.b32.xlu0 %v7644_v49, %s7184_s12  ;;  %v746_v49 = vor.u32 %v745_v24, %v365_v56  ;;  %v178_v56 = vld [vmem:[#allocation3 + $0x1c8] sm:$0xff] }
  0xd5   :  { %v398_v3 = vor.u32 %v396_v26, %v395_v18  ;;  %v213_v37 = vpack.c.bf16 %v178_v56, %v177_v60  ;;  %v502_v35 = vsel %vm7602_vm7, 0, %v405_v31  ;;  %v753_v48 = vrot.slane %v396_v26, 1 }
  0xd6   :  { %v823_v30 = vsel %vm7354_vm2, %v746_v49, 0  ;;  %536 = vst.msk [vmem:[#allocation2 + $0xe8] sm:$0xff] %vm509_vm6, %v502_v35  ;;  %v426_v18 = vor.u32 %v424_v42, %v423_v52  ;;  %v430_v41 = vrot.slane %v428_v16, 7  ;;  %v757_v26 = vrot.slane %v410_v13, 1 }
  0xd7   :  { %904 = vrot.lane.b32.xlu1 %v821_v45, %s7189_s18  ;;  %v501_v11 = vsel %vm7602_vm7, 0, %v398_v3  ;;  %v414_v44 = vshrl.u32 %v213_v37, 16  ;;  %v417_v10 = vshll.u32 %v213_v37, 16  ;;  %v828_v40 = vsel %vm7354_vm2, %v756_v0, 0 }
  0xd8   :  { %906 = vrot.lane.b32.xlu0 %v822_v46, %s7189_s18  ;;  %535 = vst.msk [vmem:[#allocation2 + $0xe0] sm:$0xff] %vm509_vm6, %v501_v11  ;;  %v505_v29 = vsel %vm7602_vm7, 0, %v426_v18  ;;  %v431_v46 = vshll.u32 %v215_v21, 16  ;;  %v758_v59 = vor.u32 %v757_v26, %v407_v32  ;;  %v761_v32 = vrot.slane %v424_v42, 1 }
  0xd9   :  { %v416_v53 = vrot.slane %v414_v44, 7  ;;  %539 = vst.msk [vmem:[#allocation2 + $0x100] sm:$0xff] %vm509_vm6, %v505_v29  ;;  %v759_v3 = vrot.slane %v417_v10, 1  ;;  %v7193_v31 = vmov 0  }
  0xda   :  { %v433_v49 = vor.u32 %v431_v46, %v430_v41  ;;  %v829_v54 = vsel %vm7354_vm2, %v758_v59, 0  ;;  %v763_v7 = vrot.slane %v431_v46, 1  ;;  %116 = vst.msk [vmem:[#allocation2] sm:$0xff] %vm115_vm10, %v7193_v31  ;;  %117 = vst.msk [vmem:[#allocation2 + $0x90] sm:$0xff] %vm115_vm10, %v7193_v31 }
  0xdb   :  { %616 = vrot.lane.b32.xlu1 %v7646_v50, %s7184_s12  ;;  %v824_v50 = vsel %vm7354_vm2, %v748_v20, 0  ;;  %v419_v9 = vor.u32 %v417_v10, %v416_v53  ;;  %v760_v20 = vor.u32 %v759_v3, %v414_v44  ;;  %119 = vst.msk [vmem:[#allocation2 + $0x88] sm:$0xff] %vm115_vm10, %v7193_v31  ;;  %120 = vst.msk [vmem:[#allocation2 + $0x118] sm:$0xff] %vm115_vm10, %v7193_v31  ;;  %v7953_v53 = vld [vmem:[#allocation6 + $0x10] sm:$0x3f]  }
  0xdc   :  { %618 = vrot.lane.b32.xlu0 %v7690_v39, %s7184_s12  ;;  %v750_v39 = vor.u32 %v749_v51, %v379_v8  ;;  %v183_v8 = vld [vmem:[#allocation3 + $0x1f0] sm:$0xff]  ;;  %v764_v56 = vor.u32 %v763_v7, %v428_v16 }
  0xdd   :  { %v7872_v14 = vpack.c.bf16 %v184_v36, %v183_v8  ;;  %v504_v24 = vsel %vm7602_vm7, 0, %v419_v9  ;;  %v830_v60 = vsel %vm7354_vm2, %v760_v20, 0 }
  0xde   :  { %v825_v5 = vsel %vm7354_vm2, %v750_v39, 0  ;;  %538 = vst.msk [vmem:[#allocation2 + $0xf8] sm:$0xff] %vm509_vm6, %v504_v24  ;;  %v832_v15 = vsel %vm7354_vm2, %v764_v56, 0 }
  0xdf   :  { %908 = vrot.lane.b32.xlu1 %v823_v30, %s7189_s18  ;;  %v435_v62 = vshrl.u32 %v7872_v14, 16  ;;  %v438_v28 = vshll.u32 %v7872_v14, 16 }
  0xe0   :  { %910 = vrot.lane.b32.xlu0 %v824_v50, %s7189_s18 }
  0xe1   :  { %v437_v45 = vrot.slane %v435_v62, 7  ;;  %v765_v30 = vrot.slane %v438_v28, 1 }
  0xe3   :  { %620 = vrot.lane.b32.xlu1 %v7698_v23, %s7184_s12  ;;  %v826_v23 = vsel %vm7354_vm2, %v752_v33, 0  ;;  %v766_v50 = vor.u32 %v765_v30, %v435_v62  ;;  %v7951_v33 = vld [vmem:[#allocation2] sm:$0xff] }
  0xe4   :  { %622 = vrot.lane.b32.xlu0 %v7786_v63, %s7184_s12  ;;  %v754_v63 = vor.u32 %v753_v48, %v393_v2  ;;  %2949 = vst.msk [vmem:[#allocation2] sm:$0xff] %vm115_vm10, %v7193_v31 }
  0xe6   :  { %v827_v2 = vsel %vm7354_vm2, %v754_v63, 0 }
  0xe7   :  { %912 = vrot.lane.b32.xlu1 %v825_v5, %s7189_s18 }
  0xe8   :  { %914 = vrot.lane.b32.xlu0 %v826_v23, %s7189_s18 }
  0xeb   :  { %624 = vrot.lane.b32.xlu1 %v7788_v1, %s7184_s12  ;;  %v440_v1 = vor.u32 %v438_v28, %v437_v45 }
  0xec   :  { %626 = vrot.lane.b32.xlu0 %v7818_v17, %s7184_s12  ;;  %v506_v17 = vsel %vm7602_vm7, 0, %v433_v49 }
  0xed   :  { %v507_v43 = vsel %vm7602_vm7, 0, %v440_v1  ;;  %540 = vst.msk [vmem:[#allocation2 + $0x108] sm:$0xff] %vm509_vm6, %v506_v17 }
  0xee   :  { %541 = vst.msk [vmem:[#allocation2 + $0x110] sm:$0xff] %vm509_vm6, %v507_v43 }
  0xef   :  { %916 = vrot.lane.b32.xlu1 %v827_v2, %s7189_s18 }
  0xf0   :  { %918 = vrot.lane.b32.xlu0 %v828_v40, %s7189_s18 }
  0xf3   :  { %628 = vrot.lane.b32.xlu1 %v7820_v12, %s7184_s12  ;;  %v762_v12 = vor.u32 %v761_v32, %v421_v47  ;;  %v1560_v47 = vsel %vm1165_vm3, %v7642_v6, 0 }
  0xf4   :  { %630 = vrot.lane.b32.xlu0 %v213_v37, %s7184_s12  ;;  %v833_v37 = vsel %vm7354_vm2, %v766_v50, 0 }
  0xf5   :  { %v831_v58 = vsel %vm7354_vm2, %v762_v12, 0 }
  0xf6   :  { %v575_v11 = vpop.permute.xlu0 %574 }
  0xf7   :  { %920 = vrot.lane.b32.xlu1 %v829_v54, %s7189_s18  ;;  %671 = vst.msk [vmem:[#allocation2 + $0x8] sm:$0xff] %vm670_vm8, %v575_v11 }
  0xf8   :  { %922 = vrot.lane.b32.xlu0 %v830_v60, %s7189_s18 }
  0xfa   :  { %v577_v34 = vpop.permute.xlu0 %576 }
  0xfb   :  { %632 = vrot.lane.b32.xlu1 %v7848_v27, %s7184_s12  ;;  %672 = vst.msk [vmem:[#allocation2 + $0x10] sm:$0xff] %vm670_vm8, %v577_v34 }
  0xfc   :  { %634 = vrot.lane.b32.xlu0 %v215_v21, %s7184_s12 }
  0xfd   :  { %v867_v51 = vpop.permute.xlu1 %866 }
  0xfe   :  { %963 = vst.msk [vmem:[#allocation2 + $0x8] sm:$0xff] %vm962_vm9, %v867_v51  ;;  %v579_v13 = vpop.permute.xlu0 %578 }
  0xff   :  { %924 = vrot.lane.b32.xlu1 %v831_v58, %s7189_s18  ;;  %673 = vst.msk [vmem:[#allocation2 + $0x18] sm:$0xff] %vm670_vm8, %v579_v13  ;;  %v8050_v58 = vld [vmem:[#allocation2 + $0x90] sm:$0xff] }
 0x100   :  { %926 = vrot.lane.b32.xlu0 %v832_v15, %s7189_s18  ;;  %2950 = vst.msk [vmem:[#allocation2 + $0x90] sm:$0xff] %vm115_vm10, %v7193_v31 }
 0x101   :  { %v869_v25 = vpop.permute.xlu1 %868 }
 0x102   :  { %964 = vst.msk [vmem:[#allocation2 + $0x10] sm:$0xff] %vm962_vm9, %v869_v25  ;;  %v871_v38 = vpop.permute.xlu0 %870 }
 0x103   :  { %636 = vrot.lane.b32.xlu1 %v7872_v14, %s7184_s12  ;;  %965 = vst.msk [vmem:[#allocation2 + $0x18] sm:$0xff] %vm962_vm9, %v871_v38 }
 0x105   :  { %v581_v27 = vpop.permute.xlu1 %580  ;;  %v7942_v39 = vld [vmem:[#allocation2 + $0x8] sm:$0xff] }
 0x106   :  { %674 = vst.msk [vmem:[#allocation2 + $0x20] sm:$0xff] %vm670_vm8, %v581_v27  ;;  %6317 = vmatprep.mubr.msk.bf16.mxu0 %vm115_vm10, %v7942_v39  ;;  %v583_v44 = vpop.permute.xlu0 %582 }
 0x107   :  { %928 = vrot.lane.b32.xlu1 %v833_v37, %s7189_s18  ;;  %675 = vst.msk [vmem:[#allocation2 + $0x28] sm:$0xff] %vm670_vm8, %v583_v44 }
 0x109   :  { %v873_v52 = vpop.permute.xlu1 %872  ;;  %v7955_v55 = vld [vmem:[#allocation2 + $0x10] sm:$0xff] }
 0x10a   :  { %966 = vst.msk [vmem:[#allocation2 + $0x20] sm:$0xff] %vm962_vm9, %v873_v52  ;;  %6318 = vmatmul.mubr.msk.bf16.vlgmr.msra.gmra.mrb[0].mxu0 %vm115_vm10, %v7955_v55  ;;  %v875_v35 = vpop.permute.xlu0 %874  ;;  %v7962_v61 = vld [vmem:[#allocation2 + $0x18] sm:$0xff] }
 0x10b   :  { %6382 = vmatpush3.bf16.msra.mxu0 %v1560_v47  ;;  %967 = vst.msk [vmem:[#allocation2 + $0x28] sm:$0xff] %vm962_vm9, %v875_v35  ;;  %6321 = vmatprep.mubr.msk.bf16.mxu0 %vm115_vm10, %v7962_v61 }
 0x10c   :  { %6969 = vmatprep.subr.msk.bf16.mxu0 %vm1165_vm3, %v7953_v53 }
 0x10d   :  { %v585_v6 = vpop.permute.xlu1 %584 }
 0x10e   :  { %676 = vst.msk [vmem:[#allocation2 + $0x30] sm:$0xff] %vm670_vm8, %v585_v6  ;;  %v587_v57 = vpop.permute.xlu0 %586 }
 0x10f   :  { %677 = vst.msk [vmem:[#allocation2 + $0x38] sm:$0xff] %vm670_vm8, %v587_v57 }
 0x111   :  { %v877_v8 = vpop.permute.xlu1 %876  ;;  %v7971_v36 = vld [vmem:[#allocation2 + $0x20] sm:$0xff] }
 0x112   :  { %968 = vst.msk [vmem:[#allocation2 + $0x30] sm:$0xff] %vm962_vm9, %v877_v8  ;;  %6322 = vmatmul.mubr.msk.bf16.gmra.mrb[4].mxu0 %vm115_vm10, %v7971_v36  ;;  %v879_v5 = vpop.permute.xlu0 %878  ;;  %v7976_v48 = vld [vmem:[#allocation2 + $0x28] sm:$0xff] }
 0x113   :  { %969 = vst.msk [vmem:[#allocation2 + $0x38] sm:$0xff] %vm962_vm9, %v879_v5  ;;  %6325 = vmatprep.mubr.msk.bf16.mxu0 %vm115_vm10, %v7976_v48 }
 0x115   :  { %v589_v10 = vpop.permute.xlu1 %588 }
 0x116   :  { %678 = vst.msk [vmem:[#allocation2 + $0x40] sm:$0xff] %vm670_vm8, %v589_v10  ;;  %v591_v42 = vpop.permute.xlu0 %590 }
 0x117   :  { %679 = vst.msk [vmem:[#allocation2 + $0x48] sm:$0xff] %vm670_vm8, %v591_v42 }
 0x119   :  { %v881_v23 = vpop.permute.xlu1 %880  ;;  %v7983_v4 = vld [vmem:[#allocation2 + $0x30] sm:$0xff] }
 0x11a   :  { %970 = vst.msk [vmem:[#allocation2 + $0x40] sm:$0xff] %vm962_vm9, %v881_v23  ;;  %6326 = vmatmul.mubr.msk.bf16.gmra.mrb[8].mxu0 %vm115_vm10, %v7983_v4  ;;  %v883_v9 = vpop.permute.xlu0 %882  ;;  %v7988_v18 = vld [vmem:[#allocation2 + $0x38] sm:$0xff] }
 0x11b   :  { %971 = vst.msk [vmem:[#allocation2 + $0x48] sm:$0xff] %vm962_vm9, %v883_v9  ;;  %6329 = vmatprep.mubr.msk.bf16.mxu0 %vm115_vm10, %v7988_v18 }
 0x11d   :  { %v593_v21 = vpop.permute.xlu1 %592 }
 0x11e   :  { %680 = vst.msk [vmem:[#allocation2 + $0x50] sm:$0xff] %vm670_vm8, %v593_v21  ;;  %v595_v14 = vpop.permute.xlu0 %594 }
 0x11f   :  { %681 = vst.msk [vmem:[#allocation2 + $0x58] sm:$0xff] %vm670_vm8, %v595_v14 }
 0x121   :  { %v885_v63 = vpop.permute.xlu1 %884  ;;  %v7995_v16 = vld [vmem:[#allocation2 + $0x40] sm:$0xff] }
 0x122   :  { %972 = vst.msk [vmem:[#allocation2 + $0x50] sm:$0xff] %vm962_vm9, %v885_v63  ;;  %6330 = vmatmul.mubr.msk.bf16.gmra.mrb[12].mxu0 %vm115_vm10, %v7995_v16  ;;  %v887_v62 = vpop.permute.xlu0 %886  ;;  %v8000_v0 = vld [vmem:[#allocation2 + $0x48] sm:$0xff] }
 0x123   :  { %973 = vst.msk [vmem:[#allocation2 + $0x58] sm:$0xff] %vm962_vm9, %v887_v62  ;;  %6333 = vmatprep.mubr.msk.bf16.mxu0 %vm115_vm10, %v8000_v0 }
 0x125   :  { %v597_v41 = vpop.permute.xlu1 %596 }
 0x126   :  { %682 = vst.msk [vmem:[#allocation2 + $0x60] sm:$0xff] %vm670_vm8, %v597_v41  ;;  %v599_v45 = vpop.permute.xlu0 %598 }
 0x127   :  { %683 = vst.msk [vmem:[#allocation2 + $0x68] sm:$0xff] %vm670_vm8, %v599_v45 }
 0x129   :  { %v889_v24 = vpop.permute.xlu1 %888  ;;  %v8007_v29 = vld [vmem:[#allocation2 + $0x50] sm:$0xff] }
 0x12a   :  { %974 = vst.msk [vmem:[#allocation2 + $0x60] sm:$0xff] %vm962_vm9, %v889_v24  ;;  %6334 = vmatmul.mubr.msk.bf16.gmra.mrb[16].mxu0 %vm115_vm10, %v8007_v29  ;;  %v891_v2 = vpop.permute.xlu0 %890  ;;  %v8012_v26 = vld [vmem:[#allocation2 + $0x58] sm:$0xff] }
 0x12b   :  { %975 = vst.msk [vmem:[#allocation2 + $0x68] sm:$0xff] %vm962_vm9, %v891_v2  ;;  %6337 = vmatprep.mubr.msk.bf16.mxu0 %vm115_vm10, %v8012_v26 }
 0x12d   :  { %v601_v46 = vpop.permute.xlu1 %600 }
 0x12e   :  { %684 = vst.msk [vmem:[#allocation2 + $0x70] sm:$0xff] %vm670_vm8, %v601_v46  ;;  %v603_v28 = vpop.permute.xlu0 %602 }
 0x12f   :  { %685 = vst.msk [vmem:[#allocation2 + $0x78] sm:$0xff] %vm670_vm8, %v603_v28 }
 0x131   :  { %v893_v40 = vpop.permute.xlu1 %892  ;;  %v8019_v3 = vld [vmem:[#allocation2 + $0x60] sm:$0xff] }
 0x132   :  { %976 = vst.msk [vmem:[#allocation2 + $0x70] sm:$0xff] %vm962_vm9, %v893_v40  ;;  %6338 = vmatmul.mubr.msk.bf16.gmra.mrb[20].mxu0 %vm115_vm10, %v8019_v3  ;;  %v895_v49 = vpop.permute.xlu0 %894  ;;  %v8024_v1 = vld [vmem:[#allocation2 + $0x68] sm:$0xff] }
 0x133   :  { %977 = vst.msk [vmem:[#allocation2 + $0x78] sm:$0xff] %vm962_vm9, %v895_v49  ;;  %6341 = vmatprep.mubr.msk.bf16.mxu0 %vm115_vm10, %v8024_v1 }
 0x135   :  { %v605_v59 = vpop.permute.xlu1 %604 }
 0x136   :  { %686 = vst.msk [vmem:[#allocation2 + $0x80] sm:$0xff] %vm670_vm8, %v605_v59  ;;  %v607_v20 = vpop.permute.xlu0 %606 }
 0x137   :  { %687 = vst.msk [vmem:[#allocation2 + $0x98] sm:$0xff] %vm670_vm8, %v607_v20 }
 0x139   :  { %v897_v17 = vpop.permute.xlu1 %896  ;;  %v8031_v43 = vld [vmem:[#allocation2 + $0x70] sm:$0xff] }
 0x13a   :  { %978 = vst.msk [vmem:[#allocation2 + $0x80] sm:$0xff] %vm962_vm9, %v897_v17  ;;  %6342 = vmatmul.mubr.msk.bf16.gmra.mrb[24].mxu0 %vm115_vm10, %v8031_v43  ;;  %v899_v54 = vpop.permute.xlu0 %898  ;;  %v8036_v32 = vld [vmem:[#allocation2 + $0x78] sm:$0xff] }
 0x13b   :  { %979 = vst.msk [vmem:[#allocation2 + $0x98] sm:$0xff] %vm962_vm9, %v899_v54  ;;  %6345 = vmatprep.mubr.msk.bf16.mxu0 %vm115_vm10, %v8036_v32 }
 0x13d   :  { %v609_v60 = vpop.permute.xlu1 %608 }
 0x13e   :  { %688 = vst.msk [vmem:[#allocation2 + $0xa0] sm:$0xff] %vm670_vm8, %v609_v60  ;;  %v611_v7 = vpop.permute.xlu0 %610 }
 0x13f   :  { %689 = vst.msk [vmem:[#allocation2 + $0xa8] sm:$0xff] %vm670_vm8, %v611_v7 }
 0x141   :  { %v901_v11 = vpop.permute.xlu1 %900  ;;  %v8043_v12 = vld [vmem:[#allocation2 + $0x80] sm:$0xff] }
 0x142   :  { %980 = vst.msk [vmem:[#allocation2 + $0xa0] sm:$0xff] %vm962_vm9, %v901_v11  ;;  %6346 = vmatmul.mubr.msk.bf16.gmra.mrb[28].mxu0 %vm115_vm10, %v8043_v12  ;;  %v903_v56 = vpop.permute.xlu0 %902  ;;  %v8048_v34 = vld [vmem:[#allocation2 + $0x98] sm:$0xff] }
 0x143   :  { %981 = vst.msk [vmem:[#allocation2 + $0xa8] sm:$0xff] %vm962_vm9, %v903_v56  ;;  %6349 = vmatprep.mubr.msk.bf16.mxu0 %vm115_vm10, %v8048_v34 }
 0x145   :  { %v613_v30 = vpop.permute.xlu1 %612 }
 0x146   :  { %690 = vst.msk [vmem:[#allocation2 + $0xb0] sm:$0xff] %vm670_vm8, %v613_v30  ;;  %v615_v51 = vpop.permute.xlu0 %614  ;;  %v1989_v30 = vsel %vm1165_vm3, %v7953_v53, 0 }
 0x147   :  { %691 = vst.msk [vmem:[#allocation2 + $0xb8] sm:$0xff] %vm670_vm8, %v615_v51 }
 0x149   :  { %v905_v15 = vpop.permute.xlu1 %904  ;;  %v8059_v13 = vld [vmem:[#allocation2 + $0xa0] sm:$0xff] }
 0x14a   :  { %982 = vst.msk [vmem:[#allocation2 + $0xb0] sm:$0xff] %vm962_vm9, %v905_v15  ;;  %6350 = vmatmul.mubr.msk.bf16.gmra.mrb[32].mxu0 %vm115_vm10, %v8059_v13  ;;  %v907_v50 = vpop.permute.xlu0 %906  ;;  %v8064_v25 = vld [vmem:[#allocation2 + $0xa8] sm:$0xff] }
 0x14b   :  { %983 = vst.msk [vmem:[#allocation2 + $0xb8] sm:$0xff] %vm962_vm9, %v907_v50  ;;  %6353 = vmatprep.mubr.msk.bf16.mxu0 %vm115_vm10, %v8064_v25 }
 0x14d   :  { %v617_v38 = vpop.permute.xlu1 %616 }
 0x14e   :  { %692 = vst.msk [vmem:[#allocation2 + $0xc0] sm:$0xff] %vm670_vm8, %v617_v38  ;;  %v619_v37 = vpop.permute.xlu0 %618 }
 0x14f   :  { %693 = vst.msk [vmem:[#allocation2 + $0xc8] sm:$0xff] %vm670_vm8, %v619_v37 }
 0x151   :  { %v909_v27 = vpop.permute.xlu1 %908  ;;  %v8071_v44 = vld [vmem:[#allocation2 + $0xb0] sm:$0xff] }
 0x152   :  { %984 = vst.msk [vmem:[#allocation2 + $0xc0] sm:$0xff] %vm962_vm9, %v909_v27  ;;  %6354 = vmatmul.mubr.msk.bf16.gmra.mrb[36].mxu0 %vm115_vm10, %v8071_v44  ;;  %v911_v47 = vpop.permute.xlu0 %910  ;;  %v8076_v52 = vld [vmem:[#allocation2 + $0xb8] sm:$0xff] }
 0x153   :  { %985 = vst.msk [vmem:[#allocation2 + $0xc8] sm:$0xff] %vm962_vm9, %v911_v47  ;;  %6357 = vmatprep.mubr.msk.bf16.mxu0 %vm115_vm10, %v8076_v52 }
 0x155   :  { %v621_v35 = vpop.permute.xlu1 %620 }
 0x156   :  { %694 = vst.msk [vmem:[#allocation2 + $0xd0] sm:$0xff] %vm670_vm8, %v621_v35  ;;  %v623_v6 = vpop.permute.xlu0 %622 }
 0x157   :  { %695 = vst.msk [vmem:[#allocation2 + $0xd8] sm:$0xff] %vm670_vm8, %v623_v6 }
 0x159   :  { %v913_v57 = vpop.permute.xlu1 %912  ;;  %v8083_v8 = vld [vmem:[#allocation2 + $0xc0] sm:$0xff] }
 0x15a   :  { %986 = vst.msk [vmem:[#allocation2 + $0xd0] sm:$0xff] %vm962_vm9, %v913_v57  ;;  %6358 = vmatmul.mubr.msk.bf16.gmra.mrb[40].mxu0 %vm115_vm10, %v8083_v8  ;;  %v915_v5 = vpop.permute.xlu0 %914  ;;  %v8088_v10 = vld [vmem:[#allocation2 + $0xc8] sm:$0xff] }
 0x15b   :  { %987 = vst.msk [vmem:[#allocation2 + $0xd8] sm:$0xff] %vm962_vm9, %v915_v5  ;;  %6361 = vmatprep.mubr.msk.bf16.mxu0 %vm115_vm10, %v8088_v10 }
 0x15d   :  { %v625_v42 = vpop.permute.xlu1 %624 }
 0x15e   :  { %696 = vst.msk [vmem:[#allocation2 + $0xe0] sm:$0xff] %vm670_vm8, %v625_v42  ;;  %v627_v23 = vpop.permute.xlu0 %626 }
 0x15f   :  { %697 = vst.msk [vmem:[#allocation2 + $0xe8] sm:$0xff] %vm670_vm8, %v627_v23 }
 0x161   :  { %v917_v9 = vpop.permute.xlu1 %916  ;;  %v8095_v21 = vld [vmem:[#allocation2 + $0xd0] sm:$0xff] }
 0x162   :  { %988 = vst.msk [vmem:[#allocation2 + $0xe0] sm:$0xff] %vm962_vm9, %v917_v9  ;;  %6362 = vmatmul.mubr.msk.bf16.gmra.mrb[44].mxu0 %vm115_vm10, %v8095_v21  ;;  %v919_v14 = vpop.permute.xlu0 %918  ;;  %v8100_v63 = vld [vmem:[#allocation2 + $0xd8] sm:$0xff] }
 0x163   :  { %989 = vst.msk [vmem:[#allocation2 + $0xe8] sm:$0xff] %vm962_vm9, %v919_v14  ;;  %6365 = vmatprep.mubr.msk.bf16.mxu0 %vm115_vm10, %v8100_v63 }
 0x165   :  { %v629_v62 = vpop.permute.xlu1 %628 }
 0x166   :  { %698 = vst.msk [vmem:[#allocation2 + $0xf0] sm:$0xff] %vm670_vm8, %v629_v62  ;;  %v631_v41 = vpop.permute.xlu0 %630 }
 0x167   :  { %699 = vst.msk [vmem:[#allocation2 + $0xf8] sm:$0xff] %vm670_vm8, %v631_v41 }
 0x169   :  { %v921_v45 = vpop.permute.xlu1 %920  ;;  %v8107_v24 = vld [vmem:[#allocation2 + $0xe0] sm:$0xff] }
 0x16a   :  { %990 = vst.msk [vmem:[#allocation2 + $0xf0] sm:$0xff] %vm962_vm9, %v921_v45  ;;  %6366 = vmatmul.mubr.msk.bf16.gmra.mrb[48].mxu0 %vm115_vm10, %v8107_v24  ;;  %v923_v2 = vpop.permute.xlu0 %922  ;;  %v8112_v46 = vld [vmem:[#allocation2 + $0xe8] sm:$0xff] }
 0x16b   :  { %991 = vst.msk [vmem:[#allocation2 + $0xf8] sm:$0xff] %vm962_vm9, %v923_v2  ;;  %6369 = vmatprep.mubr.msk.bf16.mxu0 %vm115_vm10, %v8112_v46 }
 0x16d   :  { %v633_v28 = vpop.permute.xlu1 %632 }
 0x16e   :  { %700 = vst.msk [vmem:[#allocation2 + $0x100] sm:$0xff] %vm670_vm8, %v633_v28  ;;  %v635_v40 = vpop.permute.xlu0 %634 }
 0x16f   :  { %701 = vst.msk [vmem:[#allocation2 + $0x108] sm:$0xff] %vm670_vm8, %v635_v40 }
 0x171   :  { %v925_v49 = vpop.permute.xlu1 %924  ;;  %v8119_v59 = vld [vmem:[#allocation2 + $0xf0] sm:$0xff] }
 0x172   :  { %992 = vst.msk [vmem:[#allocation2 + $0x100] sm:$0xff] %vm962_vm9, %v925_v49  ;;  %6370 = vmatmul.mubr.msk.bf16.gmra.mrb[52].mxu0 %vm115_vm10, %v8119_v59  ;;  %v927_v20 = vpop.permute.xlu0 %926  ;;  %v8124_v17 = vld [vmem:[#allocation2 + $0xf8] sm:$0xff] }
 0x173   :  { %993 = vst.msk [vmem:[#allocation2 + $0x108] sm:$0xff] %vm962_vm9, %v927_v20  ;;  %6373 = vmatprep.mubr.msk.bf16.mxu0 %vm115_vm10, %v8124_v17 }
 0x175   :  { %v637_v54 = vpop.permute.xlu1 %636 }
 0x176   :  { %702 = vst.msk [vmem:[#allocation2 + $0x110] sm:$0xff] %vm670_vm8, %v637_v54 }
 0x179   :  { %v929_v60 = vpop.permute.xlu1 %928  ;;  %v8130_v7 = vld [vmem:[#allocation2 + $0x100] sm:$0xff] }
 0x17a   :  { %994 = vst.msk [vmem:[#allocation2 + $0x110] sm:$0xff] %vm962_vm9, %v929_v60  ;;  %6374 = vmatmul.mubr.msk.bf16.gmra.mrb[56].mxu0 %vm115_vm10, %v8130_v7  ;;  %v8135_v11 = vld [vmem:[#allocation2 + $0x108] sm:$0xff] }
 0x17b   :  { %6377 = vmatprep.mubr.msk.bf16.mxu0 %vm115_vm10, %v8135_v11 }
 0x181   :  { %v8139_v56 = vld [vmem:[#allocation2 + $0x110] sm:$0xff] }
 0x182   :  { %6378 = vmatmul.mubr.msk.bf16.gmra.mrb[60].mxu0 %vm115_vm10, %v8139_v56 }
 0x183   :  { %6383 = vmatprep.mubr.msk.bf16.mxu0 %vm115_vm10, %v7951_v33  ;;  %v1883_v33 = vld [vmem:[#allocation2 + $0x118] sm:$0xff] }
 0x184   :  { %2952 = vst.msk [vmem:[#allocation2 + $0x118] sm:$0xff] %vm115_vm10, %v7193_v31 }
 0x18a   :  { %6384 = vmatmul.mubr.msk.bf16.vlgmr.msra.gmra.mrb[0].mxu0 %vm115_vm10, %v7942_v39  ;;  %v1867_v39 = vld [vmem:[#allocation2 + $0x88] sm:$0xff] }
 0x18b   :  { %6448 = vmatpush3.bf16.msra.mxu0 %v1989_v30  ;;  %6387 = vmatprep.mubr.msk.bf16.mxu0 %vm115_vm10, %v7955_v55  ;;  %2951 = vst.msk [vmem:[#allocation2 + $0x88] sm:$0xff] %vm115_vm10, %v7193_v31 }
 0x192   :  { %6388 = vmatmul.mubr.msk.bf16.gmra.mrb[4].mxu0 %vm115_vm10, %v7962_v61 }
 0x193   :  { %6391 = vmatprep.mubr.msk.bf16.mxu0 %vm115_vm10, %v7971_v36 }
 0x19a   :  { %6392 = vmatmul.mubr.msk.bf16.gmra.mrb[8].mxu0 %vm115_vm10, %v7976_v48 }
 0x19b   :  { %6395 = vmatprep.mubr.msk.bf16.mxu0 %vm115_vm10, %v7983_v4 }
 0x1a2   :  { %6396 = vmatmul.mubr.msk.bf16.gmra.mrb[12].mxu0 %vm115_vm10, %v7988_v18 }
 0x1a3   :  { %6399 = vmatprep.mubr.msk.bf16.mxu0 %vm115_vm10, %v7995_v16 }
 0x1aa   :  { %6400 = vmatmul.mubr.msk.bf16.gmra.mrb[16].mxu0 %vm115_vm10, %v8000_v0 }
 0x1ab   :  { %6403 = vmatprep.mubr.msk.bf16.mxu0 %vm115_vm10, %v8007_v29 }
 0x1b2   :  { %6404 = vmatmul.mubr.msk.bf16.gmra.mrb[20].mxu0 %vm115_vm10, %v8012_v26 }
 0x1b3   :  { %6407 = vmatprep.mubr.msk.bf16.mxu0 %vm115_vm10, %v8019_v3 }
 0x1ba   :  { %6408 = vmatmul.mubr.msk.bf16.gmra.mrb[24].mxu0 %vm115_vm10, %v8024_v1 }
 0x1bb   :  { %6411 = vmatprep.mubr.msk.bf16.mxu0 %vm115_vm10, %v8031_v43 }
 0x1c2   :  { %6412 = vmatmul.mubr.msk.bf16.gmra.mrb[28].mxu0 %vm115_vm10, %v8036_v32 }
 0x1c3   :  { %6415 = vmatprep.mubr.msk.bf16.mxu0 %vm115_vm10, %v8050_v58 }
 0x1ca   :  { %6416 = vmatmul.mubr.msk.bf16.gmra.mrb[32].mxu0 %vm115_vm10, %v8048_v34 }
 0x1cb   :  { %6419 = vmatprep.mubr.msk.bf16.mxu0 %vm115_vm10, %v8059_v13 }
 0x1d2   :  { %6420 = vmatmul.mubr.msk.bf16.gmra.mrb[36].mxu0 %vm115_vm10, %v8064_v25 }
 0x1d3   :  { %6423 = vmatprep.mubr.msk.bf16.mxu0 %vm115_vm10, %v8071_v44 }
 0x1da   :  { %6424 = vmatmul.mubr.msk.bf16.gmra.mrb[40].mxu0 %vm115_vm10, %v8076_v52 }
 0x1db   :  { %6427 = vmatprep.mubr.msk.bf16.mxu0 %vm115_vm10, %v8083_v8 }
 0x1e2   :  { %6428 = vmatmul.mubr.msk.bf16.gmra.mrb[44].mxu0 %vm115_vm10, %v8088_v10 }
 0x1e3   :  { %6431 = vmatprep.mubr.msk.bf16.mxu0 %vm115_vm10, %v8095_v21 }
 0x1ea   :  { %6432 = vmatmul.mubr.msk.bf16.gmra.mrb[48].mxu0 %vm115_vm10, %v8100_v63 }
 0x1eb   :  { %6435 = vmatprep.mubr.msk.bf16.mxu0 %vm115_vm10, %v8107_v24 }
 0x1f2   :  { %6436 = vmatmul.mubr.msk.bf16.gmra.mrb[52].mxu0 %vm115_vm10, %v8112_v46 }
 0x1f3   :  { %6439 = vmatprep.mubr.msk.bf16.mxu0 %vm115_vm10, %v8119_v59 }
 0x1fa   :  { %6440 = vmatmul.mubr.msk.bf16.gmra.mrb[56].mxu0 %vm115_vm10, %v8124_v17 }
 0x1fb   :  { %6443 = vmatprep.mubr.msk.bf16.mxu0 %vm115_vm10, %v8130_v7 }
 0x202   :  { %6444 = vmatmul.mubr.msk.bf16.gmra.mrb[60].mxu0 %vm115_vm10, %v8135_v11 }
 0x203   :  { %6449 = vmatprep.mubr.msk.bf16.mxu0 %vm115_vm10, %v7955_v55 }
 0x20a   :  { %6450 = vmatmul.mubr.msk.bf16.vlgmr.msra.gmra.mrb[0].mxu0 %vm115_vm10, %v7962_v61 }
 0x20b   :  { %6453 = vmatprep.mubr.msk.bf16.mxu0 %vm115_vm10, %v7971_v36 }
 0x212   :  { %6454 = vmatmul.mubr.msk.bf16.gmra.mrb[4].mxu0 %vm115_vm10, %v7976_v48 }
 0x213   :  { %6457 = vmatprep.mubr.msk.bf16.mxu0 %vm115_vm10, %v7983_v4 }
 0x21a   :  { %6458 = vmatmul.mubr.msk.bf16.gmra.mrb[8].mxu0 %vm115_vm10, %v7988_v18 }
 0x21b   :  { %6461 = vmatprep.mubr.msk.bf16.mxu0 %vm115_vm10, %v7995_v16 }
 0x222   :  { %6462 = vmatmul.mubr.msk.bf16.gmra.mrb[12].mxu0 %vm115_vm10, %v8000_v0 }
 0x223   :  { %6465 = vmatprep.mubr.msk.bf16.mxu0 %vm115_vm10, %v8007_v29 }
 0x22a   :  { %6466 = vmatmul.mubr.msk.bf16.gmra.mrb[16].mxu0 %vm115_vm10, %v8012_v26 }
 0x22b   :  { %6469 = vmatprep.mubr.msk.bf16.mxu0 %vm115_vm10, %v8019_v3 }
 0x232   :  { %6470 = vmatmul.mubr.msk.bf16.gmra.mrb[20].mxu0 %vm115_vm10, %v8024_v1 }
 0x233   :  { %6473 = vmatprep.mubr.msk.bf16.mxu0 %vm115_vm10, %v8031_v43 }
 0x23a   :  { %6474 = vmatmul.mubr.msk.bf16.gmra.mrb[24].mxu0 %vm115_vm10, %v8036_v32 }
 0x23b   :  { %6477 = vmatprep.mubr.msk.bf16.mxu0 %vm115_vm10, %v8043_v12 }
 0x242   :  { %6478 = vmatmul.mubr.msk.bf16.gmra.mrb[28].mxu0 %vm115_vm10, %v1867_v39 }
 0x243   :  { %6481 = vmatprep.mubr.msk.bf16.mxu0 %vm115_vm10, %v8059_v13 }
 0x24a   :  { %6482 = vmatmul.mubr.msk.bf16.gmra.mrb[32].mxu0 %vm115_vm10, %v8064_v25 }
 0x24b   :  { %6485 = vmatprep.mubr.msk.bf16.mxu0 %vm115_vm10, %v8071_v44 }
 0x252   :  { %6486 = vmatmul.mubr.msk.bf16.gmra.mrb[36].mxu0 %vm115_vm10, %v8076_v52 }
 0x253   :  { %6489 = vmatprep.mubr.msk.bf16.mxu0 %vm115_vm10, %v8083_v8 }
 0x25a   :  { %6490 = vmatmul.mubr.msk.bf16.gmra.mrb[40].mxu0 %vm115_vm10, %v8088_v10 }
 0x25b   :  { %6493 = vmatprep.mubr.msk.bf16.mxu0 %vm115_vm10, %v8095_v21 }
 0x262   :  { %6494 = vmatmul.mubr.msk.bf16.gmra.mrb[44].mxu0 %vm115_vm10, %v8100_v63 }
 0x263   :  { %6497 = vmatprep.mubr.msk.bf16.mxu0 %vm115_vm10, %v8107_v24 }
 0x26a   :  { %6498 = vmatmul.mubr.msk.bf16.gmra.mrb[48].mxu0 %vm115_vm10, %v8112_v46 }
 0x26b   :  { %6501 = vmatprep.mubr.msk.bf16.mxu0 %vm115_vm10, %v8119_v59 }
 0x272   :  { %6502 = vmatmul.mubr.msk.bf16.gmra.mrb[52].mxu0 %vm115_vm10, %v8124_v17 }
 0x273   :  { %6505 = vmatprep.mubr.msk.bf16.mxu0 %vm115_vm10, %v8130_v7 }
 0x27a   :  { %6506 = vmatmul.mubr.msk.bf16.gmra.mrb[56].mxu0 %vm115_vm10, %v8135_v11 }
 0x27b   :  { %6509 = vmatprep.mubr.msk.bf16.mxu0 %vm115_vm10, %v8139_v56 }
 0x282   :  { %6510 = vmatmul.mubr.msk.bf16.gmra.mrb[60].mxu0 %vm115_vm10, %v1883_v33 }
 0x2dd   :  { %v8275_v31 = vpop.f32.mrb[0].mxu0 }
 0x2de   :  { %v8277_v53 = vpop.f32.mrb[1].mxu0  ;;  %v2347_v18 = vsel %vm509_vm6, %v8275_v31, 0.0 }
 0x2df   :  { %v8279_v55 = vpop.f32.mrb[2].mxu0  ;;  %v2344_v36 = vsel %vm509_vm6, %v8277_v53, 0.0 }
 0x2e0   :  { %v8281_v61 = vpop.f32.mrb[3].mxu0  ;;  %v2349_v0 = vsel %vm509_vm6, %v8279_v55, 0.0 }
 0x2e1   :  { %v2345_v48 = vsel %vm509_vm6, %v8281_v61, 0.0 }
 0x2e2   :  { %v2346_v4 = vadd.f32 %v2345_v48, %v2344_v36 }
 0x2e4   :  { %v2348_v16 = vadd.f32 %v2347_v18, %v2346_v4 }
 0x2e5   :  { %v8291_v29 = vpop.f32.mrb[4].mxu0 }
 0x2e6   :  { %v8293_v26 = vpop.f32.mrb[5].mxu0  ;;  %v2350_v3 = vadd.f32 %v2349_v0, %v2348_v16  ;;  %v2355_v51 = vsel %vm509_vm6, %v8291_v29, 0.0 }
 0x2e7   :  { %v2351_v1 = vsel %vm509_vm6, %v8293_v26, 0.0  ;;  %v8297_v43 = vpop.f32.mrb[6].mxu0 }
 0x2e8   :  { %v2352_v32 = vadd.f32 %v2351_v1, %v2350_v3  ;;  %v8299_v12 = vpop.f32.mrb[7].mxu0  ;;  %v2357_v13 = vsel %vm509_vm6, %v8297_v43, 0.0 }
 0x2e9   :  { %v2353_v34 = vsel %vm509_vm6, %v8299_v12, 0.0 }
 0x2ea   :  { %v2354_v58 = vadd.f32 %v2353_v34, %v2352_v32 }
 0x2ec   :  { %v2356_v15 = vadd.f32 %v2355_v51, %v2354_v58 }
 0x2ed   :  { %v8307_v50 = vpop.f32.mrb[8].mxu0 }
 0x2ee   :  { %v8309_v25 = vpop.f32.mrb[9].mxu0  ;;  %v2358_v38 = vadd.f32 %v2357_v13, %v2356_v15  ;;  %v2363_v6 = vsel %vm509_vm6, %v8307_v50, 0.0 }
 0x2ef   :  { %v2359_v37 = vsel %vm509_vm6, %v8309_v25, 0.0  ;;  %v8313_v27 = vpop.f32.mrb[10].mxu0 }
 0x2f0   :  { %v2360_v44 = vadd.f32 %v2359_v37, %v2358_v38  ;;  %v8315_v47 = vpop.f32.mrb[11].mxu0  ;;  %v2365_v8 = vsel %vm509_vm6, %v8313_v27, 0.0 }
 0x2f1   :  { %v2361_v52 = vsel %vm509_vm6, %v8315_v47, 0.0 }
 0x2f2   :  { %v2362_v35 = vadd.f32 %v2361_v52, %v2360_v44 }
 0x2f4   :  { %v2364_v57 = vadd.f32 %v2363_v6, %v2362_v35 }
 0x2f5   :  { %v8323_v5 = vpop.f32.mrb[12].mxu0 }
 0x2f6   :  { %v8325_v10 = vpop.f32.mrb[13].mxu0  ;;  %v2366_v42 = vadd.f32 %v2365_v8, %v2364_v57  ;;  %v2371_v41 = vsel %vm509_vm6, %v8323_v5, 0.0 }
 0x2f7   :  { %v2367_v23 = vsel %vm509_vm6, %v8325_v10, 0.0  ;;  %v8329_v9 = vpop.f32.mrb[14].mxu0 }
 0x2f8   :  { %v2368_v21 = vadd.f32 %v2367_v23, %v2366_v42  ;;  %v8331_v14 = vpop.f32.mrb[15].mxu0  ;;  %v2373_v24 = vsel %vm509_vm6, %v8329_v9, 0.0 }
 0x2f9   :  { %v2369_v63 = vsel %vm509_vm6, %v8331_v14, 0.0 }
 0x2fa   :  { %v2370_v62 = vadd.f32 %v2369_v63, %v2368_v21 }
 0x2fc   :  { %v2372_v45 = vadd.f32 %v2371_v41, %v2370_v62 }
 0x2fd   :  { %v8339_v2 = vpop.f32.mrb[16].mxu0 }
 0x2fe   :  { %v8341_v46 = vpop.f32.mrb[17].mxu0  ;;  %v2374_v28 = vadd.f32 %v2373_v24, %v2372_v45  ;;  %v2379_v60 = vsel %vm509_vm6, %v8339_v2, 0.0 }
 0x2ff   :  { %v2375_v40 = vsel %vm509_vm6, %v8341_v46, 0.0  ;;  %v8345_v49 = vpop.f32.mrb[18].mxu0 }
 0x300   :  { %v2376_v59 = vadd.f32 %v2375_v40, %v2374_v28  ;;  %v8347_v20 = vpop.f32.mrb[19].mxu0  ;;  %v2381_v11 = vsel %vm509_vm6, %v8345_v49, 0.0 }
 0x301   :  { %v2377_v17 = vsel %vm509_vm6, %v8347_v20, 0.0 }
 0x302   :  { %v2378_v54 = vadd.f32 %v2377_v17, %v2376_v59 }
 0x304   :  { %v2380_v7 = vadd.f32 %v2379_v60, %v2378_v54 }
 0x305   :  { %v8355_v56 = vpop.f32.mrb[20].mxu0 }
 0x306   :  { %v8357_v30 = vpop.f32.mrb[21].mxu0  ;;  %v2382_v39 = vadd.f32 %v2381_v11, %v2380_v7  ;;  %v2387_v0 = vsel %vm509_vm6, %v8355_v56, 0.0 }
 0x307   :  { %v2383_v33 = vsel %vm509_vm6, %v8357_v30, 0.0  ;;  %v8361_v36 = vpop.f32.mrb[22].mxu0 }
 0x308   :  { %v2384_v48 = vadd.f32 %v2383_v33, %v2382_v39  ;;  %v8363_v4 = vpop.f32.mrb[23].mxu0  ;;  %v2389_v1 = vsel %vm509_vm6, %v8361_v36, 0.0 }
 0x309   :  { %v2385_v18 = vsel %vm509_vm6, %v8363_v4, 0.0 }
 0x30a   :  { %v2386_v16 = vadd.f32 %v2385_v18, %v2384_v48 }
 0x30c   :  { %v2388_v3 = vadd.f32 %v2387_v0, %v2386_v16 }
 0x30d   :  { %v8371_v32 = vpop.f32.mrb[24].mxu0 }
 0x30e   :  { %v8373_v34 = vpop.f32.mrb[25].mxu0  ;;  %v2390_v58 = vadd.f32 %v2389_v1, %v2388_v3  ;;  %v2395_v52 = vsel %vm509_vm6, %v8371_v32, 0.0 }
 0x30f   :  { %v2391_v51 = vsel %vm509_vm6, %v8373_v34, 0.0  ;;  %v8377_v15 = vpop.f32.mrb[26].mxu0 }
 0x310   :  { %v2392_v13 = vadd.f32 %v2391_v51, %v2390_v58  ;;  %v8379_v38 = vpop.f32.mrb[27].mxu0  ;;  %v2397_v6 = vsel %vm509_vm6, %v8377_v15, 0.0 }
 0x311   :  { %v2393_v37 = vsel %vm509_vm6, %v8379_v38, 0.0 }
 0x312   :  { %v2394_v44 = vadd.f32 %v2393_v37, %v2392_v13 }
 0x314   :  { %v2396_v35 = vadd.f32 %v2395_v52, %v2394_v44 }
 0x315   :  { %v8387_v57 = vpop.f32.mrb[28].mxu0 }
 0x316   :  { %v8389_v8 = vpop.f32.mrb[29].mxu0  ;;  %v2398_v42 = vadd.f32 %v2397_v6, %v2396_v35  ;;  %v2403_v24 = vsel %vm509_vm6, %v8387_v57, 0.0 }
 0x317   :  { %v2399_v23 = vsel %vm509_vm6, %v8389_v8, 0.0  ;;  %v8393_v21 = vpop.f32.mrb[30].mxu0 }
 0x318   :  { %v2400_v63 = vadd.f32 %v2399_v23, %v2398_v42  ;;  %v8395_v62 = vpop.f32.mrb[31].mxu0  ;;  %v2405_v40 = vsel %vm509_vm6, %v8393_v21, 0.0 }
 0x319   :  { %v2401_v41 = vsel %vm509_vm6, %v8395_v62, 0.0 }
 0x31a   :  { %v2402_v45 = vadd.f32 %v2401_v41, %v2400_v63 }
 0x31c   :  { %v2404_v28 = vadd.f32 %v2403_v24, %v2402_v45 }
 0x31d   :  { %v8403_v59 = vpop.f32.mrb[32].mxu0 }
 0x31e   :  { %v8405_v17 = vpop.f32.mrb[33].mxu0  ;;  %v2406_v54 = vadd.f32 %v2405_v40, %v2404_v28  ;;  %v2411_v18 = vsel %vm509_vm6, %v8403_v59, 0.0 }
 0x31f   :  { %v2407_v60 = vsel %vm509_vm6, %v8405_v17, 0.0  ;;  %v8409_v7 = vpop.f32.mrb[34].mxu0 }
 0x320   :  { %v2408_v11 = vadd.f32 %v2407_v60, %v2406_v54  ;;  %v8411_v39 = vpop.f32.mrb[35].mxu0  ;;  %v2413_v0 = vsel %vm509_vm6, %v8409_v7, 0.0 }
 0x321   :  { %v2409_v33 = vsel %vm509_vm6, %v8411_v39, 0.0 }
 0x322   :  { %v2410_v48 = vadd.f32 %v2409_v33, %v2408_v11 }
 0x324   :  { %v2412_v16 = vadd.f32 %v2411_v18, %v2410_v48 }
 0x325   :  { %v8419_v3 = vpop.f32.mrb[36].mxu0 }
 0x326   :  { %v8421_v1 = vpop.f32.mrb[37].mxu0  ;;  %v2414_v58 = vadd.f32 %v2413_v0, %v2412_v16  ;;  %v2419_v6 = vsel %vm509_vm6, %v8419_v3, 0.0 }
 0x327   :  { %v2415_v51 = vsel %vm509_vm6, %v8421_v1, 0.0  ;;  %v8425_v13 = vpop.f32.mrb[38].mxu0 }
 0x328   :  { %v2416_v37 = vadd.f32 %v2415_v51, %v2414_v58  ;;  %v8427_v44 = vpop.f32.mrb[39].mxu0  ;;  %v2421_v23 = vsel %vm509_vm6, %v8425_v13, 0.0 }
 0x329   :  { %v2417_v52 = vsel %vm509_vm6, %v8427_v44, 0.0 }
 0x32a   :  { %v2418_v35 = vadd.f32 %v2417_v52, %v2416_v37 }
 0x32c   :  { %v2420_v42 = vadd.f32 %v2419_v6, %v2418_v35 }
 0x32d   :  { %v8435_v63 = vpop.f32.mrb[40].mxu0 }
 0x32e   :  { %v8437_v41 = vpop.f32.mrb[41].mxu0  ;;  %v2422_v45 = vadd.f32 %v2421_v23, %v2420_v42  ;;  %v2427_v33 = vsel %vm509_vm6, %v8435_v63, 0.0 }
 0x32f   :  { %v2423_v24 = vsel %vm509_vm6, %v8437_v41, 0.0  ;;  %v8441_v28 = vpop.f32.mrb[42].mxu0 }
 0x330   :  { %v2424_v40 = vadd.f32 %v2423_v24, %v2422_v45  ;;  %v8443_v54 = vpop.f32.mrb[43].mxu0  ;;  %v2429_v18 = vsel %vm509_vm6, %v8441_v28, 0.0 }
 0x331   :  { %v2425_v60 = vsel %vm509_vm6, %v8443_v54, 0.0 }
 0x332   :  { %v2426_v11 = vadd.f32 %v2425_v60, %v2424_v40 }
 0x334   :  { %v2428_v48 = vadd.f32 %v2427_v33, %v2426_v11 }
 0x335   :  { %v8451_v16 = vpop.f32.mrb[44].mxu0 }
 0x336   :  { %v8453_v0 = vpop.f32.mrb[45].mxu0  ;;  %v2430_v58 = vadd.f32 %v2429_v18, %v2428_v48  ;;  %v2435_v23 = vsel %vm509_vm6, %v8451_v16, 0.0 }
 0x337   :  { %v2431_v51 = vsel %vm509_vm6, %v8453_v0, 0.0  ;;  %v8457_v37 = vpop.f32.mrb[46].mxu0 }
 0x338   :  { %11921 = vst [vmem:[#allocation23_spill] sm:$0xff] %v8457_v37  ;;  %v2432_v52 = vadd.f32 %v2431_v51, %v2430_v58  ;;  %v8459_v35 = vpop.f32.mrb[47].mxu0  ;;  %v2437_v24 = vsel %vm509_vm6, %v8457_v37, 0.0 }
 0x339   :  { %v2433_v6 = vsel %vm509_vm6, %v8459_v35, 0.0 }
 0x33a   :  { %v2434_v42 = vadd.f32 %v2433_v6, %v2432_v52 }
 0x33c   :  { %v2436_v45 = vadd.f32 %v2435_v23, %v2434_v42 }
 0x33d   :  { %v8467_v40 = vpop.f32.mrb[48].mxu0 }
 0x33e   :  { %11922 = vst [vmem:[#allocation24_spill] sm:$0xff] %v8467_v40  ;;  %v8469_v60 = vpop.f32.mrb[49].mxu0  ;;  %v2438_v11 = vadd.f32 %v2437_v24, %v2436_v45  ;;  %v2443_v6 = vsel %vm509_vm6, %v8467_v40, 0.0 }
 0x33f   :  { %11923 = vst [vmem:[#allocation25_spill] sm:$0xff] %v8469_v60  ;;  %v2439_v33 = vsel %vm509_vm6, %v8469_v60, 0.0  ;;  %v8473_v48 = vpop.f32.mrb[50].mxu0 }
 0x340   :  { %11924 = vst [vmem:[#allocation26_spill] sm:$0xff] %v8473_v48  ;;  %v2440_v18 = vadd.f32 %v2439_v33, %v2438_v11  ;;  %v8475_v58 = vpop.f32.mrb[51].mxu0  ;;  %v2445_v23 = vsel %vm509_vm6, %v8473_v48, 0.0 }
 0x341   :  { %11925 = vst [vmem:[#allocation27_spill] sm:$0xff] %v8475_v58  ;;  %v2441_v51 = vsel %vm509_vm6, %v8475_v58, 0.0 }
 0x342   :  { %v2442_v52 = vadd.f32 %v2441_v51, %v2440_v18 }
 0x344   :  { %v2444_v42 = vadd.f32 %v2443_v6, %v2442_v52 }
 0x345   :  { %v8483_v45 = vpop.f32.mrb[52].mxu0 }
 0x346   :  { %11926 = vst [vmem:[#allocation28_spill] sm:$0xff] %v8483_v45  ;;  %v8485_v24 = vpop.f32.mrb[53].mxu0  ;;  %v2446_v22 = vadd.f32 %v2445_v23, %v2444_v42  ;;  %v2451_v52 = vsel %vm509_vm6, %v8483_v45, 0.0 }
 0x347   :  { %11927 = vst [vmem:[#allocation29_spill] sm:$0xff] %v8485_v24  ;;  %v2447_v11 = vsel %vm509_vm6, %v8485_v24, 0.0  ;;  %v8489_v33 = vpop.f32.mrb[54].mxu0 }
 0x348   :  { %11928 = vst [vmem:[#allocation30_spill] sm:$0xff] %v8489_v33  ;;  %v2448_v19 = vadd.f32 %v2447_v11, %v2446_v22  ;;  %v8491_v58 = vpop.f32.mrb[55].mxu0  ;;  %v2453_v48 = vsel %vm509_vm6, %v8489_v33, 0.0 }
 0x349   :  { %11929 = vst [vmem:[#allocation31_spill] sm:$0xff] %v8491_v58  ;;  %v2449_v18 = vsel %vm509_vm6, %v8491_v58, 0.0 }
 0x34a   :  { %v2450_v51 = vadd.f32 %v2449_v18, %v2448_v19 }
 0x34c   :  { %v2452_v6 = vadd.f32 %v2451_v52, %v2450_v51 }
 0x34d   :  { %v8499_v42 = vpop.f32.mrb[56].mxu0 }
 0x34e   :  { %11930 = vst [vmem:[#allocation32_spill] sm:$0xff] %v8499_v42  ;;  %v8501_v23 = vpop.f32.mrb[57].mxu0  ;;  %v2454_v24 = vadd.f32 %v2453_v48, %v2452_v6  ;;  %v2459_v51 = vsel %vm509_vm6, %v8499_v42, 0.0 }
 0x34f   :  { %11931 = vst [vmem:[#allocation33_spill] sm:$0xff] %v8501_v23  ;;  %v2455_v22 = vsel %vm509_vm6, %v8501_v23, 0.0  ;;  %v8505_v11 = vpop.f32.mrb[58].mxu0 }
 0x350   :  { %11932 = vst [vmem:[#allocation34_spill] sm:$0xff] %v8505_v11  ;;  %v2456_v40 = vadd.f32 %v2455_v22, %v2454_v24  ;;  %v8507_v58 = vpop.f32.mrb[59].mxu0  ;;  %v2461_v33 = vsel %vm509_vm6, %v8505_v11, 0.0 }
 0x351   :  { %11933 = vst [vmem:[#allocation35_spill] sm:$0xff] %v8507_v58  ;;  %v2457_v19 = vsel %vm509_vm6, %v8507_v58, 0.0 }
 0x352   :  { %v2458_v18 = vadd.f32 %v2457_v19, %v2456_v40 }
 0x354   :  { %v2460_v52 = vadd.f32 %v2459_v51, %v2458_v18 }
 0x355   :  { %v8515_v48 = vpop.f32.mrb[60].mxu0 }
 0x356   :  { %v8517_v6 = vpop.f32.mrb[61].mxu0  ;;  %v2462_v23 = vadd.f32 %v2461_v33, %v2460_v52  ;;  %v2467_v18 = vsel %vm509_vm6, %v8515_v48, 0.0 }
 0x357   :  { %11934 = vst [vmem:[#allocation36_spill] sm:$0xff] %v8517_v6  ;;  %v2463_v24 = vsel %vm509_vm6, %v8517_v6, 0.0  ;;  %v8521_v22 = vpop.f32.mrb[62].mxu0 }
 0x358   :  { %v2464_v45 = vadd.f32 %v2463_v24, %v2462_v23  ;;  %v8523_v58 = vpop.f32.mrb[63].mxu0  ;;  %v2469_v11 = vsel %vm509_vm6, %v8521_v22, 0.0 }
 0x359   :  { %11935 = vst [vmem:[#allocation37_spill] sm:$0xff] %v8523_v58  ;;  %v2465_v40 = vsel %vm509_vm6, %v8523_v58, 0.0 }
 0x35a   :  { %v2466_v19 = vadd.f32 %v2465_v40, %v2464_v45 }
 0x35c   :  { %v2468_v51 = vadd.f32 %v2467_v18, %v2466_v19  ;;  %v11946_v19 = vld [vmem:[#allocation24_spill] sm:$0xff]  ;;  %v11948_v18 = vld [vmem:[#allocation26_spill] sm:$0xff] }
 0x35e   :  { %v2470_v33 = vadd.f32 %v2469_v11, %v2468_v51  ;;  %v11950_v51 = vld [vmem:[#allocation29_spill] sm:$0xff] }
 0x360   :  { %v2471_v52 = vrot.slane %v2470_v33, 4 }
 0x362   :  { %v2472_v42 = vadd.f32 %v2471_v52, %v2470_v33  ;;  %v11952_v52 = vld [vmem:[#allocation31_spill] sm:$0xff] }
 0x364   :  { %v2473_v6 = vrot.slane %v2472_v42, 2 }
 0x366   :  { %v2474_v60 = vadd.f32 %v2473_v6, %v2472_v42  ;;  %v11942_v42 = vld [vmem:[#allocation25_spill] sm:$0xff]  ;;  %v11944_v6 = vld [vmem:[#allocation27_spill] sm:$0xff] }
 0x368   :  { %v2475_v37 = vrot.slane %v2474_v60, 1 }
 0x36a   :  { %v2476_v23 = vadd.f32 %v2475_v37, %v2474_v60  ;;  %v11940_v60 = vld [vmem:[#allocation23_spill] sm:$0xff] }
 0x36c   :  { %v8531_v24 = vmul.f32 0.001953125, %v2476_v23 }
 0x36e   :  { %v8535_v58 = vsub.f32 %v8277_v53, %v8531_v24  ;;  %v8539_v45 = vsub.f32 %v8281_v61, %v8531_v24  ;;  %v8543_v40 = vsub.f32 %v8275_v31, %v8531_v24  ;;  %v8547_v11 = vsub.f32 %v8279_v55, %v8531_v24 }
 0x36f   :  { %v8551_v37 = vsub.f32 %v8293_v26, %v8531_v24  ;;  %v8555_v53 = vsub.f32 %v8299_v12, %v8531_v24  ;;  %v8559_v61 = vsub.f32 %v8291_v29, %v8531_v24  ;;  %v8563_v31 = vsub.f32 %v8297_v43, %v8531_v24 }
 0x370   :  { %11936 = vst [vmem:[#allocation38_spill] sm:$0xff] %v8535_v58  ;;  %11937 = vst [vmem:[#allocation39_spill] sm:$0xff] %v8539_v45  ;;  %v8567_v55 = vsub.f32 %v8309_v25, %v8531_v24  ;;  %v8571_v26 = vsub.f32 %v8315_v47, %v8531_v24  ;;  %v8575_v12 = vsub.f32 %v8307_v50, %v8531_v24 }
 0x371   :  { %11938 = vst [vmem:[#allocation40_spill] sm:$0xff] %v8543_v40  ;;  %11939 = vst [vmem:[#allocation41_spill] sm:$0xff] %v8547_v11  ;;  %v8579_v29 = vsub.f32 %v8313_v27, %v8531_v24  ;;  %v8583_v43 = vsub.f32 %v8325_v10, %v8531_v24  ;;  %v8587_v25 = vsub.f32 %v8331_v14, %v8531_v24 }
 0x372   :  { %v8591_v47 = vsub.f32 %v8323_v5, %v8531_v24  ;;  %v8595_v50 = vsub.f32 %v8329_v9, %v8531_v24  ;;  %v8599_v27 = vsub.f32 %v8341_v46, %v8531_v24  ;;  %v8603_v10 = vsub.f32 %v8347_v20, %v8531_v24 }
 0x373   :  { %v8607_v14 = vsub.f32 %v8339_v2, %v8531_v24  ;;  %v8611_v5 = vsub.f32 %v8345_v49, %v8531_v24  ;;  %v8615_v9 = vsub.f32 %v8357_v30, %v8531_v24  ;;  %v8619_v46 = vsub.f32 %v8363_v4, %v8531_v24 }
 0x374   :  { %v8623_v20 = vsub.f32 %v8355_v56, %v8531_v24  ;;  %v8627_v2 = vsub.f32 %v8361_v36, %v8531_v24  ;;  %v8631_v49 = vsub.f32 %v8373_v34, %v8531_v24  ;;  %v8635_v30 = vsub.f32 %v8379_v38, %v8531_v24 }
 0x375   :  { %v8639_v4 = vsub.f32 %v8371_v32, %v8531_v24  ;;  %v8643_v56 = vsub.f32 %v8377_v15, %v8531_v24  ;;  %v8647_v36 = vsub.f32 %v8389_v8, %v8531_v24  ;;  %v8651_v34 = vsub.f32 %v8395_v62, %v8531_v24 }
 0x376   :  { %v8655_v38 = vsub.f32 %v8387_v57, %v8531_v24  ;;  %v8659_v32 = vsub.f32 %v8393_v21, %v8531_v24  ;;  %v8663_v15 = vsub.f32 %v8405_v17, %v8531_v24  ;;  %v8667_v8 = vsub.f32 %v8411_v39, %v8531_v24 }
 0x377   :  { %v8671_v62 = vsub.f32 %v8403_v59, %v8531_v24  ;;  %v8675_v57 = vsub.f32 %v8409_v7, %v8531_v24  ;;  %v8679_v21 = vsub.f32 %v8421_v1, %v8531_v24  ;;  %v8683_v17 = vsub.f32 %v8427_v44, %v8531_v24 }
 0x378   :  { %v8687_v39 = vsub.f32 %v8419_v3, %v8531_v24  ;;  %v8691_v59 = vsub.f32 %v8425_v13, %v8531_v24  ;;  %v8695_v7 = vsub.f32 %v8437_v41, %v8531_v24  ;;  %v8699_v1 = vsub.f32 %v8443_v54, %v8531_v24 }
 0x379   :  { %v8703_v44 = vsub.f32 %v8435_v63, %v8531_v24  ;;  %v8707_v3 = vsub.f32 %v8441_v28, %v8531_v24  ;;  %v8711_v13 = vsub.f32 %v8453_v0, %v8531_v24  ;;  %v8715_v41 = vsub.f32 %v8459_v35, %v8531_v24 }
 0x37a   :  { %v8719_v54 = vsub.f32 %v8451_v16, %v8531_v24  ;;  %v8723_v63 = vsub.f32 %v11940_v60, %v8531_v24  ;;  %v8727_v28 = vsub.f32 %v11942_v42, %v8531_v24  ;;  %v8731_v0 = vsub.f32 %v11944_v6, %v8531_v24  ;;  %v11954_v60 = vld [vmem:[#allocation28_spill] sm:$0xff]  ;;  %v11956_v6 = vld [vmem:[#allocation30_spill] sm:$0xff] }
 0x37b   :  { %v8735_v35 = vsub.f32 %v11946_v19, %v8531_v24  ;;  %v8739_v16 = vsub.f32 %v11948_v18, %v8531_v24  ;;  %v8743_v33 = vsub.f32 %v11950_v51, %v8531_v24  ;;  %v8747_v23 = vsub.f32 %v11952_v52, %v8531_v24 }
 0x37c   :  { %11941 = vst [vmem:[#allocation23_spill] sm:$0xff] %v8723_v63  ;;  %11943 = vst [vmem:[#allocation25_spill] sm:$0xff] %v8727_v28  ;;  %v8751_v42 = vsub.f32 %v11954_v60, %v8531_v24  ;;  %v8755_v19 = vsub.f32 %v11956_v6, %v8531_v24 }
 0x37d   :  { %11945 = vst [vmem:[#allocation27_spill] sm:$0xff] %v8731_v0  ;;  %11947 = vst [vmem:[#allocation24_spill] sm:$0xff] %v8735_v35  ;;  %v11958_v35 = vld [vmem:[#allocation33_spill] sm:$0xff] }
 0x37e   :  { %11949 = vst [vmem:[#allocation26_spill] sm:$0xff] %v8739_v16  ;;  %11951 = vst [vmem:[#allocation29_spill] sm:$0xff] %v8743_v33  ;;  %v8759_v18 = vsub.f32 %v11958_v35, %v8531_v24  ;;  %v11960_v16 = vld [vmem:[#allocation35_spill] sm:$0xff]  ;;  %v11962_v33 = vld [vmem:[#allocation32_spill] sm:$0xff] }
 0x37f   :  { %11953 = vst [vmem:[#allocation31_spill] sm:$0xff] %v8747_v23  ;;  %11955 = vst [vmem:[#allocation28_spill] sm:$0xff] %v8751_v42  ;;  %v8763_v51 = vsub.f32 %v11960_v16, %v8531_v24  ;;  %v8767_v52 = vsub.f32 %v11962_v33, %v8531_v24  ;;  %v11964_v23 = vld [vmem:[#allocation34_spill] sm:$0xff]  ;;  %v11966_v42 = vld [vmem:[#allocation36_spill] sm:$0xff]  ;;  %v8783_v16 = vsub.f32 %v8515_v48, %v8531_v24 }
 0x380   :  { %11957 = vst [vmem:[#allocation30_spill] sm:$0xff] %v8755_v19  ;;  %11959 = vst [vmem:[#allocation33_spill] sm:$0xff] %v8759_v18  ;;  %v8771_v60 = vsub.f32 %v11964_v23, %v8531_v24  ;;  %v8775_v6 = vsub.f32 %v11966_v42, %v8531_v24  ;;  %v11968_v19 = vld [vmem:[#allocation37_spill] sm:$0xff]  ;;  %v8787_v33 = vsub.f32 %v8521_v22, %v8531_v24 }
 0x381   :  { %11961 = vst [vmem:[#allocation35_spill] sm:$0xff] %v8763_v51  ;;  %11963 = vst [vmem:[#allocation32_spill] sm:$0xff] %v8767_v52  ;;  %v8779_v35 = vsub.f32 %v11968_v19, %v8531_v24  ;;  %v2542_v23 = vmul.f32 %v8535_v58, %v8535_v58  ;;  %v2544_v42 = vmul.f32 %v8543_v40, %v8543_v40 }
 0x382   :  { %11965 = vst [vmem:[#allocation34_spill] sm:$0xff] %v8771_v60  ;;  %11967 = vst [vmem:[#allocation36_spill] sm:$0xff] %v8775_v6  ;;  %v2543_v60 = vmul.f32 %v8539_v45, %v8539_v45  ;;  %v2545_v19 = vmul.f32 %v8547_v11, %v8547_v11  ;;  %v2546_v22 = vmul.f32 %v8551_v37, %v8551_v37 }
 0x383   :  { %11969 = vst [vmem:[#allocation37_spill] sm:$0xff] %v8779_v35  ;;  %11970 = vst [vmem:[#allocation42_spill] sm:$0xff] %v8783_v16  ;;  %v2606_v35 = vsel %vm509_vm6, %v2542_v23, 0.0  ;;  %v2609_v24 = vsel %vm509_vm6, %v2544_v42, 0.0  ;;  %v2547_v45 = vmul.f32 %v8555_v53, %v8555_v53  ;;  %v2548_v11 = vmul.f32 %v8559_v61, %v8559_v61 }
 0x384   :  { %11971 = vst [vmem:[#allocation43_spill] sm:$0xff] %v8787_v33  ;;  %v2607_v48 = vsel %vm509_vm6, %v2543_v60, 0.0  ;;  %v2611_v33 = vsel %vm509_vm6, %v2545_v19, 0.0  ;;  %v2613_v23 = vsel %vm509_vm6, %v2546_v22, 0.0  ;;  %v2549_v60 = vmul.f32 %v8563_v31, %v8563_v31 }
 0x385   :  { %v2608_v16 = vadd.f32 %v2607_v48, %v2606_v35  ;;  %v2615_v35 = vsel %vm509_vm6, %v2547_v45, 0.0  ;;  %v2617_v42 = vsel %vm509_vm6, %v2548_v11, 0.0  ;;  %v2553_v45 = vmul.f32 %v8579_v29, %v8579_v29 }
 0x386   :  { %v2554_v11 = vmul.f32 %v8583_v43, %v8583_v43 }
 0x387   :  { %v2610_v58 = vadd.f32 %v2609_v24, %v2608_v16  ;;  %v2550_v16 = vmul.f32 %v8567_v55, %v8567_v55 }
 0x389   :  { %v2612_v40 = vadd.f32 %v2611_v33, %v2610_v58  ;;  %v2551_v58 = vmul.f32 %v8571_v26, %v8571_v26  ;;  %v2619_v33 = vsel %vm509_vm6, %v2549_v60, 0.0  ;;  %v2621_v22 = vsel %vm509_vm6, %v2550_v16, 0.0 }
 0x38a   :  { %v2555_v60 = vmul.f32 %v8587_v25, %v8587_v25  ;;  %v2556_v16 = vmul.f32 %v8591_v47, %v8591_v47 }
 0x38b   :  { %v2614_v6 = vadd.f32 %v2613_v23, %v2612_v40  ;;  %v2552_v40 = vmul.f32 %v8575_v12, %v8575_v12 }
 0x38d   :  { %v2616_v48 = vadd.f32 %v2615_v35, %v2614_v6  ;;  %v2623_v6 = vsel %vm509_vm6, %v2551_v58, 0.0  ;;  %v2557_v58 = vmul.f32 %v8595_v50, %v8595_v50 }
 0x38f   :  { %v2618_v24 = vadd.f32 %v2617_v42, %v2616_v48  ;;  %v2625_v48 = vsel %vm509_vm6, %v2552_v40, 0.0  ;;  %v2558_v40 = vmul.f32 %v8599_v27, %v8599_v27 }
 0x391   :  { %v2620_v19 = vadd.f32 %v2619_v33, %v2618_v24  ;;  %v2627_v24 = vsel %vm509_vm6, %v2553_v45, 0.0  ;;  %v2559_v45 = vmul.f32 %v8603_v10, %v8603_v10 }
 0x393   :  { %v2622_v23 = vadd.f32 %v2621_v22, %v2620_v19  ;;  %v2629_v19 = vsel %vm509_vm6, %v2554_v11, 0.0  ;;  %v2560_v11 = vmul.f32 %v8607_v14, %v8607_v14 }
 0x395   :  { %v2624_v35 = vadd.f32 %v2623_v6, %v2622_v23  ;;  %v2631_v23 = vsel %vm509_vm6, %v2555_v60, 0.0  ;;  %v2561_v60 = vmul.f32 %v8611_v5, %v8611_v5 }
 0x397   :  { %v2626_v42 = vadd.f32 %v2625_v48, %v2624_v35  ;;  %v2633_v35 = vsel %vm509_vm6, %v2556_v16, 0.0  ;;  %v2562_v16 = vmul.f32 %v8615_v9, %v8615_v9 }
 0x399   :  { %v2628_v33 = vadd.f32 %v2627_v24, %v2626_v42  ;;  %v2635_v42 = vsel %vm509_vm6, %v2557_v58, 0.0  ;;  %v2563_v58 = vmul.f32 %v8619_v46, %v8619_v46 }
 0x39b   :  { %v2630_v22 = vadd.f32 %v2629_v19, %v2628_v33  ;;  %v2637_v33 = vsel %vm509_vm6, %v2558_v40, 0.0  ;;  %v2564_v40 = vmul.f32 %v8623_v20, %v8623_v20 }
 0x39d   :  { %v2632_v6 = vadd.f32 %v2631_v23, %v2630_v22  ;;  %v2639_v22 = vsel %vm509_vm6, %v2559_v45, 0.0  ;;  %v2565_v45 = vmul.f32 %v8627_v2, %v8627_v2 }
 0x39f   :  { %v2634_v48 = vadd.f32 %v2633_v35, %v2632_v6  ;;  %v2641_v6 = vsel %vm509_vm6, %v2560_v11, 0.0  ;;  %v2566_v11 = vmul.f32 %v8631_v49, %v8631_v49 }
 0x3a1   :  { %v2636_v24 = vadd.f32 %v2635_v42, %v2634_v48  ;;  %v2643_v48 = vsel %vm509_vm6, %v2561_v60, 0.0  ;;  %v2567_v60 = vmul.f32 %v8635_v30, %v8635_v30 }
 0x3a3   :  { %v2638_v19 = vadd.f32 %v2637_v33, %v2636_v24  ;;  %v2645_v24 = vsel %vm509_vm6, %v2562_v16, 0.0  ;;  %v2568_v16 = vmul.f32 %v8639_v4, %v8639_v4 }
 0x3a5   :  { %v2640_v23 = vadd.f32 %v2639_v22, %v2638_v19  ;;  %v2647_v19 = vsel %vm509_vm6, %v2563_v58, 0.0  ;;  %v2569_v58 = vmul.f32 %v8643_v56, %v8643_v56 }
 0x3a7   :  { %v2642_v35 = vadd.f32 %v2641_v6, %v2640_v23  ;;  %v2649_v23 = vsel %vm509_vm6, %v2564_v40, 0.0  ;;  %v2570_v40 = vmul.f32 %v8647_v36, %v8647_v36 }
 0x3a9   :  { %v2644_v42 = vadd.f32 %v2643_v48, %v2642_v35  ;;  %v2651_v35 = vsel %vm509_vm6, %v2565_v45, 0.0  ;;  %v2571_v45 = vmul.f32 %v8651_v34, %v8651_v34 }
 0x3ab   :  { %v2646_v33 = vadd.f32 %v2645_v24, %v2644_v42  ;;  %v2653_v42 = vsel %vm509_vm6, %v2566_v11, 0.0  ;;  %v2572_v11 = vmul.f32 %v8655_v38, %v8655_v38 }
 0x3ad   :  { %v2648_v22 = vadd.f32 %v2647_v19, %v2646_v33  ;;  %v2655_v33 = vsel %vm509_vm6, %v2567_v60, 0.0  ;;  %v2573_v60 = vmul.f32 %v8659_v32, %v8659_v32 }
 0x3af   :  { %v2650_v6 = vadd.f32 %v2649_v23, %v2648_v22  ;;  %v2657_v22 = vsel %vm509_vm6, %v2568_v16, 0.0  ;;  %v2574_v16 = vmul.f32 %v8663_v15, %v8663_v15 }
 0x3b1   :  { %v2652_v48 = vadd.f32 %v2651_v35, %v2650_v6  ;;  %v2659_v6 = vsel %vm509_vm6, %v2569_v58, 0.0  ;;  %v2575_v58 = vmul.f32 %v8667_v8, %v8667_v8 }
 0x3b3   :  { %v2654_v24 = vadd.f32 %v2653_v42, %v2652_v48  ;;  %v2661_v48 = vsel %vm509_vm6, %v2570_v40, 0.0  ;;  %v2576_v40 = vmul.f32 %v8671_v62, %v8671_v62 }
 0x3b5   :  { %v2656_v19 = vadd.f32 %v2655_v33, %v2654_v24  ;;  %v2663_v24 = vsel %vm509_vm6, %v2571_v45, 0.0  ;;  %v2577_v45 = vmul.f32 %v8675_v57, %v8675_v57 }
 0x3b7   :  { %v2658_v23 = vadd.f32 %v2657_v22, %v2656_v19  ;;  %v2665_v19 = vsel %vm509_vm6, %v2572_v11, 0.0  ;;  %v2578_v11 = vmul.f32 %v8679_v21, %v8679_v21 }
 0x3b9   :  { %v2660_v35 = vadd.f32 %v2659_v6, %v2658_v23  ;;  %v2667_v23 = vsel %vm509_vm6, %v2573_v60, 0.0  ;;  %v2579_v60 = vmul.f32 %v8683_v17, %v8683_v17 }
 0x3bb   :  { %v2662_v42 = vadd.f32 %v2661_v48, %v2660_v35  ;;  %v2669_v35 = vsel %vm509_vm6, %v2574_v16, 0.0  ;;  %v2580_v16 = vmul.f32 %v8687_v39, %v8687_v39 }
 0x3bd   :  { %v2664_v33 = vadd.f32 %v2663_v24, %v2662_v42  ;;  %v2671_v42 = vsel %vm509_vm6, %v2575_v58, 0.0  ;;  %v2581_v58 = vmul.f32 %v8691_v59, %v8691_v59 }
 0x3bf   :  { %v2666_v22 = vadd.f32 %v2665_v19, %v2664_v33  ;;  %v2673_v33 = vsel %vm509_vm6, %v2576_v40, 0.0  ;;  %v2582_v40 = vmul.f32 %v8695_v7, %v8695_v7 }
 0x3c1   :  { %v2668_v6 = vadd.f32 %v2667_v23, %v2666_v22  ;;  %v2675_v22 = vsel %vm509_vm6, %v2577_v45, 0.0  ;;  %v2583_v45 = vmul.f32 %v8699_v1, %v8699_v1 }
 0x3c3   :  { %v2670_v48 = vadd.f32 %v2669_v35, %v2668_v6  ;;  %v2677_v6 = vsel %vm509_vm6, %v2578_v11, 0.0  ;;  %v2584_v11 = vmul.f32 %v8703_v44, %v8703_v44 }
 0x3c5   :  { %v2672_v24 = vadd.f32 %v2671_v42, %v2670_v48  ;;  %v2679_v48 = vsel %vm509_vm6, %v2579_v60, 0.0  ;;  %v2585_v60 = vmul.f32 %v8707_v3, %v8707_v3 }
 0x3c7   :  { %v2674_v19 = vadd.f32 %v2673_v33, %v2672_v24  ;;  %v2681_v24 = vsel %vm509_vm6, %v2580_v16, 0.0  ;;  %v2586_v16 = vmul.f32 %v8711_v13, %v8711_v13 }
 0x3c9   :  { %v2676_v23 = vadd.f32 %v2675_v22, %v2674_v19  ;;  %v2683_v19 = vsel %vm509_vm6, %v2581_v58, 0.0  ;;  %v2587_v58 = vmul.f32 %v8715_v41, %v8715_v41 }
 0x3cb   :  { %v2678_v35 = vadd.f32 %v2677_v6, %v2676_v23  ;;  %v2685_v23 = vsel %vm509_vm6, %v2582_v40, 0.0  ;;  %v2588_v40 = vmul.f32 %v8719_v54, %v8719_v54 }
 0x3cd   :  { %v2680_v42 = vadd.f32 %v2679_v48, %v2678_v35  ;;  %v2687_v35 = vsel %vm509_vm6, %v2583_v45, 0.0  ;;  %v2589_v45 = vmul.f32 %v8723_v63, %v8723_v63 }
 0x3cf   :  { %v2682_v33 = vadd.f32 %v2681_v24, %v2680_v42  ;;  %v2689_v42 = vsel %vm509_vm6, %v2584_v11, 0.0  ;;  %v2590_v11 = vmul.f32 %v8727_v28, %v8727_v28 }
 0x3d1   :  { %v2684_v22 = vadd.f32 %v2683_v19, %v2682_v33  ;;  %v2691_v33 = vsel %vm509_vm6, %v2585_v60, 0.0  ;;  %v2591_v60 = vmul.f32 %v8731_v0, %v8731_v0 }
 0x3d3   :  { %v2686_v6 = vadd.f32 %v2685_v23, %v2684_v22  ;;  %v2693_v22 = vsel %vm509_vm6, %v2586_v16, 0.0  ;;  %v11972_v16 = vld [vmem:[#allocation24_spill] sm:$0xff] }
 0x3d5   :  { %v2688_v48 = vadd.f32 %v2687_v35, %v2686_v6  ;;  %v2695_v6 = vsel %vm509_vm6, %v2587_v58, 0.0  ;;  %v11973_v58 = vld [vmem:[#allocation26_spill] sm:$0xff] }
 0x3d7   :  { %v2690_v24 = vadd.f32 %v2689_v42, %v2688_v48  ;;  %v2697_v48 = vsel %vm509_vm6, %v2588_v40, 0.0  ;;  %v11974_v40 = vld [vmem:[#allocation29_spill] sm:$0xff] }
 0x3d9   :  { %v2692_v19 = vadd.f32 %v2691_v33, %v2690_v24  ;;  %v2699_v24 = vsel %vm509_vm6, %v2589_v45, 0.0  ;;  %v11975_v45 = vld [vmem:[#allocation31_spill] sm:$0xff] }
 0x3db   :  { %v2694_v23 = vadd.f32 %v2693_v22, %v2692_v19  ;;  %v2592_v19 = vmul.f32 %v11972_v16, %v11972_v16  ;;  %v2701_v22 = vsel %vm509_vm6, %v2590_v11, 0.0  ;;  %v11976_v11 = vld [vmem:[#allocation28_spill] sm:$0xff] }
 0x3dd   :  { %v2696_v35 = vadd.f32 %v2695_v6, %v2694_v23  ;;  %v2593_v23 = vmul.f32 %v11973_v58, %v11973_v58  ;;  %v2703_v6 = vsel %vm509_vm6, %v2591_v60, 0.0  ;;  %v11977_v60 = vld [vmem:[#allocation30_spill] sm:$0xff] }
 0x3df   :  { %v2698_v42 = vadd.f32 %v2697_v48, %v2696_v35  ;;  %v2594_v35 = vmul.f32 %v11974_v40, %v11974_v40  ;;  %v2705_v48 = vsel %vm509_vm6, %v2592_v19, 0.0 }
 0x3e1   :  { %v2700_v33 = vadd.f32 %v2699_v24, %v2698_v42  ;;  %v2595_v42 = vmul.f32 %v11975_v45, %v11975_v45  ;;  %v2707_v24 = vsel %vm509_vm6, %v2593_v23, 0.0 }
 0x3e3   :  { %v2702_v63 = vadd.f32 %v2701_v22, %v2700_v33  ;;  %v2596_v33 = vmul.f32 %v11976_v11, %v11976_v11  ;;  %v2709_v22 = vsel %vm509_vm6, %v2594_v35, 0.0 }
 0x3e5   :  { %v2704_v28 = vadd.f32 %v2703_v6, %v2702_v63  ;;  %v2597_v63 = vmul.f32 %v11977_v60, %v11977_v60  ;;  %v2711_v6 = vsel %vm509_vm6, %v2595_v42, 0.0  ;;  %v2713_v19 = vsel %vm509_vm6, %v2596_v33, 0.0  ;;  %v11978_v42 = vld [vmem:[#allocation34_spill] sm:$0xff]  ;;  %v11979_v33 = vld [vmem:[#allocation36_spill] sm:$0xff] }
 0x3e7   :  { %v2706_v0 = vadd.f32 %v2705_v48, %v2704_v28  ;;  %v2598_v28 = vmul.f32 %v8759_v18, %v8759_v18  ;;  %v2715_v23 = vsel %vm509_vm6, %v2597_v63, 0.0  ;;  %v11980_v63 = vld [vmem:[#allocation37_spill] sm:$0xff] }
 0x3e9   :  { %v2708_v16 = vadd.f32 %v2707_v24, %v2706_v0  ;;  %v2599_v0 = vmul.f32 %v8763_v51, %v8763_v51  ;;  %v2717_v35 = vsel %vm509_vm6, %v2598_v28, 0.0  ;;  %v11981_v28 = vld [vmem:[#allocation42_spill] sm:$0xff] }
 0x3eb   :  { %v2710_v58 = vadd.f32 %v2709_v22, %v2708_v16  ;;  %v2600_v16 = vmul.f32 %v8767_v52, %v8767_v52 }
 0x3ed   :  { %v2712_v40 = vadd.f32 %v2711_v6, %v2710_v58  ;;  %v2601_v58 = vmul.f32 %v11978_v42, %v11978_v42  ;;  %v2719_v6 = vsel %vm509_vm6, %v2599_v0, 0.0  ;;  %v11982_v0 = vld [vmem:[#allocation43_spill] sm:$0xff] }
 0x3ef   :  { %v2714_v48 = vadd.f32 %v2713_v19, %v2712_v40  ;;  %v2602_v40 = vmul.f32 %v11979_v33, %v11979_v33  ;;  %v2721_v19 = vsel %vm509_vm6, %v2600_v16, 0.0 }
 0x3f1   :  { %v2716_v24 = vadd.f32 %v2715_v23, %v2714_v48  ;;  %v2603_v48 = vmul.f32 %v11980_v63, %v11980_v63  ;;  %v2723_v23 = vsel %vm509_vm6, %v2601_v58, 0.0 }
 0x3f3   :  { %v2718_v22 = vadd.f32 %v2717_v35, %v2716_v24  ;;  %v2604_v24 = vmul.f32 %v11981_v28, %v11981_v28  ;;  %v2725_v35 = vsel %vm509_vm6, %v2602_v40, 0.0 }
 0x3f5   :  { %v2720_v18 = vadd.f32 %v2719_v6, %v2718_v22  ;;  %v2605_v22 = vmul.f32 %v11982_v0, %v11982_v0  ;;  %v2727_v6 = vsel %vm509_vm6, %v2603_v48, 0.0  ;;  %v2740_v48 = vld [vmem:[#allocation8] sm:$0x1] }
 0x3f7   :  { %v2722_v51 = vadd.f32 %v2721_v19, %v2720_v18  ;;  %v2729_v18 = vsel %vm509_vm6, %v2604_v24, 0.0  ;;  %v2731_v19 = vsel %vm509_vm6, %v2605_v22, 0.0 }
 0x3f9   :  { %v2724_v52 = vadd.f32 %v2723_v23, %v2722_v51 }
 0x3fb   :  { %v2726_v42 = vadd.f32 %v2725_v35, %v2724_v52  ;;  %v2745_v35 = vlaneseq }
 0x3fd   :  { %v2728_v33 = vadd.f32 %v2727_v6, %v2726_v42  ;;  %v8981_v0 = vshrl.u32 %v2745_v35, 7 }
 0x3ff   :  { %v2730_v16 = vadd.f32 %v2729_v18, %v2728_v33  ;;  %11983 = vst [vmem:[#allocation37_spill] sm:$0xff] %v8981_v0  ;;  %v11875_v42 = vsub.s32 0, %v8981_v0  ;;  %v11986_v18 = vld [vmem:[#allocation39_spill] sm:$0xff] }
 0x401   :  { %v2732_v60 = vadd.f32 %v2731_v19, %v2730_v16  ;;  %v11987_v19 = vld [vmem:[#allocation40_spill] sm:$0xff] }
 0x403   :  { %v2733_v58 = vrot.slane %v2732_v60, 4 }
 0x405   :  { %v2734_v51 = vadd.f32 %v2733_v58, %v2732_v60  ;;  %v8988_v60 = vld [vmem:[#allocation9] ss:$0 sm:$0xff] }
 0x407   :  { %v2735_v23 = vrot.slane %v2734_v51, 2 }
 0x409   :  { %v2736_v11 = vadd.f32 %v2735_v23, %v2734_v51  ;;  %v11988_v51 = vld [vmem:[#allocation41_spill] sm:$0xff] }
 0x40b   :  { %v2737_v28 = vrot.slane %v2736_v11, 1 }
 0x40d   :  { %v2738_v45 = vadd.f32 %v2737_v28, %v2736_v11  ;;  %v11985_v28 = vld [vmem:[#allocation38_spill] sm:$0xff] }
 0x40f   :  { %v2739_v40 = vmul.f32 0.001953125, %v2738_v45 }
 0x411   :  { %v2741_v52 = vadd.f32 1e-05, %v2739_v40 }
 0x413   :  { %6992 = vrsqrt.f32 %v2741_v52 }
 0x41d   :  { %v6993_v24 = vpop.eup %6992 }
 0x41e   :  { %v2743_v33 = vmul.f32 %v6993_v24, %v2740_v48 }
 0x420   :  { %v8986_v22 = vrot.slane %v2743_v33, %v11875_v42 }
 0x422   :  { %v2811_v11 = vmul.f32 %v8986_v22, %v11980_v63  ;;  %v8997_v6 = vmul.f32 %v8986_v22, %v11985_v28  ;;  %v9001_v16 = vmul.f32 %v8986_v22, %v11986_v18  ;;  %v2752_v58 = vmul.f32 %v8986_v22, %v11987_v19  ;;  %v11999_v28 = vld [vmem:[#allocation25_spill] sm:$0xff]  ;;  %v12000_v18 = vld [vmem:[#allocation27_spill] sm:$0xff]  ;;  %v12001_v19 = vld [vmem:[#allocation24_spill] sm:$0xff] }
 0x423   :  { %v2753_v23 = vmul.f32 %v8986_v22, %v11988_v51  ;;  %v9009_v63 = vmul.f32 %v8986_v22, %v8551_v37  ;;  %v9013_v40 = vmul.f32 %v8986_v22, %v8555_v53  ;;  %v9017_v52 = vmul.f32 %v8986_v22, %v8559_v61 }
 0x424   :  { %v8993_v45 = vadd.f32 %v8988_v60, %v2811_v11  ;;  %v9021_v35 = vmul.f32 %v8986_v22, %v8563_v31  ;;  %v9025_v48 = vmul.f32 %v8986_v22, %v8567_v55  ;;  %v9029_v37 = vmul.f32 %v8986_v22, %v8571_v26  ;;  %v11998_v11 = vld [vmem:[#allocation23_spill] sm:$0xff] }
 0x425   :  { %v9033_v53 = vmul.f32 %v8986_v22, %v8575_v12  ;;  %v9037_v61 = vmul.f32 %v8986_v22, %v8579_v29  ;;  %v9041_v31 = vmul.f32 %v8986_v22, %v8583_v43  ;;  %v9045_v55 = vmul.f32 %v8986_v22, %v8587_v25 }
 0x426   :  { %11984 = vst [vmem:[#allocation44_spill] sm:$0xff] %v8993_v45  ;;  %v9049_v26 = vmul.f32 %v8986_v22, %v8591_v47  ;;  %v9053_v12 = vmul.f32 %v8986_v22, %v8595_v50  ;;  %v9057_v29 = vmul.f32 %v8986_v22, %v8599_v27  ;;  %v9061_v43 = vmul.f32 %v8986_v22, %v8603_v10 }
 0x427   :  { %v9065_v25 = vmul.f32 %v8986_v22, %v8607_v14  ;;  %v9069_v47 = vmul.f32 %v8986_v22, %v8611_v5  ;;  %v9073_v50 = vmul.f32 %v8986_v22, %v8615_v9  ;;  %v9077_v27 = vmul.f32 %v8986_v22, %v8619_v46 }
 0x428   :  { %v9081_v10 = vmul.f32 %v8986_v22, %v8623_v20  ;;  %v9085_v14 = vmul.f32 %v8986_v22, %v8627_v2  ;;  %v9089_v5 = vmul.f32 %v8986_v22, %v8631_v49  ;;  %v9093_v9 = vmul.f32 %v8986_v22, %v8635_v30 }
 0x429   :  { %v9097_v46 = vmul.f32 %v8986_v22, %v8639_v4  ;;  %v9101_v20 = vmul.f32 %v8986_v22, %v8643_v56  ;;  %v9105_v2 = vmul.f32 %v8986_v22, %v8647_v36  ;;  %v9109_v49 = vmul.f32 %v8986_v22, %v8651_v34 }
 0x42a   :  { %v9113_v30 = vmul.f32 %v8986_v22, %v8655_v38  ;;  %v9117_v4 = vmul.f32 %v8986_v22, %v8659_v32  ;;  %v9121_v56 = vmul.f32 %v8986_v22, %v8663_v15  ;;  %v9125_v36 = vmul.f32 %v8986_v22, %v8667_v8 }
 0x42b   :  { %v9129_v34 = vmul.f32 %v8986_v22, %v8671_v62  ;;  %v9133_v38 = vmul.f32 %v8986_v22, %v8675_v57  ;;  %v9137_v32 = vmul.f32 %v8986_v22, %v8679_v21  ;;  %v9141_v15 = vmul.f32 %v8986_v22, %v8683_v17 }
 0x42c   :  { %11989 = vst [vmem:[#allocation38_spill] sm:$0xff] %v9117_v4  ;;  %11990 = vst [vmem:[#allocation39_spill] sm:$0xff] %v9121_v56  ;;  %v9145_v8 = vmul.f32 %v8986_v22, %v8687_v39  ;;  %v9149_v62 = vmul.f32 %v8986_v22, %v8691_v59  ;;  %v2790_v57 = vmul.f32 %v8986_v22, %v8695_v7  ;;  %v12012_v56 = vld [vmem:[#allocation42_spill] sm:$0xff]  ;;  %v12013_v4 = vld [vmem:[#allocation43_spill] sm:$0xff] }
 0x42d   :  { %11991 = vst [vmem:[#allocation40_spill] sm:$0xff] %v9125_v36  ;;  %11992 = vst [vmem:[#allocation41_spill] sm:$0xff] %v9129_v34  ;;  %v2791_v24 = vmul.f32 %v8986_v22, %v8699_v1  ;;  %v2792_v21 = vmul.f32 %v8986_v22, %v8703_v44  ;;  %v2793_v17 = vmul.f32 %v8986_v22, %v8707_v3  ;;  %v12010_v34 = vld [vmem:[#allocation34_spill] sm:$0xff]  ;;  %v12011_v36 = vld [vmem:[#allocation36_spill] sm:$0xff] }
 0x42e   :  { %11993 = vst [vmem:[#allocation45_spill] sm:$0xff] %v9133_v38  ;;  %11994 = vst [vmem:[#allocation46_spill] sm:$0xff] %v9137_v32  ;;  %v2794_v39 = vmul.f32 %v8986_v22, %v8711_v13  ;;  %v2795_v33 = vmul.f32 %v8986_v22, %v8715_v41  ;;  %v2796_v59 = vmul.f32 %v8986_v22, %v8719_v54  ;;  %v12002_v41 = vld [vmem:[#allocation26_spill] sm:$0xff]  ;;  %v12003_v54 = vld [vmem:[#allocation29_spill] sm:$0xff] }
 0x42f   :  { %11995 = vst [vmem:[#allocation47_spill] sm:$0xff] %v9141_v15  ;;  %11996 = vst [vmem:[#allocation48_spill] sm:$0xff] %v9145_v8  ;;  %v2797_v7 = vmul.f32 %v8986_v22, %v11998_v11  ;;  %v2798_v1 = vmul.f32 %v8986_v22, %v11999_v28  ;;  %v2799_v44 = vmul.f32 %v8986_v22, %v12000_v18  ;;  %v12004_v11 = vld [vmem:[#allocation31_spill] sm:$0xff]  ;;  %v12005_v28 = vld [vmem:[#allocation28_spill] sm:$0xff] }
 0x430   :  { %11997 = vst [vmem:[#allocation49_spill] sm:$0xff] %v9149_v62  ;;  %v2800_v3 = vmul.f32 %v8986_v22, %v12001_v19  ;;  %v2823_v13 = vadd.f32 %v8988_v60, %v2752_v58  ;;  %v2824_v51 = vadd.f32 %v8988_v60, %v2753_v23  ;;  %v2801_v42 = vmul.f32 %v8986_v22, %v12002_v41  ;;  %v12006_v18 = vld [vmem:[#allocation30_spill] sm:$0xff]  ;;  %v12007_v19 = vld [vmem:[#allocation33_spill] sm:$0xff]  ;;  %v12008_v32 = vld [vmem:[#allocation35_spill] sm:$0xff] }
 0x431   :  { %v2802_v0 = vmul.f32 %v8986_v22, %v12003_v54  ;;  %v2803_v45 = vmul.f32 %v8986_v22, %v12004_v11  ;;  %v2804_v15 = vmul.f32 %v8986_v22, %v12005_v28  ;;  %v2805_v62 = vmul.f32 %v8986_v22, %v12006_v18  ;;  %v12009_v38 = vld [vmem:[#allocation32_spill] sm:$0xff] }
 0x432   :  { %v2806_v58 = vmul.f32 %v8986_v22, %v12007_v19  ;;  %v2887_v8 = vmax.f32 %v2823_v13, 0.0  ;;  %v2888_v23 = vmax.f32 %v2824_v51, 0.0  ;;  %v2807_v41 = vmul.f32 %v8986_v22, %v12008_v32 }
 0x433   :  { %v2808_v54 = vmul.f32 %v8986_v22, %v12009_v38  ;;  %v2809_v11 = vmul.f32 %v8986_v22, %v12010_v34  ;;  %v2810_v28 = vmul.f32 %v8986_v22, %v12011_v36  ;;  %v2812_v18 = vmul.f32 %v8986_v22, %v12012_v56 }
 0x434   :  { %v2813_v19 = vmul.f32 %v8986_v22, %v12013_v4  ;;  %v9199_v13 = vpack.c.bf16 %v2888_v23, %v2887_v8  ;;  %v2821_v32 = vadd.f32 %v8988_v60, %v8997_v6  ;;  %v2822_v38 = vadd.f32 %v8988_v60, %v9001_v16 }
 0x435   :  { %v9207_v34 = vadd.f32 %v8988_v60, %v9009_v63  ;;  %v2826_v36 = vadd.f32 %v8988_v60, %v9013_v40  ;;  %v2827_v56 = vadd.f32 %v8988_v60, %v9017_v52  ;;  %v2828_v22 = vadd.f32 %v8988_v60, %v9021_v35 }
 0x436   :  { %3339 = vrot.lane.b32.xlu1 %v9199_v13, %s7184_s12  ;;  %v9219_v6 = vadd.f32 %v8988_v60, %v9025_v48  ;;  %v9223_v16 = vadd.f32 %v8988_v60, %v9029_v37  ;;  %v9227_v63 = vadd.f32 %v8988_v60, %v9033_v53  ;;  %v9231_v40 = vadd.f32 %v8988_v60, %v9037_v61 }
 0x437   :  { %v9235_v52 = vadd.f32 %v8988_v60, %v9041_v31  ;;  %v9239_v35 = vadd.f32 %v8988_v60, %v9045_v55  ;;  %v9243_v48 = vadd.f32 %v8988_v60, %v9049_v26  ;;  %v9247_v37 = vadd.f32 %v8988_v60, %v9053_v12 }
 0x438   :  { %v9251_v53 = vadd.f32 %v8988_v60, %v9057_v29  ;;  %v9255_v61 = vadd.f32 %v8988_v60, %v9061_v43  ;;  %v9259_v31 = vadd.f32 %v8988_v60, %v9065_v25  ;;  %v9263_v55 = vadd.f32 %v8988_v60, %v9069_v47 }
 0x439   :  { %v9267_v26 = vadd.f32 %v8988_v60, %v9073_v50  ;;  %v9271_v12 = vadd.f32 %v8988_v60, %v9077_v27  ;;  %v9275_v29 = vadd.f32 %v8988_v60, %v9081_v10  ;;  %v9279_v43 = vadd.f32 %v8988_v60, %v9085_v14 }
 0x43a   :  { %v9283_v25 = vadd.f32 %v8988_v60, %v9089_v5  ;;  %v9287_v47 = vadd.f32 %v8988_v60, %v9093_v9  ;;  %v9291_v50 = vadd.f32 %v8988_v60, %v9097_v46  ;;  %v9295_v27 = vadd.f32 %v8988_v60, %v9101_v20 }
 0x43b   :  { %v9298_v10 = vadd.f32 %v8988_v60, %v2790_v57  ;;  %v9301_v14 = vadd.f32 %v8988_v60, %v2791_v24  ;;  %v9304_v5 = vadd.f32 %v8988_v60, %v2792_v21  ;;  %v9307_v9 = vadd.f32 %v8988_v60, %v2793_v17 }
 0x43c   :  { %v9310_v4 = vadd.f32 %v8988_v60, %v2794_v39  ;;  %v9313_v46 = vadd.f32 %v8988_v60, %v2795_v33  ;;  %v9316_v20 = vadd.f32 %v8988_v60, %v2796_v59  ;;  %v9319_v8 = vadd.f32 %v8988_v60, %v2797_v7 }
 0x43d   :  { %v9322_v57 = vadd.f32 %v8988_v60, %v2798_v1  ;;  %v9325_v24 = vadd.f32 %v8988_v60, %v2799_v44  ;;  %v9328_v21 = vadd.f32 %v8988_v60, %v2800_v3  ;;  %v9331_v17 = vadd.f32 %v8988_v60, %v2801_v42 }
 0x43e   :  { %v9334_v39 = vadd.f32 %v8988_v60, %v2802_v0  ;;  %v9337_v33 = vadd.f32 %v8988_v60, %v2803_v45  ;;  %v9340_v59 = vadd.f32 %v8988_v60, %v2804_v15  ;;  %v9343_v7 = vadd.f32 %v8988_v60, %v2805_v62 }
 0x43f   :  { %v9346_v1 = vadd.f32 %v8988_v60, %v2806_v58  ;;  %v9349_v44 = vadd.f32 %v8988_v60, %v2807_v41  ;;  %v9352_v42 = vadd.f32 %v8988_v60, %v2808_v54  ;;  %v9355_v0 = vadd.f32 %v8988_v60, %v2809_v11 }
 0x440   :  { %12014 = vst [vmem:[#allocation23_spill] sm:$0xff] %v9334_v39  ;;  %12015 = vst [vmem:[#allocation25_spill] sm:$0xff] %v9337_v33  ;;  %v9358_v45 = vadd.f32 %v8988_v60, %v2810_v28  ;;  %v9361_v15 = vadd.f32 %v8988_v60, %v2812_v18  ;;  %v9364_v62 = vadd.f32 %v8988_v60, %v2813_v19  ;;  %v2885_v3 = vmax.f32 %v2821_v32, 0.0 }
 0x441   :  { %12016 = vst [vmem:[#allocation27_spill] sm:$0xff] %v9340_v59  ;;  %12017 = vst [vmem:[#allocation24_spill] sm:$0xff] %v9343_v7  ;;  %v2886_v51 = vmax.f32 %v2822_v38, 0.0  ;;  %v2993_v58 = vshrl.u32 %v9199_v13, 16  ;;  %v2996_v23 = vshll.u32 %v9199_v13, 16  ;;  %v2891_v41 = vmax.f32 %v2827_v56, 0.0 }
 0x442   :  { %12018 = vst [vmem:[#allocation26_spill] sm:$0xff] %v9346_v1  ;;  %12019 = vst [vmem:[#allocation29_spill] sm:$0xff] %v9349_v44  ;;  %v2892_v54 = vmax.f32 %v2828_v22, 0.0  ;;  %v2889_v11 = vmax.f32 %v9207_v34, 0.0  ;;  %v2890_v44 = vmax.f32 %v2826_v36, 0.0  ;;  %v2895_v18 = vmax.f32 %v9227_v63, 0.0 }
 0x443   :  { %12020 = vst [vmem:[#allocation31_spill] sm:$0xff] %v9352_v42  ;;  %12021 = vst [vmem:[#allocation28_spill] sm:$0xff] %v9355_v0  ;;  %v2953_v1 = vpack.c.bf16 %v2886_v51, %v2885_v3  ;;  %v3467_v28 = vrot.slane %v2996_v23, 1  ;;  %v2896_v32 = vmax.f32 %v9231_v40, 0.0  ;;  %v2893_v38 = vmax.f32 %v9219_v6, 0.0 }
 0x444   :  { %12022 = vst [vmem:[#allocation30_spill] sm:$0xff] %v9358_v45  ;;  %12023 = vst [vmem:[#allocation33_spill] sm:$0xff] %v9361_v15  ;;  %v2995_v45 = vrot.slane %v2993_v58, 7  ;;  %v9370_v15 = vld [vmem:[#allocation11 + $0x8] sm:$0x3f]   ;;  %v2956_v19 = vpack.c.bf16 %v2892_v54, %v2891_v41  ;;  %v2894_v42 = vmax.f32 %v9223_v16, 0.0 }
 0x445   :  { %12024 = vst [vmem:[#allocation35_spill] sm:$0xff] %v9364_v62  ;;  %12025 = vst [vmem:[#allocation32_spill] sm:$0xff] %v9370_v15  ;;  %v2955_v62 = vpack.c.bf16 %v2890_v44, %v2889_v11  ;;  %3337 = vrot.lane.b32.xlu0 %v2953_v1, %s7184_s12  ;;  %v3468_v13 = vor.u32 %v3467_v28, %v2993_v58  ;;  %v2986_v22 = vshrl.u32 %v2953_v1, 16  ;;  %v2989_v34 = vshll.u32 %v2953_v1, 16 }
 0x446   :  { %v2998_v56 = vor.u32 %v2996_v23, %v2995_v45  ;;  %6970 = vmatprep.subr.msk.bf16.mxu1 %vm1165_vm3, %v9370_v15  ;;  %v3007_v36 = vshrl.u32 %v2956_v19, 16  ;;  %v3010_v3 = vshll.u32 %v2956_v19, 16  ;;  %v2958_v15 = vpack.c.bf16 %v2896_v32, %v2895_v18 }
 0x447   :  { %v3000_v63 = vshrl.u32 %v2955_v62, 16  ;;  %v3003_v51 = vshll.u32 %v2955_v62, 16  ;;  %v3562_v44 = vsel %vm7354_vm2, %v3468_v13, 0  ;;  %v3465_v6 = vrot.slane %v2989_v34, 1 }
 0x448   :  { %v3242_v40 = vsel %vm7602_vm7, 0, %v2998_v56  ;;  %v2988_v54 = vrot.slane %v2986_v22, 7  ;;  %3627 = vrot.lane.b32.xlu1 %v3562_v44, %s7189_s18  ;;  %v3009_v1 = vrot.slane %v3007_v36, 7  ;;  %v3471_v45 = vrot.slane %v3010_v3, 1 }
 0x449   :  { %3274 = vst.msk [vmem:[#allocation2 + $0x10] sm:$0xff] %vm509_vm6, %v3242_v40  ;;  %v3002_v58 = vrot.slane %v3000_v63, 7  ;;  %v3469_v23 = vrot.slane %v3003_v51, 1  ;;  %v3466_v11 = vor.u32 %v3465_v6, %v2986_v22  ;;  %v9386_v13 = vadd.f32 %v8988_v60, %v9105_v2 }
 0x44a   :  { %v2991_v28 = vor.u32 %v2989_v34, %v2988_v54  ;;  %v3012_v56 = vor.u32 %v3010_v3, %v3009_v1  ;;  %v3472_v33 = vor.u32 %v3471_v45, %v3007_v36  ;;  %v2957_v7 = vpack.c.bf16 %v2894_v42, %v2893_v38 }
 0x44b   :  { %v3005_v39 = vor.u32 %v3003_v51, %v3002_v58  ;;  %v3561_v44 = vsel %vm7354_vm2, %v3466_v11, 0  ;;  %v3021_v59 = vshrl.u32 %v2958_v15, 16  ;;  %v9394_v18 = vadd.f32 %v8988_v60, %v9109_v49  ;;  %v12028_v58 = vld [vmem:[#allocation38_spill] sm:$0xff] }
 0x44c   :  { %v3241_v40 = vsel %vm7602_vm7, 0, %v2991_v28  ;;  %3625 = vrot.lane.b32.xlu0 %v3561_v44, %s7189_s18  ;;  %3343 = vrot.lane.b32.xlu1 %v2956_v19, %s7184_s12  ;;  %v3244_v2 = vsel %vm7602_vm7, 0, %v3012_v56  ;;  %v3470_v32 = vor.u32 %v3469_v23, %v3000_v63  ;;  %v3024_v49 = vshll.u32 %v2958_v15, 16  ;;  %v12029_v44 = vld [vmem:[#allocation39_spill] sm:$0xff] }
 0x44d   :  { %3273 = vst.msk [vmem:[#allocation2 + $0x8] sm:$0xff] %vm509_vm6, %v3241_v40  ;;  %v3243_v16 = vsel %vm7602_vm7, 0, %v3005_v39  ;;  %3276 = vst.msk [vmem:[#allocation2 + $0x20] sm:$0xff] %vm509_vm6, %v3244_v2  ;;  %v3023_v42 = vrot.slane %v3021_v59, 7  ;;  %v3014_v38 = vshrl.u32 %v2957_v7, 16  ;;  %v3017_v22 = vshll.u32 %v2957_v7, 16 }
 0x44e   :  { %3275 = vst.msk [vmem:[#allocation2 + $0x18] sm:$0xff] %vm509_vm6, %v3243_v16  ;;  %v2899_v34 = vmax.f32 %v9243_v48, 0.0  ;;  %v2900_v36 = vmax.f32 %v9247_v37, 0.0  ;;  %v2897_v19 = vmax.f32 %v9235_v52, 0.0  ;;  %v2898_v3 = vmax.f32 %v9239_v35, 0.0 }
 0x44f   :  { %v3564_v39 = vsel %vm7354_vm2, %v3472_v33, 0  ;;  %v3026_v63 = vor.u32 %v3024_v49, %v3023_v42  ;;  %v3475_v51 = vrot.slane %v3024_v49, 1  ;;  %v3016_v6 = vrot.slane %v3014_v38, 7 }
 0x450   :  { %3341 = vrot.lane.b32.xlu0 %v2955_v62, %s7184_s12  ;;  %3631 = vrot.lane.b32.xlu1 %v3564_v39, %s7189_s18  ;;  %v2960_v54 = vpack.c.bf16 %v2900_v36, %v2899_v34  ;;  %v9413_v1 = vpack.c.bf16 %v2898_v3, %v2897_v19  ;;  %v2903_v48 = vmax.f32 %v9259_v31, 0.0  ;;  %v2904_v37 = vmax.f32 %v9263_v55, 0.0  ;;  %v12030_v34 = vld [vmem:[#allocation40_spill] sm:$0xff] }
 0x451   :  { %v9419_v52 = vadd.f32 %v8988_v60, %v9113_v30  ;;  %v3246_v35 = vsel %vm7602_vm7, 0, %v3026_v63  ;;  %v3019_v33 = vor.u32 %v3017_v22, %v3016_v6  ;;  %v3473_v45 = vrot.slane %v3017_v22, 1 }
 0x452   :  { %v9425_v62 = vadd.f32 %v8988_v60, %v12028_v58  ;;  %3278 = vst.msk [vmem:[#allocation2 + $0x30] sm:$0xff] %vm509_vm6, %v3246_v35  ;;  %v3035_v23 = vshrl.u32 %v2960_v54, 16  ;;  %v3038_v11 = vshll.u32 %v2960_v54, 16  ;;  %v3028_v31 = vshrl.u32 %v9413_v1, 16 }
 0x453   :  { %v3563_v55 = vsel %vm7354_vm2, %v3470_v32, 0  ;;  %v3476_v30 = vor.u32 %v3475_v51, %v3021_v59  ;;  %v3245_v28 = vsel %vm7602_vm7, 0, %v3019_v33  ;;  %v9433_v56 = vpack.c.bf16 %v2904_v37, %v2903_v48 }
 0x454   :  { %v9437_v40 = vadd.f32 %v8988_v60, %v12029_v44  ;;  %3629 = vrot.lane.b32.xlu0 %v3563_v55, %s7189_s18  ;;  %3347 = vrot.lane.b32.xlu1 %v2958_v15, %s7184_s12  ;;  %3277 = vst.msk [vmem:[#allocation2 + $0x28] sm:$0xff] %vm509_vm6, %v3245_v28  ;;  %v3037_v2 = vrot.slane %v3035_v23, 7  ;;  %v3030_v16 = vrot.slane %v3028_v31, 7  ;;  %v3031_v32 = vshll.u32 %v9413_v1, 16 }
 0x455   :  { %v3474_v59 = vor.u32 %v3473_v45, %v3014_v38  ;;  %v2901_v42 = vmax.f32 %v9251_v53, 0.0  ;;  %v2902_v49 = vmax.f32 %v9255_v61, 0.0  ;;  %v3049_v22 = vshrl.u32 %v9433_v56, 16  ;;  %v12031_v53 = vld [vmem:[#allocation41_spill] sm:$0xff] }
 0x456   :  { %v9448_v36 = vadd.f32 %v8988_v60, %v12030_v34  ;;  %v3040_v19 = vor.u32 %v3038_v11, %v3037_v2  ;;  %v3479_v3 = vrot.slane %v3038_v11, 1  ;;  %v3033_v15 = vor.u32 %v3031_v32, %v3030_v16  ;;  %v12032_v16 = vld [vmem:[#allocation45_spill] sm:$0xff] }
 0x457   :  { %v3566_v39 = vsel %vm7354_vm2, %v3476_v30, 0  ;;  %v9452_v63 = vpack.c.bf16 %v2902_v49, %v2901_v42  ;;  %v3051_v51 = vrot.slane %v3049_v22, 7  ;;  %v3052_v38 = vshll.u32 %v9433_v56, 16 }
 0x458   :  { %v9457_v61 = vadd.f32 %v8988_v60, %v12031_v53  ;;  %3345 = vrot.lane.b32.xlu0 %v2957_v7, %s7184_s12  ;;  %3635 = vrot.lane.b32.xlu1 %v3566_v39, %s7189_s18  ;;  %v3248_v6 = vsel %vm7602_vm7, 0, %v3040_v19  ;;  %v3247_v48 = vsel %vm7602_vm7, 0, %v3033_v15  ;;  %v2907_v37 = vmax.f32 %v9275_v29, 0.0  ;;  %v12034_v53 = vld [vmem:[#allocation48_spill] sm:$0xff] }
 0x459   :  { %v3565_v35 = vsel %vm7354_vm2, %v3474_v59, 0  ;;  %3280 = vst.msk [vmem:[#allocation2 + $0x40] sm:$0xff] %vm509_vm6, %v3248_v6  ;;  %v3477_v33 = vrot.slane %v3031_v32, 1  ;;  %3279 = vst.msk [vmem:[#allocation2 + $0x38] sm:$0xff] %vm509_vm6, %v3247_v48  ;;  %v3054_v45 = vor.u32 %v3052_v38, %v3051_v51  ;;  %v3042_v7 = vshrl.u32 %v9452_v63, 16  ;;  %v12033_v59 = vld [vmem:[#allocation46_spill] sm:$0xff] }
 0x45a   :  { %v3480_v58 = vor.u32 %v3479_v3, %v3035_v23  ;;  %v2908_v11 = vmax.f32 %v9279_v43, 0.0  ;;  %v2905_v55 = vmax.f32 %v9267_v26, 0.0  ;;  %v2906_v30 = vmax.f32 %v9271_v12, 0.0 }
 0x45b   :  { %v3250_v29 = vsel %vm7602_vm7, 0, %v3054_v45  ;;  %v3044_v28 = vrot.slane %v3042_v7, 7  ;;  %v3045_v44 = vshll.u32 %v9452_v63, 16  ;;  %v2911_v2 = vmax.f32 %v9291_v50, 0.0 }
 0x45c   :  { %3633 = vrot.lane.b32.xlu0 %v3565_v35, %s7189_s18  ;;  %3351 = vrot.lane.b32.xlu1 %v2960_v54, %s7184_s12  ;;  %3282 = vst.msk [vmem:[#allocation2 + $0x50] sm:$0xff] %vm509_vm6, %v3250_v29  ;;  %v9481_v23 = vpack.c.bf16 %v2908_v11, %v2907_v37  ;;  %v9483_v43 = vpack.c.bf16 %v2906_v30, %v2905_v55  ;;  %v2912_v26 = vmax.f32 %v9295_v27, 0.0  ;;  %v2909_v12 = vmax.f32 %v9283_v25, 0.0 }
 0x45d   :  { %v9489_v32 = vadd.f32 %v8988_v60, %v12032_v16  ;;  %v9493_v50 = vadd.f32 %v8988_v60, %v12033_v59  ;;  %v3047_v42 = vor.u32 %v3045_v44, %v3044_v28  ;;  %v2910_v54 = vmax.f32 %v9287_v47, 0.0  ;;  %v12035_v28 = vld [vmem:[#allocation49_spill] sm:$0xff] }
 0x45e   :  { %v3478_v49 = vor.u32 %v3477_v33, %v3028_v31  ;;  %v3483_v34 = vrot.slane %v3052_v38, 1  ;;  %v3063_v19 = vshrl.u32 %v9481_v23, 16  ;;  %v3056_v3 = vshrl.u32 %v9483_v43, 16 }
 0x45f   :  { %v3568_v25 = vsel %vm7354_vm2, %v3480_v58, 0  ;;  %v3249_v27 = vsel %vm7602_vm7, 0, %v3047_v42  ;;  %v9502_v15 = vpack.c.bf16 %v2912_v26, %v2911_v2  ;;  %v9504_v39 = vpack.c.bf16 %v2910_v54, %v2909_v12 }
 0x460   :  { %3349 = vrot.lane.b32.xlu0 %v9413_v1, %s7184_s12  ;;  %3639 = vrot.lane.b32.xlu1 %v3568_v25, %s7189_s18  ;;  %3281 = vst.msk [vmem:[#allocation2 + $0x48] sm:$0xff] %vm509_vm6, %v3249_v27  ;;  %v3065_v47 = vrot.slane %v3063_v19, 7  ;;  %v3066_v31 = vshll.u32 %v9481_v23, 16  ;;  %v3058_v51 = vrot.slane %v3056_v3, 7  ;;  %v3059_v38 = vshll.u32 %v9483_v43, 16 }
 0x461   :  { %v9514_v6 = vadd.f32 %v8988_v60, %v12034_v53  ;;  %v3481_v48 = vrot.slane %v3045_v44, 1  ;;  %v3077_v37 = vshrl.u32 %v9502_v15, 16  ;;  %v3070_v35 = vshrl.u32 %v9504_v39, 16 }
 0x462   :  { %v3567_v1 = vsel %vm7354_vm2, %v3478_v49, 0  ;;  %v3484_v33 = vor.u32 %v3483_v34, %v3049_v22  ;;  %v3068_v45 = vor.u32 %v3066_v31, %v3065_v47  ;;  %v3061_v58 = vor.u32 %v3059_v38, %v3058_v51 }
 0x463   :  { %v3079_v11 = vrot.slane %v3077_v37, 7  ;;  %v3080_v55 = vshll.u32 %v9502_v15, 16  ;;  %v3072_v30 = vrot.slane %v3070_v35, 7  ;;  %v3073_v29 = vshll.u32 %v9504_v39, 16 }
 0x464   :  { %v2860_v44 = vadd.f32 %v8988_v60, %v12035_v28  ;;  %3637 = vrot.lane.b32.xlu0 %v3567_v1, %s7189_s18  ;;  %3355 = vrot.lane.b32.xlu1 %v9433_v56, %s7184_s12  ;;  %v3252_v22 = vsel %vm7602_vm7, 0, %v3068_v45  ;;  %v3251_v2 = vsel %vm7602_vm7, 0, %v3061_v58  ;;  %v2915_v26 = vmax.f32 %v9419_v52, 0.0 }
 0x465   :  { %v3482_v12 = vor.u32 %v3481_v48, %v3042_v7  ;;  %v3487_v16 = vrot.slane %v3066_v31, 1  ;;  %3284 = vst.msk [vmem:[#allocation2 + $0x60] sm:$0xff] %vm509_vm6, %v3252_v22  ;;  %3283 = vst.msk [vmem:[#allocation2 + $0x58] sm:$0xff] %vm509_vm6, %v3251_v2  ;;  %v3082_v59 = vor.u32 %v3080_v55, %v3079_v11  ;;  %v3075_v42 = vor.u32 %v3073_v29, %v3072_v30  ;;  %v12036_v31 = vld [vmem:[#allocation47_spill] sm:$0xff] }
 0x466   :  { %v3570_v54 = vsel %vm7354_vm2, %v3484_v33, 0  ;;  %v2916_v56 = vmax.f32 %v9425_v62, 0.0  ;;  %v2913_v49 = vmax.f32 %v9386_v13, 0.0  ;;  %v2914_v34 = vmax.f32 %v9394_v18, 0.0 }
 0x467   :  { %v3485_v25 = vrot.slane %v3059_v38, 1  ;;  %v3254_v52 = vsel %vm7602_vm7, 0, %v3082_v59  ;;  %v3253_v7 = vsel %vm7602_vm7, 0, %v3075_v42  ;;  %v2919_v27 = vmax.f32 %v9457_v61, 0.0 }
 0x468   :  { %3353 = vrot.lane.b32.xlu0 %v9452_v63, %s7184_s12  ;;  %3643 = vrot.lane.b32.xlu1 %v3570_v54, %s7189_s18  ;;  %3286 = vst.msk [vmem:[#allocation2 + $0x70] sm:$0xff] %vm509_vm6, %v3254_v52  ;;  %3285 = vst.msk [vmem:[#allocation2 + $0x68] sm:$0xff] %vm509_vm6, %v3253_v7  ;;  %v9553_v13 = vpack.c.bf16 %v2916_v56, %v2915_v26  ;;  %v9555_v18 = vpack.c.bf16 %v2914_v34, %v2913_v49  ;;  %v2920_v62 = vmax.f32 %v9489_v32, 0.0 }
 0x469   :  { %v2917_v47 = vmax.f32 %v9437_v40, 0.0  ;;  %v2858_v61 = vadd.f32 %v8988_v60, %v12036_v31  ;;  %v3569_v63 = vsel %vm7354_vm2, %v3482_v12, 0  ;;  %v3488_v51 = vor.u32 %v3487_v16, %v3063_v19 }
 0x46a   :  { %v2918_v38 = vmax.f32 %v9448_v36, 0.0  ;;  %v3091_v53 = vshrl.u32 %v9553_v13, 16  ;;  %v3084_v48 = vshrl.u32 %v9555_v18, 16  ;;  %v2923_v1 = vmax.f32 %v9514_v6, 0.0 }
 0x46b   :  { %v2924_v33 = vmax.f32 %v2860_v44, 0.0  ;;  %v3486_v45 = vor.u32 %v3485_v25, %v3056_v3  ;;  %v3491_v32 = vrot.slane %v3080_v55, 1  ;;  %v9567_v58 = vpack.c.bf16 %v2920_v62, %v2919_v27 }
 0x46c   :  { %v9569_v40 = vpack.c.bf16 %v2918_v38, %v2917_v47  ;;  %3641 = vrot.lane.b32.xlu0 %v3569_v63, %s7189_s18  ;;  %3359 = vrot.lane.b32.xlu1 %v9481_v23, %s7184_s12  ;;  %v3093_v60 = vrot.slane %v3091_v53, 7  ;;  %v3094_v36 = vshll.u32 %v9553_v13, 16  ;;  %v3086_v19 = vrot.slane %v3084_v48, 7 }
 0x46d   :  { %v3087_v3 = vshll.u32 %v9555_v18, 16  ;;  %v3572_v6 = vsel %vm7354_vm2, %v3488_v51, 0  ;;  %v3105_v11 = vshrl.u32 %v9567_v58, 16  ;;  %v2921_v30 = vmax.f32 %v9493_v50, 0.0 }
 0x46e   :  { %v3098_v55 = vshrl.u32 %v9569_v40, 16  ;;  %v3096_v23 = vor.u32 %v3094_v36, %v3093_v60  ;;  %v9585_v44 = vpack.c.bf16 %v2924_v33, %v2923_v1  ;;  %v2922_v22 = vmax.f32 %v2858_v61, 0.0 }
 0x46f   :  { %v3089_v28 = vor.u32 %v3087_v3, %v3086_v19  ;;  %v3107_v2 = vrot.slane %v3105_v11, 7  ;;  %v3108_v26 = vshll.u32 %v9567_v58, 16  ;;  %v3101_v16 = vshll.u32 %v9569_v40, 16 }
 0x470   :  { %v3100_v12 = vrot.slane %v3098_v55, 7  ;;  %3357 = vrot.lane.b32.xlu0 %v9483_v43, %s7184_s12  ;;  %3647 = vrot.lane.b32.xlu1 %v3572_v6, %s7189_s18  ;;  %v3489_v50 = vrot.slane %v3073_v29, 1  ;;  %v3256_v59 = vsel %vm7602_vm7, 0, %v3096_v23  ;;  %v3571_v43 = vsel %vm7354_vm2, %v3486_v45, 0 }
 0x471   :  { %v3255_v42 = vsel %vm7602_vm7, 0, %v3089_v28  ;;  %3288 = vst.msk [vmem:[#allocation2 + $0x80] sm:$0xff] %vm509_vm6, %v3256_v59  ;;  %v3110_v54 = vor.u32 %v3108_v26, %v3107_v2  ;;  %v9608_v29 = vpack.c.bf16 %v2922_v22, %v2921_v30  ;;  %v3119_v49 = vshrl.u32 %v9585_v44, 16 }
 0x472   :  { %3287 = vst.msk [vmem:[#allocation2 + $0x78] sm:$0xff] %vm509_vm6, %v3255_v42  ;;  %v3103_v56 = vor.u32 %v3101_v16, %v3100_v12  ;;  %v3492_v34 = vor.u32 %v3491_v32, %v3077_v37  ;;  %v2927_v7 = vmax.f32 %v9304_v5, 0.0  ;;  %v3490_v27 = vor.u32 %v3489_v50, %v3070_v35 }
 0x473   :  { %v3258_v25 = vsel %vm7602_vm7, 0, %v3110_v54  ;;  %v3121_v37 = vrot.slane %v3119_v49, 7  ;;  %v3122_v62 = vshll.u32 %v9585_v44, 16  ;;  %v3112_v47 = vshrl.u32 %v9608_v29, 16 }
 0x474   :  { %v3257_v52 = vsel %vm7602_vm7, 0, %v3103_v56  ;;  %3645 = vrot.lane.b32.xlu0 %v3571_v43, %s7189_s18  ;;  %3363 = vrot.lane.b32.xlu1 %v9502_v15, %s7184_s12  ;;  %3290 = vst.msk [vmem:[#allocation2 + $0xa0] sm:$0xff] %vm509_vm6, %v3258_v25  ;;  %v3495_v5 = vrot.slane %v3094_v36, 1  ;;  %v2928_v31 = vmax.f32 %v9307_v9, 0.0  ;;  %v2925_v61 = vmax.f32 %v9298_v10, 0.0 }
 0x475   :  { %3289 = vst.msk [vmem:[#allocation2 + $0x98] sm:$0xff] %vm509_vm6, %v3257_v52  ;;  %v2926_v15 = vmax.f32 %v9301_v14, 0.0  ;;  %v3124_v35 = vor.u32 %v3122_v62, %v3121_v37  ;;  %v3114_v63 = vrot.slane %v3112_v47, 7  ;;  %v3115_v51 = vshll.u32 %v9608_v29, 16 }
 0x476   :  { %v2931_v38 = vmax.f32 %v9316_v20, 0.0  ;;  %v3574_v1 = vsel %vm7354_vm2, %v3492_v34, 0  ;;  %v9640_v33 = vpack.c.bf16 %v2928_v31, %v2927_v7  ;;  %v2932_v10 = vmax.f32 %v9319_v8, 0.0  ;;  %v12037_v31 = vld [vmem:[#allocation27_spill] sm:$0xff] }
 0x477   :  { %v9642_v9 = vpack.c.bf16 %v2926_v15, %v2925_v61  ;;  %v3260_v14 = vsel %vm7602_vm7, 0, %v3124_v35  ;;  %v3117_v20 = vor.u32 %v3115_v51, %v3114_v63  ;;  %v2929_v45 = vmax.f32 %v9310_v4, 0.0 }
 0x478   :  { %3361 = vrot.lane.b32.xlu0 %v9504_v39, %s7184_s12  ;;  %3651 = vrot.lane.b32.xlu1 %v3574_v1, %s7189_s18  ;;  %v3573_v32 = vsel %vm7354_vm2, %v3490_v27, 0  ;;  %v3493_v60 = vrot.slane %v3087_v3, 1  ;;  %3292 = vst.msk [vmem:[#allocation2 + $0xb0] sm:$0xff] %vm509_vm6, %v3260_v14  ;;  %v3133_v8 = vshrl.u32 %v9640_v33, 16  ;;  %v3496_v36 = vor.u32 %v3495_v5, %v3091_v53 }
 0x479   :  { %v3126_v39 = vshrl.u32 %v9642_v9, 16  ;;  %v3259_v19 = vsel %vm7602_vm7, 0, %v3117_v20  ;;  %v9662_v6 = vpack.c.bf16 %v2932_v10, %v2931_v38  ;;  %v2930_v4 = vmax.f32 %v9313_v46, 0.0  ;;  %v12040_v38 = vld [vmem:[#allocation25_spill] sm:$0xff] }
 0x47a   :  { %3291 = vst.msk [vmem:[#allocation2 + $0xa8] sm:$0xff] %vm509_vm6, %v3259_v19  ;;  %v3135_v3 = vrot.slane %v3133_v8, 7  ;;  %v3136_v30 = vshll.u32 %v9640_v33, 16  ;;  %v3129_v28 = vshll.u32 %v9642_v9, 16  ;;  %v3494_v22 = vor.u32 %v3493_v60, %v3084_v48 }
 0x47b   :  { %v3128_v23 = vrot.slane %v3126_v39, 7  ;;  %v9675_v53 = vpack.c.bf16 %v2930_v4, %v2929_v45  ;;  %v3147_v46 = vshrl.u32 %v9662_v6, 16  ;;  %v3499_v50 = vrot.slane %v3108_v26, 1 }
 0x47c   :  { %3649 = vrot.lane.b32.xlu0 %v3573_v32, %s7189_s18  ;;  %3367 = vrot.lane.b32.xlu1 %v9553_v13, %s7184_s12  ;;  %v3138_v2 = vor.u32 %v3136_v30, %v3135_v3  ;;  %v3150_v13 = vshll.u32 %v9662_v6, 16  ;;  %v3576_v54 = vsel %vm7354_vm2, %v3496_v36, 0  ;;  %v2935_v43 = vmax.f32 %v9328_v21, 0.0 }
 0x47d   :  { %v3131_v12 = vor.u32 %v3129_v28, %v3128_v23  ;;  %v3149_v59 = vrot.slane %v3147_v46, 7  ;;  %v3140_v42 = vshrl.u32 %v9675_v53, 16  ;;  %v3497_v26 = vrot.slane %v3101_v16, 1 }
 0x47e   :  { %v3262_v48 = vsel %vm7602_vm7, 0, %v3138_v2  ;;  %v3143_v21 = vshll.u32 %v9675_v53, 16  ;;  %v2936_v52 = vmax.f32 %v9331_v17, 0.0  ;;  %v2933_v7 = vmax.f32 %v9322_v57, 0.0  ;;  %v12038_v57 = vld [vmem:[#allocation24_spill] sm:$0xff] }
 0x47f   :  { %v3261_v56 = vsel %vm7602_vm7, 0, %v3131_v12  ;;  %3294 = vst.msk [vmem:[#allocation2 + $0xc0] sm:$0xff] %vm509_vm6, %v3262_v48  ;;  %v3152_v34 = vor.u32 %v3150_v13, %v3149_v59  ;;  %v3142_v25 = vrot.slane %v3140_v42, 7  ;;  %v2934_v16 = vmax.f32 %v9325_v24, 0.0  ;;  %v12039_v24 = vld [vmem:[#allocation23_spill] sm:$0xff]  ;;  %v12042_v59 = vld [vmem:[#allocation28_spill] sm:$0xff] }
 0x480   :  { %3365 = vrot.lane.b32.xlu0 %v9555_v18, %s7184_s12  ;;  %3655 = vrot.lane.b32.xlu1 %v3576_v54, %s7189_s18  ;;  %3293 = vst.msk [vmem:[#allocation2 + $0xb8] sm:$0xff] %vm509_vm6, %v3261_v56  ;;  %v3575_v18 = vsel %vm7354_vm2, %v3494_v22, 0  ;;  %v3500_v27 = vor.u32 %v3499_v50, %v3105_v11  ;;  %v2939_v61 = vmax.f32 %v12037_v31, 0.0  ;;  %v9722_v15 = vpack.c.bf16 %v2936_v52, %v2935_v43  ;;  %v12041_v22 = vld [vmem:[#allocation31_spill] sm:$0xff]  ;;  %v12045_v31 = vld [vmem:[#allocation33_spill] sm:$0xff] }
 0x481   :  { %v3264_v37 = vsel %vm7602_vm7, 0, %v3152_v34  ;;  %v3145_v5 = vor.u32 %v3143_v21, %v3142_v25  ;;  %v9724_v17 = vpack.c.bf16 %v2934_v16, %v2933_v7  ;;  %v2940_v35 = vmax.f32 %v12038_v57, 0.0  ;;  %v12044_v16 = vld [vmem:[#allocation29_spill] sm:$0xff] }
 0x482   :  { %3296 = vst.msk [vmem:[#allocation2 + $0xd0] sm:$0xff] %vm509_vm6, %v3264_v37  ;;  %v2937_v63 = vmax.f32 %v12039_v24, 0.0  ;;  %v2938_v1 = vmax.f32 %v12040_v38, 0.0  ;;  %v3498_v10 = vor.u32 %v3497_v26, %v3098_v55  ;;  %v3161_v14 = vshrl.u32 %v9722_v15, 16 }
 0x483   :  { %v3263_v11 = vsel %vm7602_vm7, 0, %v3145_v5  ;;  %v3154_v20 = vshrl.u32 %v9724_v17, 16  ;;  %v3578_v45 = vsel %vm7354_vm2, %v3500_v27, 0  ;;  %v9743_v32 = vpack.c.bf16 %v2940_v35, %v2939_v61  ;;  %v12047_v35 = vld [vmem:[#allocation44_spill] sm:$0xff] }
 0x484   :  { %3653 = vrot.lane.b32.xlu0 %v3575_v18, %s7189_s18  ;;  %3371 = vrot.lane.b32.xlu1 %v9567_v58, %s7184_s12  ;;  %3295 = vst.msk [vmem:[#allocation2 + $0xc8] sm:$0xff] %vm509_vm6, %v3263_v11  ;;  %v3503_v58 = vrot.slane %v3122_v62, 1  ;;  %v9745_v60 = vpack.c.bf16 %v2938_v1, %v2937_v63  ;;  %v3163_v36 = vrot.slane %v3161_v14, 7  ;;  %v3164_v55 = vshll.u32 %v9722_v15, 16  ;;  %v9804_v1 = vld [vmem:[#allocation11] sm:$0x3f]  }
 0x485   :  { %v3156_v19 = vrot.slane %v3154_v20, 7  ;;  %v3157_v4 = vshll.u32 %v9724_v17, 16  ;;  %v3501_v62 = vrot.slane %v3115_v51, 1  ;;  %v3175_v3 = vshrl.u32 %v9743_v32, 16 }
 0x486   :  { %v3168_v23 = vshrl.u32 %v9745_v60, 16  ;;  %v2943_v2 = vmax.f32 %v12041_v22, 0.0  ;;  %v3166_v12 = vor.u32 %v3164_v55, %v3163_v36  ;;  %v2944_v54 = vmax.f32 %v12042_v59, 0.0  ;;  %v12049_v22 = vld [vmem:[#allocation32_spill] sm:$0xff] }
 0x487   :  { %v3159_v50 = vor.u32 %v3157_v4, %v3156_v19  ;;  %v3177_v56 = vrot.slane %v3175_v3, 7  ;;  %v3178_v51 = vshll.u32 %v9743_v32, 16  ;;  %v3171_v26 = vshll.u32 %v9745_v60, 16  ;;  %v12048_v19 = vld [vmem:[#allocation30_spill] sm:$0xff] }
 0x488   :  { %3369 = vrot.lane.b32.xlu0 %v9569_v40, %s7184_s12  ;;  %3659 = vrot.lane.b32.xlu1 %v3578_v45, %s7189_s18  ;;  %v12043_v40 = vld [vmem:[#allocation26_spill] sm:$0xff]  ;;  %v3170_v43 = vrot.slane %v3168_v23, 7  ;;  %v3577_v34 = vsel %vm7354_vm2, %v3498_v10, 0  ;;  %v3504_v25 = vor.u32 %v3503_v58, %v3119_v49  ;;  %v3266_v18 = vsel %vm7602_vm7, 0, %v3166_v12 }
 0x489   :  { %v2941_v48 = vmax.f32 %v12043_v40, 0.0  ;;  %v3265_v52 = vsel %vm7602_vm7, 0, %v3159_v50  ;;  %3298 = vst.msk [vmem:[#allocation2 + $0xe0] sm:$0xff] %vm509_vm6, %v3266_v18  ;;  %v3180_v7 = vor.u32 %v3178_v51, %v3177_v56  ;;  %v2942_v27 = vmax.f32 %v12044_v16, 0.0 }
 0x48a   :  { %3297 = vst.msk [vmem:[#allocation2 + $0xd8] sm:$0xff] %vm509_vm6, %v3265_v52  ;;  %v3173_v49 = vor.u32 %v3171_v26, %v3170_v43  ;;  %v3502_v37 = vor.u32 %v3501_v62, %v3112_v47  ;;  %v9793_v5 = vpack.c.bf16 %v2944_v54, %v2943_v2  ;;  %v2947_v61 = vmax.f32 %v12045_v31, 0.0 }
 0x48b   :  { %v2946_v24 = vmax.f32 %v12047_v35, 0.0  ;;  %v3268_v63 = vsel %vm7602_vm7, 0, %v3180_v7  ;;  %v9802_v38 = vpack.c.bf16 %v2942_v27, %v2941_v48  ;;  %v3580_v47 = vsel %vm7354_vm2, %v3504_v25, 0 }
 0x48c   :  { %3657 = vrot.lane.b32.xlu0 %v3577_v34, %s7189_s18  ;;  %3375 = vrot.lane.b32.xlu1 %v9585_v44, %s7184_s12  ;;  %v12046_v44 = vld [vmem:[#allocation35_spill] sm:$0xff]  ;;  %v3267_v11 = vsel %vm7602_vm7, 0, %v3173_v49  ;;  %v3507_v10 = vrot.slane %v3136_v30, 1  ;;  %3300 = vst.msk [vmem:[#allocation2 + $0xf0] sm:$0xff] %vm509_vm6, %v3268_v63  ;;  %v3189_v45 = vshrl.u32 %v9793_v5, 16  ;;  %v2945_v62 = vmax.f32 %v12048_v19, 0.0 }
 0x48d   :  { %v2948_v57 = vmax.f32 %v12046_v44, 0.0  ;;  %3299 = vst.msk [vmem:[#allocation2 + $0xe8] sm:$0xff] %vm509_vm6, %v3267_v11  ;;  %v3182_v36 = vshrl.u32 %v9802_v38, 16  ;;  %v3924_v30 = vsel %vm1165_vm3, %v12049_v22, 0  ;;  %v3579_v2 = vsel %vm7354_vm2, %v3502_v37, 0 }
 0x48e   :  { %v3191_v12 = vrot.slane %v3189_v45, 7  ;;  %v3192_v50 = vshll.u32 %v9793_v5, 16  ;;  %6514 = vmatpush3.bf16.msra.mxu1 %v3924_v30  ;;  %v3505_v59 = vrot.slane %v3129_v28, 1  ;;  %v3185_v40 = vshll.u32 %v9802_v38, 16 }
 0x48f   :  { %v9813_v58 = vpack.c.bf16 %v2948_v57, %v2947_v61  ;;  %v3184_v54 = vrot.slane %v3182_v36, 7  ;;  %v9833_v48 = vpack.c.bf16 %v2946_v24, %v2945_v62  ;;  %6971 = vmatprep.subr.msk.bf16.mxu1 %vm1165_vm3, %v9804_v1  ;;  %v3508_v56 = vor.u32 %v3507_v10, %v3133_v8 }
 0x490   :  { %3373 = vrot.lane.b32.xlu0 %v9608_v29, %s7184_s12  ;;  %3663 = vrot.lane.b32.xlu1 %v3580_v47, %s7189_s18  ;;  %v3194_v43 = vor.u32 %v3192_v50, %v3191_v12  ;;  %v3506_v27 = vor.u32 %v3505_v59, %v3126_v39  ;;  %v3511_v37 = vrot.slane %v3150_v13, 1  ;;  %v3509_v57 = vrot.slane %v3143_v21, 1 }
 0x491   :  { %v3203_v29 = vshrl.u32 %v9813_v58, 16  ;;  %v3206_v25 = vshll.u32 %v9813_v58, 16  ;;  %v3187_v28 = vor.u32 %v3185_v40, %v3184_v54  ;;  %v3196_v18 = vshrl.u32 %v9833_v48, 16  ;;  %v9966_v54 = vld [vmem:[#allocation11 + $0x10] sm:$0x3f]  }
 0x492   :  { %v3270_v52 = vsel %vm7602_vm7, 0, %v3194_v43  ;;  %v3199_v16 = vshll.u32 %v9833_v48, 16  ;;  %v3581_v39 = vsel %vm7354_vm2, %v3506_v27, 0  ;;  %v3512_v13 = vor.u32 %v3511_v37, %v3147_v46 }
 0x493   :  { %v3205_v34 = vrot.slane %v3203_v29, 7  ;;  %3302 = vst.msk [vmem:[#allocation2 + $0x100] sm:$0xff] %vm509_vm6, %v3270_v52  ;;  %v3269_v8 = vsel %vm7602_vm7, 0, %v3187_v28  ;;  %v3198_v49 = vrot.slane %v3196_v18, 7  ;;  %v3515_v35 = vrot.slane %v3164_v55, 1 }
 0x494   :  { %3661 = vrot.lane.b32.xlu0 %v3579_v2, %s7189_s18  ;;  %3379 = vrot.lane.b32.xlu1 %v9640_v33, %s7184_s12  ;;  %v3582_v33 = vsel %vm7354_vm2, %v3508_v56, 0  ;;  %3301 = vst.msk [vmem:[#allocation2 + $0xf8] sm:$0xff] %vm509_vm6, %v3269_v8  ;;  %v3584_v41 = vsel %vm7354_vm2, %v3512_v13, 0  ;;  %v3513_v21 = vrot.slane %v3157_v4, 1  ;;  %v3519_v55 = vrot.slane %v3178_v51, 1 }
 0x495   :  { %v3208_v7 = vor.u32 %v3206_v25, %v3205_v34  ;;  %v3201_v61 = vor.u32 %v3199_v16, %v3198_v49  ;;  %v3523_v24 = vrot.slane %v3192_v50, 1  ;;  %v3521_v63 = vrot.slane %v3185_v40, 1 }
 0x496   :  { %v3520_v4 = vor.u32 %v3519_v55, %v3175_v3  ;;  %v3527_v11 = vrot.slane %v3206_v25, 1 }
 0x497   :  { %v3272_v31 = vsel %vm7602_vm7, 0, %v3208_v7  ;;  %v3271_v44 = vsel %vm7602_vm7, 0, %v3201_v61 }
 0x498   :  { %3377 = vrot.lane.b32.xlu0 %v9642_v9, %s7184_s12  ;;  %3667 = vrot.lane.b32.xlu1 %v3582_v33, %s7189_s18  ;;  %3304 = vst.msk [vmem:[#allocation2 + $0x110] sm:$0xff] %vm509_vm6, %v3272_v31  ;;  %3303 = vst.msk [vmem:[#allocation2 + $0x108] sm:$0xff] %vm509_vm6, %v3271_v44  ;;  %v3510_v9 = vor.u32 %v3509_v57, %v3140_v42 }
 0x49a   :  { %v3583_v46 = vsel %vm7354_vm2, %v3510_v9, 0 }
 0x49c   :  { %3665 = vrot.lane.b32.xlu0 %v3581_v39, %s7189_s18  ;;  %3383 = vrot.lane.b32.xlu1 %v9662_v6, %s7184_s12  ;;  %v3516_v6 = vor.u32 %v3515_v35, %v3161_v14 }
 0x49e   :  { %v3586_v42 = vsel %vm7354_vm2, %v3516_v6, 0 }
 0x4a0   :  { %3381 = vrot.lane.b32.xlu0 %v9675_v53, %s7184_s12  ;;  %3671 = vrot.lane.b32.xlu1 %v3584_v41, %s7189_s18  ;;  %v3514_v53 = vor.u32 %v3513_v21, %v3154_v20  ;;  %v3517_v20 = vrot.slane %v3171_v26, 1  ;;  %v3524_v26 = vor.u32 %v3523_v24, %v3189_v45  ;;  %v3525_v45 = vrot.slane %v3199_v16, 1 }
 0x4a2   :  { %v3518_v51 = vor.u32 %v3517_v20, %v3168_v23  ;;  %v3590_v23 = vsel %vm7354_vm2, %v3524_v26, 0  ;;  %v3526_v62 = vor.u32 %v3525_v45, %v3196_v18 }
 0x4a4   :  { %3669 = vrot.lane.b32.xlu0 %v3583_v46, %s7189_s18  ;;  %3387 = vrot.lane.b32.xlu1 %v9722_v15, %s7184_s12  ;;  %v3585_v15 = vsel %vm7354_vm2, %v3514_v53, 0  ;;  %v3587_v3 = vsel %vm7354_vm2, %v3518_v51, 0 }
 0x4a8   :  { %3385 = vrot.lane.b32.xlu0 %v9724_v17, %s7184_s12  ;;  %3675 = vrot.lane.b32.xlu1 %v3586_v42, %s7189_s18  ;;  %v3340_v14 = vpop.permute.xlu1 %3339  ;;  %v3588_v17 = vsel %vm7354_vm2, %v3520_v4, 0 }
 0x4a9   :  { %3434 = vst.msk [vmem:[#allocation2 + $0x10] sm:$0xff] %vm670_vm8, %v3340_v14 }
 0x4ac   :  { %3673 = vrot.lane.b32.xlu0 %v3585_v15, %s7189_s18  ;;  %3391 = vrot.lane.b32.xlu1 %v9743_v32, %s7184_s12 }
 0x4b0   :  { %3389 = vrot.lane.b32.xlu0 %v9745_v60, %s7184_s12  ;;  %3679 = vrot.lane.b32.xlu1 %v3588_v17, %s7189_s18  ;;  %v3522_v60 = vor.u32 %v3521_v63, %v3182_v36 }
 0x4b2   :  { %v3589_v10 = vsel %vm7354_vm2, %v3522_v60, 0 }
 0x4b4   :  { %3677 = vrot.lane.b32.xlu0 %v3587_v3, %s7189_s18  ;;  %3395 = vrot.lane.b32.xlu1 %v9793_v5, %s7184_s12  ;;  %v3528_v5 = vor.u32 %v3527_v11, %v3203_v29  ;;  %v4317_v29 = vsel %vm1165_vm3, %v9804_v1, 0 }
 0x4b7   :  { %v3338_v32 = vpop.permute.xlu0 %3337 }
 0x4b8   :  { %3433 = vst.msk [vmem:[#allocation2 + $0x8] sm:$0xff] %vm670_vm8, %v3338_v32  ;;  %3393 = vrot.lane.b32.xlu0 %v9802_v38, %s7184_s12  ;;  %3683 = vrot.lane.b32.xlu1 %v3590_v23, %s7189_s18  ;;  %v3592_v38 = vsel %vm7354_vm2, %v3528_v5, 0 }
 0x4ba   :  { %v3628_v47 = vpop.permute.xlu1 %3627 }
 0x4bb   :  { %3722 = vst.msk [vmem:[#allocation2 + $0x10] sm:$0xff] %vm962_vm9, %v3628_v47 }
 0x4bc   :  { %3681 = vrot.lane.b32.xlu0 %v3589_v10, %s7189_s18  ;;  %3399 = vrot.lane.b32.xlu1 %v9813_v58, %s7184_s12  ;;  %v3591_v58 = vsel %vm7354_vm2, %v3526_v62, 0 }
 0x4be   :  { %v3626_v36 = vpop.permute.xlu0 %3625  ;;  %v3344_v19 = vpop.permute.xlu1 %3343 }
 0x4bf   :  { %3721 = vst.msk [vmem:[#allocation2 + $0x8] sm:$0xff] %vm962_vm9, %v3626_v36 }
 0x4c0   :  { %3436 = vst.msk [vmem:[#allocation2 + $0x20] sm:$0xff] %vm670_vm8, %v3344_v19  ;;  %3397 = vrot.lane.b32.xlu0 %v9833_v48, %s7184_s12  ;;  %3687 = vrot.lane.b32.xlu1 %v3592_v38, %s7189_s18  ;;  %s5902_s12 = sshll.u32 %s7194_s6, 4  ;;  %s5903_s12 = int_to_ptr.vmem [resolvable:$true] %s5902_s12 }
 0x4c1   :  { %s7150_s20 = scalar_lea.vmem %s5903_s12, 8192  ;;  %p7155_p1 = scmp.lt.s32.totalorder %s5903_s12, %s5903_s12 }
 0x4c2   :  { %v3342_v22 = vpop.permute.xlu0 %3341  ;;  %v3632_v30 = vpop.permute.xlu1 %3631  ;;  %v9960_v2 = vld [vmem:[#allocation2 + $0x10] sm:$0xff]  ;;  %p7151_p0 = scmp.ne.s32.totalorder %s5903_s12, %s7150_s20  ;;  %p7156_p2 = scmp.lt.s32.totalorder %s7150_s20, %s7150_s20 }
 0x4c3   :  { %3435 = vst.msk [vmem:[#allocation2 + $0x18] sm:$0xff] %vm670_vm8, %v3342_v22 }
 0x4c4   :  { %3724 = vst.msk [vmem:[#allocation2 + $0x20] sm:$0xff] %vm962_vm9, %v3632_v30  ;;  %3685 = vrot.lane.b32.xlu0 %v3591_v58, %s7189_s18  ;;  %p7157_p3 = por %p7156_p2, %p7155_p1 }
 0x4c6   :  { %v3630_v12 = vpop.permute.xlu0 %3629  ;;  %v9962_v50 = vld [vmem:[#allocation2 + $0x8] sm:$0xff]  ;;  %v3348_v59 = vpop.permute.xlu1 %3347  ;;  %p7158_p4 = pnand %p7157_p3, %p7151_p0 }
 0x4c7   :  { %3723 = vst.msk [vmem:[#allocation2 + $0x18] sm:$0xff] %vm962_vm9, %v3630_v12  ;;  %6515 = vmatprep.mubr.msk.bf16.mxu1 %vm115_vm10, %v9962_v50 }
 0x4c8   :  { %3438 = vst.msk [vmem:[#allocation2 + $0x30] sm:$0xff] %vm670_vm8, %v3348_v59  ;;  %6516 = vmatmul.mubr.msk.bf16.vlgmr.msra.gmra.mrb[0].mxu1 %vm115_vm10, %v9960_v2 }
 0x4c9   :  { %6580 = vmatpush3.bf16.msra.mxu1 %v4317_v29 }
 0x4ca   :  { %v3346_v0 = vpop.permute.xlu0 %3345  ;;  %v3636_v40 = vpop.permute.xlu1 %3635  ;;  %6972 = vmatprep.subr.msk.bf16.mxu1 %vm1165_vm3, %v9966_v54 }
 0x4cb   :  { %3437 = vst.msk [vmem:[#allocation2 + $0x28] sm:$0xff] %vm670_vm8, %v3346_v0  ;;  %v9978_v1 = vld [vmem:[#allocation2 + $0x20] sm:$0xff] }
 0x4cc   :  { %3726 = vst.msk [vmem:[#allocation2 + $0x30] sm:$0xff] %vm962_vm9, %v3636_v40 }
 0x4ce   :  { %v3634_v48 = vpop.permute.xlu0 %3633  ;;  %v9980_v56 = vld [vmem:[#allocation2 + $0x18] sm:$0xff]  ;;  %v3352_v43 = vpop.permute.xlu1 %3351 }
 0x4cf   :  { %3725 = vst.msk [vmem:[#allocation2 + $0x28] sm:$0xff] %vm962_vm9, %v3634_v48  ;;  %6519 = vmatprep.mubr.msk.bf16.mxu1 %vm115_vm10, %v9980_v56 }
 0x4d0   :  { %3440 = vst.msk [vmem:[#allocation2 + $0x40] sm:$0xff] %vm670_vm8, %v3352_v43  ;;  %6520 = vmatmul.mubr.msk.bf16.gmra.mrb[4].mxu1 %vm115_vm10, %v9978_v1 }
 0x4d2   :  { %v3350_v34 = vpop.permute.xlu0 %3349  ;;  %v3640_v25 = vpop.permute.xlu1 %3639 }
 0x4d3   :  { %3439 = vst.msk [vmem:[#allocation2 + $0x38] sm:$0xff] %vm670_vm8, %v3350_v34  ;;  %v9990_v28 = vld [vmem:[#allocation2 + $0x30] sm:$0xff] }
 0x4d4   :  { %3728 = vst.msk [vmem:[#allocation2 + $0x40] sm:$0xff] %vm962_vm9, %v3640_v25 }
 0x4d6   :  { %v3638_v18 = vpop.permute.xlu0 %3637  ;;  %v9992_v52 = vld [vmem:[#allocation2 + $0x28] sm:$0xff]  ;;  %v3356_v7 = vpop.permute.xlu1 %3355 }
 0x4d7   :  { %3727 = vst.msk [vmem:[#allocation2 + $0x38] sm:$0xff] %vm962_vm9, %v3638_v18  ;;  %6523 = vmatprep.mubr.msk.bf16.mxu1 %vm115_vm10, %v9992_v52 }
 0x4d8   :  { %3442 = vst.msk [vmem:[#allocation2 + $0x50] sm:$0xff] %vm670_vm8, %v3356_v7  ;;  %6524 = vmatmul.mubr.msk.bf16.gmra.mrb[8].mxu1 %vm115_vm10, %v9990_v28 }
 0x4da   :  { %v3354_v8 = vpop.permute.xlu0 %3353  ;;  %v3644_v49 = vpop.permute.xlu1 %3643 }
 0x4db   :  { %3441 = vst.msk [vmem:[#allocation2 + $0x48] sm:$0xff] %vm670_vm8, %v3354_v8  ;;  %v10002_v16 = vld [vmem:[#allocation2 + $0x40] sm:$0xff] }
 0x4dc   :  { %3730 = vst.msk [vmem:[#allocation2 + $0x50] sm:$0xff] %vm962_vm9, %v3644_v49 }
 0x4de   :  { %v3642_v33 = vpop.permute.xlu0 %3641  ;;  %v10004_v27 = vld [vmem:[#allocation2 + $0x38] sm:$0xff]  ;;  %v3360_v37 = vpop.permute.xlu1 %3359 }
 0x4df   :  { %3729 = vst.msk [vmem:[#allocation2 + $0x48] sm:$0xff] %vm962_vm9, %v3642_v33  ;;  %6527 = vmatprep.mubr.msk.bf16.mxu1 %vm115_vm10, %v10004_v27 }
 0x4e0   :  { %3444 = vst.msk [vmem:[#allocation2 + $0x60] sm:$0xff] %vm670_vm8, %v3360_v37  ;;  %6528 = vmatmul.mubr.msk.bf16.gmra.mrb[12].mxu1 %vm115_vm10, %v10002_v16 }
 0x4e2   :  { %v3358_v31 = vpop.permute.xlu0 %3357  ;;  %v3648_v61 = vpop.permute.xlu1 %3647 }
 0x4e3   :  { %3443 = vst.msk [vmem:[#allocation2 + $0x58] sm:$0xff] %vm670_vm8, %v3358_v31  ;;  %v10014_v44 = vld [vmem:[#allocation2 + $0x50] sm:$0xff] }
 0x4e4   :  { %3732 = vst.msk [vmem:[#allocation2 + $0x60] sm:$0xff] %vm962_vm9, %v3648_v61 }
 0x4e6   :  { %v3646_v39 = vpop.permute.xlu0 %3645  ;;  %v10016_v13 = vld [vmem:[#allocation2 + $0x48] sm:$0xff]  ;;  %v3364_v57 = vpop.permute.xlu1 %3363 }
 0x4e7   :  { %3731 = vst.msk [vmem:[#allocation2 + $0x58] sm:$0xff] %vm962_vm9, %v3646_v39  ;;  %6531 = vmatprep.mubr.msk.bf16.mxu1 %vm115_vm10, %v10016_v13 }
 0x4e8   :  { %3446 = vst.msk [vmem:[#allocation2 + $0x70] sm:$0xff] %vm670_vm8, %v3364_v57  ;;  %6532 = vmatmul.mubr.msk.bf16.gmra.mrb[16].mxu1 %vm115_vm10, %v10014_v44 }
 0x4ea   :  { %v3362_v41 = vpop.permute.xlu0 %3361  ;;  %v3652_v9 = vpop.permute.xlu1 %3651 }
 0x4eb   :  { %3445 = vst.msk [vmem:[#allocation2 + $0x68] sm:$0xff] %vm670_vm8, %v3362_v41  ;;  %v10026_v35 = vld [vmem:[#allocation2 + $0x60] sm:$0xff] }
 0x4ec   :  { %3734 = vst.msk [vmem:[#allocation2 + $0x70] sm:$0xff] %vm962_vm9, %v3652_v9 }
 0x4ee   :  { %v3650_v46 = vpop.permute.xlu0 %3649  ;;  %v10028_v6 = vld [vmem:[#allocation2 + $0x58] sm:$0xff]  ;;  %v3368_v21 = vpop.permute.xlu1 %3367 }
 0x4ef   :  { %3733 = vst.msk [vmem:[#allocation2 + $0x68] sm:$0xff] %vm962_vm9, %v3650_v46  ;;  %6535 = vmatprep.mubr.msk.bf16.mxu1 %vm115_vm10, %v10028_v6 }
 0x4f0   :  { %3448 = vst.msk [vmem:[#allocation2 + $0x80] sm:$0xff] %vm670_vm8, %v3368_v21  ;;  %6536 = vmatmul.mubr.msk.bf16.gmra.mrb[20].mxu1 %vm115_vm10, %v10026_v35 }
 0x4f2   :  { %v3366_v42 = vpop.permute.xlu0 %3365  ;;  %v3656_v53 = vpop.permute.xlu1 %3655 }
 0x4f3   :  { %3447 = vst.msk [vmem:[#allocation2 + $0x78] sm:$0xff] %vm670_vm8, %v3366_v42  ;;  %v10038_v55 = vld [vmem:[#allocation2 + $0x70] sm:$0xff] }
 0x4f4   :  { %3736 = vst.msk [vmem:[#allocation2 + $0x80] sm:$0xff] %vm962_vm9, %v3656_v53 }
 0x4f6   :  { %v3654_v14 = vpop.permute.xlu0 %3653  ;;  %v10040_v15 = vld [vmem:[#allocation2 + $0x68] sm:$0xff]  ;;  %v3372_v4 = vpop.permute.xlu1 %3371 }
 0x4f7   :  { %3735 = vst.msk [vmem:[#allocation2 + $0x78] sm:$0xff] %vm962_vm9, %v3654_v14  ;;  %6539 = vmatprep.mubr.msk.bf16.mxu1 %vm115_vm10, %v10040_v15 }
 0x4f8   :  { %3450 = vst.msk [vmem:[#allocation2 + $0xa0] sm:$0xff] %vm670_vm8, %v3372_v4  ;;  %6540 = vmatmul.mubr.msk.bf16.gmra.mrb[24].mxu1 %vm115_vm10, %v10038_v55 }
 0x4fa   :  { %v3370_v20 = vpop.permute.xlu0 %3369  ;;  %v3660_v17 = vpop.permute.xlu1 %3659 }
 0x4fb   :  { %3449 = vst.msk [vmem:[#allocation2 + $0x98] sm:$0xff] %vm670_vm8, %v3370_v20  ;;  %v10050_v51 = vld [vmem:[#allocation2 + $0x80] sm:$0xff] }
 0x4fc   :  { %3738 = vst.msk [vmem:[#allocation2 + $0xa0] sm:$0xff] %vm962_vm9, %v3660_v17  ;;  %v3753_v20 = vld [vmem:[#allocation2] sm:$0xff]  ;;  %v4745_v17 = vsel %vm1165_vm3, %v9966_v54, 0  ;;  %v4639_v54 = vld [vmem:[#allocation2 + $0x118] sm:$0xff] }
 0x4fe   :  { %v3658_v24 = vpop.permute.xlu0 %3657  ;;  %v10052_v3 = vld [vmem:[#allocation2 + $0x78] sm:$0xff]  ;;  %v3376_v26 = vpop.permute.xlu1 %3375 }
 0x4ff   :  { %3737 = vst.msk [vmem:[#allocation2 + $0x98] sm:$0xff] %vm962_vm9, %v3658_v24  ;;  %6543 = vmatprep.mubr.msk.bf16.mxu1 %vm115_vm10, %v10052_v3 }
 0x500   :  { %3452 = vst.msk [vmem:[#allocation2 + $0xb0] sm:$0xff] %vm670_vm8, %v3376_v26  ;;  %6544 = vmatmul.mubr.msk.bf16.gmra.mrb[28].mxu1 %vm115_vm10, %v10050_v51 }
 0x502   :  { %v3374_v63 = vpop.permute.xlu0 %3373  ;;  %v3664_v32 = vpop.permute.xlu1 %3663 }
 0x503   :  { %3451 = vst.msk [vmem:[#allocation2 + $0xa8] sm:$0xff] %vm670_vm8, %v3374_v63  ;;  %v10062_v23 = vld [vmem:[#allocation2 + $0xa0] sm:$0xff] }
 0x504   :  { %3740 = vst.msk [vmem:[#allocation2 + $0xb0] sm:$0xff] %vm962_vm9, %v3664_v32 }
 0x506   :  { %v3662_v60 = vpop.permute.xlu0 %3661  ;;  %v10064_v11 = vld [vmem:[#allocation2 + $0x98] sm:$0xff]  ;;  %v3380_v47 = vpop.permute.xlu1 %3379 }
 0x507   :  { %3739 = vst.msk [vmem:[#allocation2 + $0xa8] sm:$0xff] %vm962_vm9, %v3662_v60  ;;  %6547 = vmatprep.mubr.msk.bf16.mxu1 %vm115_vm10, %v10064_v11 }
 0x508   :  { %3454 = vst.msk [vmem:[#allocation2 + $0xc0] sm:$0xff] %vm670_vm8, %v3380_v47  ;;  %6548 = vmatmul.mubr.msk.bf16.gmra.mrb[32].mxu1 %vm115_vm10, %v10062_v23 }
 0x50a   :  { %v3378_v10 = vpop.permute.xlu0 %3377  ;;  %v3668_v5 = vpop.permute.xlu1 %3667 }
 0x50b   :  { %3453 = vst.msk [vmem:[#allocation2 + $0xb8] sm:$0xff] %vm670_vm8, %v3378_v10  ;;  %v10074_v45 = vld [vmem:[#allocation2 + $0xb0] sm:$0xff] }
 0x50c   :  { %3742 = vst.msk [vmem:[#allocation2 + $0xc0] sm:$0xff] %vm962_vm9, %v3668_v5 }
 0x50e   :  { %v3666_v36 = vpop.permute.xlu0 %3665  ;;  %v10076_v19 = vld [vmem:[#allocation2 + $0xa8] sm:$0xff]  ;;  %v3384_v38 = vpop.permute.xlu1 %3383 }
 0x50f   :  { %3741 = vst.msk [vmem:[#allocation2 + $0xb8] sm:$0xff] %vm962_vm9, %v3666_v36  ;;  %6551 = vmatprep.mubr.msk.bf16.mxu1 %vm115_vm10, %v10076_v19 }
 0x510   :  { %3456 = vst.msk [vmem:[#allocation2 + $0xd0] sm:$0xff] %vm670_vm8, %v3384_v38  ;;  %6552 = vmatmul.mubr.msk.bf16.gmra.mrb[36].mxu1 %vm115_vm10, %v10074_v45 }
 0x512   :  { %v3382_v62 = vpop.permute.xlu0 %3381  ;;  %v3672_v22 = vpop.permute.xlu1 %3671 }
 0x513   :  { %3455 = vst.msk [vmem:[#allocation2 + $0xc8] sm:$0xff] %vm670_vm8, %v3382_v62  ;;  %v10086_v30 = vld [vmem:[#allocation2 + $0xc0] sm:$0xff] }
 0x514   :  { %3744 = vst.msk [vmem:[#allocation2 + $0xd0] sm:$0xff] %vm962_vm9, %v3672_v22 }
 0x516   :  { %v3670_v58 = vpop.permute.xlu0 %3669  ;;  %v10088_v12 = vld [vmem:[#allocation2 + $0xb8] sm:$0xff]  ;;  %v3388_v29 = vpop.permute.xlu1 %3387 }
 0x517   :  { %3743 = vst.msk [vmem:[#allocation2 + $0xc8] sm:$0xff] %vm962_vm9, %v3670_v58  ;;  %6555 = vmatprep.mubr.msk.bf16.mxu1 %vm115_vm10, %v10088_v12 }
 0x518   :  { %3458 = vst.msk [vmem:[#allocation2 + $0xe0] sm:$0xff] %vm670_vm8, %v3388_v29  ;;  %6556 = vmatmul.mubr.msk.bf16.gmra.mrb[40].mxu1 %vm115_vm10, %v10086_v30 }
 0x51a   :  { %v3386_v59 = vpop.permute.xlu0 %3385  ;;  %v3676_v0 = vpop.permute.xlu1 %3675 }
 0x51b   :  { %3457 = vst.msk [vmem:[#allocation2 + $0xd8] sm:$0xff] %vm670_vm8, %v3386_v59  ;;  %v10098_v40 = vld [vmem:[#allocation2 + $0xd0] sm:$0xff] }
 0x51c   :  { %3746 = vst.msk [vmem:[#allocation2 + $0xe0] sm:$0xff] %vm962_vm9, %v3676_v0 }
 0x51e   :  { %v3674_v48 = vpop.permute.xlu0 %3673  ;;  %v10100_v43 = vld [vmem:[#allocation2 + $0xc8] sm:$0xff]  ;;  %v3392_v34 = vpop.permute.xlu1 %3391 }
 0x51f   :  { %3745 = vst.msk [vmem:[#allocation2 + $0xd8] sm:$0xff] %vm962_vm9, %v3674_v48  ;;  %6559 = vmatprep.mubr.msk.bf16.mxu1 %vm115_vm10, %v10100_v43 }
 0x520   :  { %3460 = vst.msk [vmem:[#allocation2 + $0xf0] sm:$0xff] %vm670_vm8, %v3392_v34  ;;  %6560 = vmatmul.mubr.msk.bf16.gmra.mrb[44].mxu1 %vm115_vm10, %v10098_v40 }
 0x522   :  { %v3390_v25 = vpop.permute.xlu0 %3389  ;;  %v3680_v18 = vpop.permute.xlu1 %3679 }
 0x523   :  { %3459 = vst.msk [vmem:[#allocation2 + $0xe8] sm:$0xff] %vm670_vm8, %v3390_v25  ;;  %v10110_v7 = vld [vmem:[#allocation2 + $0xe0] sm:$0xff] }
 0x524   :  { %3748 = vst.msk [vmem:[#allocation2 + $0xf0] sm:$0xff] %vm962_vm9, %v3680_v18 }
 0x526   :  { %v3678_v8 = vpop.permute.xlu0 %3677  ;;  %v10112_v49 = vld [vmem:[#allocation2 + $0xd8] sm:$0xff]  ;;  %v3396_v33 = vpop.permute.xlu1 %3395 }
 0x527   :  { %3747 = vst.msk [vmem:[#allocation2 + $0xe8] sm:$0xff] %vm962_vm9, %v3678_v8  ;;  %6563 = vmatprep.mubr.msk.bf16.mxu1 %vm115_vm10, %v10112_v49 }
 0x528   :  { %3462 = vst.msk [vmem:[#allocation2 + $0x100] sm:$0xff] %vm670_vm8, %v3396_v33  ;;  %6564 = vmatmul.mubr.msk.bf16.gmra.mrb[48].mxu1 %vm115_vm10, %v10110_v7 }
 0x52a   :  { %v3394_v37 = vpop.permute.xlu0 %3393  ;;  %v3684_v31 = vpop.permute.xlu1 %3683 }
 0x52b   :  { %3461 = vst.msk [vmem:[#allocation2 + $0xf8] sm:$0xff] %vm670_vm8, %v3394_v37  ;;  %v10122_v61 = vld [vmem:[#allocation2 + $0xf0] sm:$0xff] }
 0x52c   :  { %3750 = vst.msk [vmem:[#allocation2 + $0x100] sm:$0xff] %vm962_vm9, %v3684_v31 }
 0x52e   :  { %v3682_v39 = vpop.permute.xlu0 %3681  ;;  %v10124_v57 = vld [vmem:[#allocation2 + $0xe8] sm:$0xff]  ;;  %v3400_v41 = vpop.permute.xlu1 %3399 }
 0x52f   :  { %3749 = vst.msk [vmem:[#allocation2 + $0xf8] sm:$0xff] %vm962_vm9, %v3682_v39  ;;  %6567 = vmatprep.mubr.msk.bf16.mxu1 %vm115_vm10, %v10124_v57 }
 0x530   :  { %3464 = vst.msk [vmem:[#allocation2 + $0x110] sm:$0xff] %vm670_vm8, %v3400_v41  ;;  %6568 = vmatmul.mubr.msk.bf16.gmra.mrb[52].mxu1 %vm115_vm10, %v10122_v61 }
 0x532   :  { %v3398_v9 = vpop.permute.xlu0 %3397  ;;  %v3688_v46 = vpop.permute.xlu1 %3687 }
 0x533   :  { %3463 = vst.msk [vmem:[#allocation2 + $0x108] sm:$0xff] %vm670_vm8, %v3398_v9  ;;  %v10134_v21 = vld [vmem:[#allocation2 + $0x100] sm:$0xff] }
 0x534   :  { %3752 = vst.msk [vmem:[#allocation2 + $0x110] sm:$0xff] %vm962_vm9, %v3688_v46 }
 0x536   :  { %v3686_v42 = vpop.permute.xlu0 %3685  ;;  %v10136_v53 = vld [vmem:[#allocation2 + $0xf8] sm:$0xff] }
 0x537   :  { %3751 = vst.msk [vmem:[#allocation2 + $0x108] sm:$0xff] %vm962_vm9, %v3686_v42  ;;  %6571 = vmatprep.mubr.msk.bf16.mxu1 %vm115_vm10, %v10136_v53 }
 0x538   :  { %6572 = vmatmul.mubr.msk.bf16.gmra.mrb[56].mxu1 %vm115_vm10, %v10134_v21 }
 0x53b   :  { %v10143_v14 = vld [vmem:[#allocation2 + $0x110] sm:$0xff] }
 0x53e   :  { %v10145_v4 = vld [vmem:[#allocation2 + $0x108] sm:$0xff] }
 0x53f   :  { %6575 = vmatprep.mubr.msk.bf16.mxu1 %vm115_vm10, %v10145_v4 }
 0x540   :  { %6576 = vmatmul.mubr.msk.bf16.gmra.mrb[60].mxu1 %vm115_vm10, %v10143_v14 }
 0x541   :  { %6581 = vmatprep.mubr.msk.bf16.mxu1 %vm115_vm10, %v3753_v20 }
 0x548   :  { %6582 = vmatmul.mubr.msk.bf16.vlgmr.msra.gmra.mrb[0].mxu1 %vm115_vm10, %v9962_v50  ;;  %v3769_v50 = vld [vmem:[#allocation2 + $0x90] sm:$0xff] }
 0x549   :  { %6646 = vmatpush3.bf16.msra.mxu1 %v4745_v17  ;;  %6585 = vmatprep.mubr.msk.bf16.mxu1 %vm115_vm10, %v9960_v2 }
 0x550   :  { %6586 = vmatmul.mubr.msk.bf16.gmra.mrb[4].mxu1 %vm115_vm10, %v9980_v56 }
 0x551   :  { %6589 = vmatprep.mubr.msk.bf16.mxu1 %vm115_vm10, %v9978_v1 }
 0x558   :  { %6590 = vmatmul.mubr.msk.bf16.gmra.mrb[8].mxu1 %vm115_vm10, %v9992_v52 }
 0x559   :  { %6593 = vmatprep.mubr.msk.bf16.mxu1 %vm115_vm10, %v9990_v28 }
 0x560   :  { %6594 = vmatmul.mubr.msk.bf16.gmra.mrb[12].mxu1 %vm115_vm10, %v10004_v27 }
 0x561   :  { %6597 = vmatprep.mubr.msk.bf16.mxu1 %vm115_vm10, %v10002_v16 }
 0x568   :  { %6598 = vmatmul.mubr.msk.bf16.gmra.mrb[16].mxu1 %vm115_vm10, %v10016_v13 }
 0x569   :  { %6601 = vmatprep.mubr.msk.bf16.mxu1 %vm115_vm10, %v10014_v44 }
 0x570   :  { %6602 = vmatmul.mubr.msk.bf16.gmra.mrb[20].mxu1 %vm115_vm10, %v10028_v6 }
 0x571   :  { %6605 = vmatprep.mubr.msk.bf16.mxu1 %vm115_vm10, %v10026_v35 }
 0x578   :  { %6606 = vmatmul.mubr.msk.bf16.gmra.mrb[24].mxu1 %vm115_vm10, %v10040_v15 }
 0x579   :  { %6609 = vmatprep.mubr.msk.bf16.mxu1 %vm115_vm10, %v10038_v55 }
 0x580   :  { %6610 = vmatmul.mubr.msk.bf16.gmra.mrb[28].mxu1 %vm115_vm10, %v10052_v3 }
 0x581   :  { %6613 = vmatprep.mubr.msk.bf16.mxu1 %vm115_vm10, %v3769_v50 }
 0x588   :  { %6614 = vmatmul.mubr.msk.bf16.gmra.mrb[32].mxu1 %vm115_vm10, %v10064_v11 }
 0x589   :  { %6617 = vmatprep.mubr.msk.bf16.mxu1 %vm115_vm10, %v10062_v23 }
 0x590   :  { %6618 = vmatmul.mubr.msk.bf16.gmra.mrb[36].mxu1 %vm115_vm10, %v10076_v19 }
 0x591   :  { %6621 = vmatprep.mubr.msk.bf16.mxu1 %vm115_vm10, %v10074_v45 }
 0x598   :  { %6622 = vmatmul.mubr.msk.bf16.gmra.mrb[40].mxu1 %vm115_vm10, %v10088_v12 }
 0x599   :  { %6625 = vmatprep.mubr.msk.bf16.mxu1 %vm115_vm10, %v10086_v30 }
 0x5a0   :  { %6626 = vmatmul.mubr.msk.bf16.gmra.mrb[44].mxu1 %vm115_vm10, %v10100_v43 }
 0x5a1   :  { %6629 = vmatprep.mubr.msk.bf16.mxu1 %vm115_vm10, %v10098_v40 }
 0x5a8   :  { %6630 = vmatmul.mubr.msk.bf16.gmra.mrb[48].mxu1 %vm115_vm10, %v10112_v49 }
 0x5a9   :  { %6633 = vmatprep.mubr.msk.bf16.mxu1 %vm115_vm10, %v10110_v7 }
 0x5b0   :  { %6634 = vmatmul.mubr.msk.bf16.gmra.mrb[52].mxu1 %vm115_vm10, %v10124_v57 }
 0x5b1   :  { %6637 = vmatprep.mubr.msk.bf16.mxu1 %vm115_vm10, %v10122_v61 }
 0x5b8   :  { %6638 = vmatmul.mubr.msk.bf16.gmra.mrb[56].mxu1 %vm115_vm10, %v10136_v53 }
 0x5b9   :  { %6641 = vmatprep.mubr.msk.bf16.mxu1 %vm115_vm10, %v10134_v21 }
 0x5c0   :  { %6642 = vmatmul.mubr.msk.bf16.gmra.mrb[60].mxu1 %vm115_vm10, %v10145_v4 }
 0x5c1   :  { %6647 = vmatprep.mubr.msk.bf16.mxu1 %vm115_vm10, %v9960_v2  ;;  %v4623_v2 = vld [vmem:[#allocation2 + $0x88] sm:$0xff] }
 0x5c8   :  { %6648 = vmatmul.mubr.msk.bf16.vlgmr.msra.gmra.mrb[0].mxu1 %vm115_vm10, %v9980_v56 }
 0x5c9   :  { %6651 = vmatprep.mubr.msk.bf16.mxu1 %vm115_vm10, %v9978_v1 }
 0x5d0   :  { %6652 = vmatmul.mubr.msk.bf16.gmra.mrb[4].mxu1 %vm115_vm10, %v9992_v52 }
 0x5d1   :  { %6655 = vmatprep.mubr.msk.bf16.mxu1 %vm115_vm10, %v9990_v28 }
 0x5d8   :  { %6656 = vmatmul.mubr.msk.bf16.gmra.mrb[8].mxu1 %vm115_vm10, %v10004_v27 }
 0x5d9   :  { %6659 = vmatprep.mubr.msk.bf16.mxu1 %vm115_vm10, %v10002_v16 }
 0x5e0   :  { %6660 = vmatmul.mubr.msk.bf16.gmra.mrb[12].mxu1 %vm115_vm10, %v10016_v13 }
 0x5e1   :  { %6663 = vmatprep.mubr.msk.bf16.mxu1 %vm115_vm10, %v10014_v44 }
 0x5e8   :  { %6664 = vmatmul.mubr.msk.bf16.gmra.mrb[16].mxu1 %vm115_vm10, %v10028_v6 }
 0x5e9   :  { %6667 = vmatprep.mubr.msk.bf16.mxu1 %vm115_vm10, %v10026_v35 }
 0x5f0   :  { %6668 = vmatmul.mubr.msk.bf16.gmra.mrb[20].mxu1 %vm115_vm10, %v10040_v15 }
 0x5f1   :  { %6671 = vmatprep.mubr.msk.bf16.mxu1 %vm115_vm10, %v10038_v55 }
 0x5f8   :  { %6672 = vmatmul.mubr.msk.bf16.gmra.mrb[24].mxu1 %vm115_vm10, %v10052_v3 }
 0x5f9   :  { %6675 = vmatprep.mubr.msk.bf16.mxu1 %vm115_vm10, %v10050_v51 }
 0x600   :  { %6676 = vmatmul.mubr.msk.bf16.gmra.mrb[28].mxu1 %vm115_vm10, %v4623_v2 }
 0x601   :  { %6679 = vmatprep.mubr.msk.bf16.mxu1 %vm115_vm10, %v10062_v23 }
 0x608   :  { %6680 = vmatmul.mubr.msk.bf16.gmra.mrb[32].mxu1 %vm115_vm10, %v10076_v19 }
 0x609   :  { %6683 = vmatprep.mubr.msk.bf16.mxu1 %vm115_vm10, %v10074_v45 }
 0x610   :  { %6684 = vmatmul.mubr.msk.bf16.gmra.mrb[36].mxu1 %vm115_vm10, %v10088_v12 }
 0x611   :  { %6687 = vmatprep.mubr.msk.bf16.mxu1 %vm115_vm10, %v10086_v30 }
 0x618   :  { %6688 = vmatmul.mubr.msk.bf16.gmra.mrb[40].mxu1 %vm115_vm10, %v10100_v43 }
 0x619   :  { %6691 = vmatprep.mubr.msk.bf16.mxu1 %vm115_vm10, %v10098_v40 }
 0x620   :  { %6692 = vmatmul.mubr.msk.bf16.gmra.mrb[44].mxu1 %vm115_vm10, %v10112_v49 }
 0x621   :  { %6695 = vmatprep.mubr.msk.bf16.mxu1 %vm115_vm10, %v10110_v7 }
 0x628   :  { %6696 = vmatmul.mubr.msk.bf16.gmra.mrb[48].mxu1 %vm115_vm10, %v10124_v57 }
 0x629   :  { %6699 = vmatprep.mubr.msk.bf16.mxu1 %vm115_vm10, %v10122_v61 }
 0x630   :  { %6700 = vmatmul.mubr.msk.bf16.gmra.mrb[52].mxu1 %vm115_vm10, %v10136_v53 }
 0x631   :  { %6703 = vmatprep.mubr.msk.bf16.mxu1 %vm115_vm10, %v10134_v21 }
 0x638   :  { %6704 = vmatmul.mubr.msk.bf16.gmra.mrb[56].mxu1 %vm115_vm10, %v10145_v4 }
 0x639   :  { %6707 = vmatprep.mubr.msk.bf16.mxu1 %vm115_vm10, %v10143_v14 }
 0x640   :  { %6708 = vmatmul.mubr.msk.bf16.gmra.mrb[60].mxu1 %vm115_vm10, %v4639_v54 }
 0x69b   :  { %v10277_v1 = vpop.f32.mrb[0].mxu1 }
 0x69c   :  { %v10279_v56 = vpop.f32.mrb[1].mxu1  ;;  %v5103_v13 = vsel %vm509_vm6, %v10277_v1, 0.0 }
 0x69d   :  { %v10281_v28 = vpop.f32.mrb[2].mxu1  ;;  %v5100_v16 = vsel %vm509_vm6, %v10279_v56, 0.0 }
 0x69e   :  { %v10283_v52 = vpop.f32.mrb[3].mxu1  ;;  %v5105_v6 = vsel %vm509_vm6, %v10281_v28, 0.0 }
 0x69f   :  { %v5101_v27 = vsel %vm509_vm6, %v10283_v52, 0.0 }
 0x6a0   :  { %v5102_v44 = vadd.f32 %v5101_v27, %v5100_v16 }
 0x6a2   :  { %v5104_v35 = vadd.f32 %v5103_v13, %v5102_v44 }
 0x6a3   :  { %v10293_v55 = vpop.f32.mrb[4].mxu1 }
 0x6a4   :  { %v10295_v15 = vpop.f32.mrb[5].mxu1  ;;  %v5106_v51 = vadd.f32 %v5105_v6, %v5104_v35  ;;  %v5111_v60 = vsel %vm509_vm6, %v10293_v55, 0.0 }
 0x6a5   :  { %v5107_v24 = vsel %vm509_vm6, %v10295_v15, 0.0  ;;  %v10299_v3 = vpop.f32.mrb[6].mxu1 }
 0x6a6   :  { %v5108_v26 = vadd.f32 %v5107_v24, %v5106_v51  ;;  %v10301_v63 = vpop.f32.mrb[7].mxu1  ;;  %v5113_v47 = vsel %vm509_vm6, %v10299_v3, 0.0 }
 0x6a7   :  { %v5109_v32 = vsel %vm509_vm6, %v10301_v63, 0.0 }
 0x6a8   :  { %v5110_v23 = vadd.f32 %v5109_v32, %v5108_v26 }
 0x6aa   :  { %v5112_v11 = vadd.f32 %v5111_v60, %v5110_v23 }
 0x6ab   :  { %v10309_v10 = vpop.f32.mrb[8].mxu1 }
 0x6ac   :  { %v10311_v5 = vpop.f32.mrb[9].mxu1  ;;  %v5114_v45 = vadd.f32 %v5113_v47, %v5112_v11  ;;  %v5119_v58 = vsel %vm509_vm6, %v10309_v10, 0.0 }
 0x6ad   :  { %v5115_v36 = vsel %vm509_vm6, %v10311_v5, 0.0  ;;  %v10315_v19 = vpop.f32.mrb[10].mxu1 }
 0x6ae   :  { %v5116_v38 = vadd.f32 %v5115_v36, %v5114_v45  ;;  %v10317_v62 = vpop.f32.mrb[11].mxu1  ;;  %v5121_v29 = vsel %vm509_vm6, %v10315_v19, 0.0 }
 0x6af   :  { %v5117_v22 = vsel %vm509_vm6, %v10317_v62, 0.0 }
 0x6b0   :  { %v5118_v30 = vadd.f32 %v5117_v22, %v5116_v38 }
 0x6b2   :  { %v5120_v12 = vadd.f32 %v5119_v58, %v5118_v30 }
 0x6b3   :  { %v10325_v59 = vpop.f32.mrb[12].mxu1 }
 0x6b4   :  { %v10327_v0 = vpop.f32.mrb[13].mxu1  ;;  %v5122_v40 = vadd.f32 %v5121_v29, %v5120_v12  ;;  %v5127_v8 = vsel %vm509_vm6, %v10325_v59, 0.0 }
 0x6b5   :  { %v5123_v48 = vsel %vm509_vm6, %v10327_v0, 0.0  ;;  %v10331_v43 = vpop.f32.mrb[14].mxu1 }
 0x6b6   :  { %v5124_v34 = vadd.f32 %v5123_v48, %v5122_v40  ;;  %v10333_v25 = vpop.f32.mrb[15].mxu1  ;;  %v5129_v33 = vsel %vm509_vm6, %v10331_v43, 0.0 }
 0x6b7   :  { %v5125_v18 = vsel %vm509_vm6, %v10333_v25, 0.0 }
 0x6b8   :  { %v5126_v7 = vadd.f32 %v5125_v18, %v5124_v34 }
 0x6ba   :  { %v5128_v49 = vadd.f32 %v5127_v8, %v5126_v7 }
 0x6bb   :  { %v10341_v37 = vpop.f32.mrb[16].mxu1 }
 0x6bc   :  { %v10343_v31 = vpop.f32.mrb[17].mxu1  ;;  %v5130_v61 = vadd.f32 %v5129_v33, %v5128_v49  ;;  %v5135_v42 = vsel %vm509_vm6, %v10341_v37, 0.0 }
 0x6bd   :  { %v5131_v39 = vsel %vm509_vm6, %v10343_v31, 0.0  ;;  %v10347_v57 = vpop.f32.mrb[18].mxu1 }
 0x6be   :  { %v5132_v41 = vadd.f32 %v5131_v39, %v5130_v61  ;;  %v10349_v9 = vpop.f32.mrb[19].mxu1  ;;  %v5137_v14 = vsel %vm509_vm6, %v10347_v57, 0.0 }
 0x6bf   :  { %v5133_v46 = vsel %vm509_vm6, %v10349_v9, 0.0 }
 0x6c0   :  { %v5134_v21 = vadd.f32 %v5133_v46, %v5132_v41 }
 0x6c2   :  { %v5136_v53 = vadd.f32 %v5135_v42, %v5134_v21 }
 0x6c3   :  { %v10357_v4 = vpop.f32.mrb[20].mxu1 }
 0x6c4   :  { %v10359_v20 = vpop.f32.mrb[21].mxu1  ;;  %v5138_v17 = vadd.f32 %v5137_v14, %v5136_v53  ;;  %v5143_v13 = vsel %vm509_vm6, %v10357_v4, 0.0 }
 0x6c5   :  { %v5139_v50 = vsel %vm509_vm6, %v10359_v20, 0.0  ;;  %v10363_v2 = vpop.f32.mrb[22].mxu1 }
 0x6c6   :  { %v5140_v54 = vadd.f32 %v5139_v50, %v5138_v17  ;;  %v10365_v16 = vpop.f32.mrb[23].mxu1  ;;  %v5145_v6 = vsel %vm509_vm6, %v10363_v2, 0.0 }
 0x6c7   :  { %v5141_v27 = vsel %vm509_vm6, %v10365_v16, 0.0 }
 0x6c8   :  { %v5142_v44 = vadd.f32 %v5141_v27, %v5140_v54 }
 0x6ca   :  { %v5144_v35 = vadd.f32 %v5143_v13, %v5142_v44 }
 0x6cb   :  { %v10373_v51 = vpop.f32.mrb[24].mxu1 }
 0x6cc   :  { %v10375_v24 = vpop.f32.mrb[25].mxu1  ;;  %v5146_v26 = vadd.f32 %v5145_v6, %v5144_v35  ;;  %v5151_v36 = vsel %vm509_vm6, %v10373_v51, 0.0 }
 0x6cd   :  { %v5147_v32 = vsel %vm509_vm6, %v10375_v24, 0.0  ;;  %v10379_v23 = vpop.f32.mrb[26].mxu1 }
 0x6ce   :  { %v5148_v60 = vadd.f32 %v5147_v32, %v5146_v26  ;;  %v10381_v11 = vpop.f32.mrb[27].mxu1  ;;  %v5153_v22 = vsel %vm509_vm6, %v10379_v23, 0.0 }
 0x6cf   :  { %v5149_v47 = vsel %vm509_vm6, %v10381_v11, 0.0 }
 0x6d0   :  { %v5150_v45 = vadd.f32 %v5149_v47, %v5148_v60 }
 0x6d2   :  { %v5152_v38 = vadd.f32 %v5151_v36, %v5150_v45 }
 0x6d3   :  { %v10389_v30 = vpop.f32.mrb[28].mxu1 }
 0x6d4   :  { %v10391_v58 = vpop.f32.mrb[29].mxu1  ;;  %v5154_v12 = vadd.f32 %v5153_v22, %v5152_v38  ;;  %v5159_v8 = vsel %vm509_vm6, %v10389_v30, 0.0 }
 0x6d5   :  { %v5155_v29 = vsel %vm509_vm6, %v10391_v58, 0.0  ;;  %v10395_v40 = vpop.f32.mrb[30].mxu1 }
 0x6d6   :  { %v5156_v48 = vadd.f32 %v5155_v29, %v5154_v12  ;;  %v10397_v34 = vpop.f32.mrb[31].mxu1  ;;  %v5161_v33 = vsel %vm509_vm6, %v10395_v40, 0.0 }
 0x6d7   :  { %v5157_v18 = vsel %vm509_vm6, %v10397_v34, 0.0 }
 0x6d8   :  { %v5158_v7 = vadd.f32 %v5157_v18, %v5156_v48 }
 0x6da   :  { %v5160_v49 = vadd.f32 %v5159_v8, %v5158_v7 }
 0x6db   :  { %v10405_v61 = vpop.f32.mrb[32].mxu1 }
 0x6dc   :  { %v10407_v39 = vpop.f32.mrb[33].mxu1  ;;  %v5162_v41 = vadd.f32 %v5161_v33, %v5160_v49  ;;  %v5167_v50 = vsel %vm509_vm6, %v10405_v61, 0.0 }
 0x6dd   :  { %v5163_v46 = vsel %vm509_vm6, %v10407_v39, 0.0  ;;  %v10411_v21 = vpop.f32.mrb[34].mxu1 }
 0x6de   :  { %v5164_v42 = vadd.f32 %v5163_v46, %v5162_v41  ;;  %v10413_v53 = vpop.f32.mrb[35].mxu1  ;;  %v5169_v27 = vsel %vm509_vm6, %v10411_v21, 0.0 }
 0x6df   :  { %v5165_v14 = vsel %vm509_vm6, %v10413_v53, 0.0 }
 0x6e0   :  { %v5166_v17 = vadd.f32 %v5165_v14, %v5164_v42 }
 0x6e2   :  { %v5168_v54 = vadd.f32 %v5167_v50, %v5166_v17 }
 0x6e3   :  { %v10421_v44 = vpop.f32.mrb[36].mxu1 }
 0x6e4   :  { %v10423_v13 = vpop.f32.mrb[37].mxu1  ;;  %v5170_v35 = vadd.f32 %v5169_v27, %v5168_v54  ;;  %v5175_v36 = vsel %vm509_vm6, %v10421_v44, 0.0 }
 0x6e5   :  { %v5171_v6 = vsel %vm509_vm6, %v10423_v13, 0.0  ;;  %v10427_v26 = vpop.f32.mrb[38].mxu1 }
 0x6e6   :  { %v5172_v32 = vadd.f32 %v5171_v6, %v5170_v35  ;;  %v10429_v60 = vpop.f32.mrb[39].mxu1  ;;  %v5177_v22 = vsel %vm509_vm6, %v10427_v26, 0.0 }
 0x6e7   :  { %v5173_v47 = vsel %vm509_vm6, %v10429_v60, 0.0 }
 0x6e8   :  { %v5174_v45 = vadd.f32 %v5173_v47, %v5172_v32 }
 0x6ea   :  { %v5176_v38 = vadd.f32 %v5175_v36, %v5174_v45 }
 0x6eb   :  { %v10437_v12 = vpop.f32.mrb[40].mxu1 }
 0x6ec   :  { %v10439_v29 = vpop.f32.mrb[41].mxu1  ;;  %v5178_v48 = vadd.f32 %v5177_v22, %v5176_v38  ;;  %v5183_v46 = vsel %vm509_vm6, %v10437_v12, 0.0 }
 0x6ed   :  { %v5179_v18 = vsel %vm509_vm6, %v10439_v29, 0.0  ;;  %v10443_v7 = vpop.f32.mrb[42].mxu1 }
 0x6ee   :  { %v5180_v8 = vadd.f32 %v5179_v18, %v5178_v48  ;;  %v10445_v49 = vpop.f32.mrb[43].mxu1  ;;  %v5185_v14 = vsel %vm509_vm6, %v10443_v7, 0.0 }
 0x6ef   :  { %v5181_v33 = vsel %vm509_vm6, %v10445_v49, 0.0 }
 0x6f0   :  { %v5182_v41 = vadd.f32 %v5181_v33, %v5180_v8 }
 0x6f2   :  { %v5184_v42 = vadd.f32 %v5183_v46, %v5182_v41 }
 0x6f3   :  { %v10453_v17 = vpop.f32.mrb[44].mxu1 }
 0x6f4   :  { %v10455_v50 = vpop.f32.mrb[45].mxu1  ;;  %v5186_v54 = vadd.f32 %v5185_v14, %v5184_v42  ;;  %v5191_v36 = vsel %vm509_vm6, %v10453_v17, 0.0 }
 0x6f5   :  { %v5187_v27 = vsel %vm509_vm6, %v10455_v50, 0.0  ;;  %v10459_v35 = vpop.f32.mrb[46].mxu1 }
 0x6f6   :  { %12050 = vst [vmem:[#allocation34_spill] sm:$0xff] %v10459_v35  ;;  %v5188_v6 = vadd.f32 %v5187_v27, %v5186_v54  ;;  %v10461_v32 = vpop.f32.mrb[47].mxu1  ;;  %v5193_v22 = vsel %vm509_vm6, %v10459_v35, 0.0 }
 0x6f7   :  { %v5189_v47 = vsel %vm509_vm6, %v10461_v32, 0.0 }
 0x6f8   :  { %v5190_v45 = vadd.f32 %v5189_v47, %v5188_v6 }
 0x6fa   :  { %v5192_v38 = vadd.f32 %v5191_v36, %v5190_v45 }
 0x6fb   :  { %v10469_v48 = vpop.f32.mrb[48].mxu1 }
 0x6fc   :  { %12051 = vst [vmem:[#allocation36_spill] sm:$0xff] %v10469_v48  ;;  %v10471_v18 = vpop.f32.mrb[49].mxu1  ;;  %v5194_v8 = vadd.f32 %v5193_v22, %v5192_v38  ;;  %v5199_v27 = vsel %vm509_vm6, %v10469_v48, 0.0 }
 0x6fd   :  { %12052 = vst [vmem:[#allocation42_spill] sm:$0xff] %v10471_v18  ;;  %v5195_v33 = vsel %vm509_vm6, %v10471_v18, 0.0  ;;  %v10475_v41 = vpop.f32.mrb[50].mxu1 }
 0x6fe   :  { %12053 = vst [vmem:[#allocation43_spill] sm:$0xff] %v10475_v41  ;;  %v5196_v46 = vadd.f32 %v5195_v33, %v5194_v8  ;;  %v10477_v42 = vpop.f32.mrb[51].mxu1  ;;  %v5201_v47 = vsel %vm509_vm6, %v10475_v41, 0.0 }
 0x6ff   :  { %12054 = vst [vmem:[#allocation21_spill] sm:$0xff] %v10477_v42  ;;  %v5197_v14 = vsel %vm509_vm6, %v10477_v42, 0.0 }
 0x700   :  { %v5198_v54 = vadd.f32 %v5197_v14, %v5196_v46 }
 0x702   :  { %v5200_v6 = vadd.f32 %v5199_v27, %v5198_v54 }
 0x703   :  { %v10485_v45 = vpop.f32.mrb[52].mxu1 }
 0x704   :  { %12055 = vst [vmem:[#allocation22_spill] sm:$0xff] %v10485_v45  ;;  %v10487_v36 = vpop.f32.mrb[53].mxu1  ;;  %v5202_v38 = vadd.f32 %v5201_v47, %v5200_v6  ;;  %v5207_v54 = vsel %vm509_vm6, %v10485_v45, 0.0 }
 0x705   :  { %12056 = vst [vmem:[#allocation38_spill] sm:$0xff] %v10487_v36  ;;  %v5203_v22 = vsel %vm509_vm6, %v10487_v36, 0.0  ;;  %v10491_v8 = vpop.f32.mrb[54].mxu1 }
 0x706   :  { %12057 = vst [vmem:[#allocation39_spill] sm:$0xff] %v10491_v8  ;;  %v5204_v33 = vadd.f32 %v5203_v22, %v5202_v38  ;;  %v10493_v42 = vpop.f32.mrb[55].mxu1  ;;  %v5209_v41 = vsel %vm509_vm6, %v10491_v8, 0.0 }
 0x707   :  { %12058 = vst [vmem:[#allocation40_spill] sm:$0xff] %v10493_v42  ;;  %v5205_v46 = vsel %vm509_vm6, %v10493_v42, 0.0 }
 0x708   :  { %v5206_v14 = vadd.f32 %v5205_v46, %v5204_v33 }
 0x70a   :  { %v5208_v27 = vadd.f32 %v5207_v54, %v5206_v14 }
 0x70b   :  { %v10501_v6 = vpop.f32.mrb[56].mxu1 }
 0x70c   :  { %12059 = vst [vmem:[#allocation41_spill] sm:$0xff] %v10501_v6  ;;  %v10503_v47 = vpop.f32.mrb[57].mxu1  ;;  %v5210_v36 = vadd.f32 %v5209_v41, %v5208_v27  ;;  %v5215_v14 = vsel %vm509_vm6, %v10501_v6, 0.0 }
 0x70d   :  { %12060 = vst [vmem:[#allocation45_spill] sm:$0xff] %v10503_v47  ;;  %v5211_v38 = vsel %vm509_vm6, %v10503_v47, 0.0  ;;  %v10507_v22 = vpop.f32.mrb[58].mxu1 }
 0x70e   :  { %12061 = vst [vmem:[#allocation46_spill] sm:$0xff] %v10507_v22  ;;  %v5212_v48 = vadd.f32 %v5211_v38, %v5210_v36  ;;  %v10509_v42 = vpop.f32.mrb[59].mxu1  ;;  %v5217_v8 = vsel %vm509_vm6, %v10507_v22, 0.0 }
 0x70f   :  { %12062 = vst [vmem:[#allocation48_spill] sm:$0xff] %v10509_v42  ;;  %v5213_v33 = vsel %vm509_vm6, %v10509_v42, 0.0 }
 0x710   :  { %v5214_v46 = vadd.f32 %v5213_v33, %v5212_v48 }
 0x712   :  { %v5216_v54 = vadd.f32 %v5215_v14, %v5214_v46 }
 0x713   :  { %v10517_v41 = vpop.f32.mrb[60].mxu1 }
 0x714   :  { %v10519_v27 = vpop.f32.mrb[61].mxu1  ;;  %v5218_v47 = vadd.f32 %v5217_v8, %v5216_v54  ;;  %v5223_v46 = vsel %vm509_vm6, %v10517_v41, 0.0 }
 0x715   :  { %12063 = vst [vmem:[#allocation49_spill] sm:$0xff] %v10519_v27  ;;  %v5219_v36 = vsel %vm509_vm6, %v10519_v27, 0.0  ;;  %v10523_v38 = vpop.f32.mrb[62].mxu1 }
 0x716   :  { %v5220_v45 = vadd.f32 %v5219_v36, %v5218_v47  ;;  %v10525_v42 = vpop.f32.mrb[63].mxu1  ;;  %v5225_v22 = vsel %vm509_vm6, %v10523_v38, 0.0 }
 0x717   :  { %12064 = vst [vmem:[#allocation47_spill] sm:$0xff] %v10525_v42  ;;  %v5221_v48 = vsel %vm509_vm6, %v10525_v42, 0.0 }
 0x718   :  { %v5222_v33 = vadd.f32 %v5221_v48, %v5220_v45 }
 0x71a   :  { %v5224_v14 = vadd.f32 %v5223_v46, %v5222_v33  ;;  %v12076_v33 = vld [vmem:[#allocation36_spill] sm:$0xff]  ;;  %v12078_v46 = vld [vmem:[#allocation43_spill] sm:$0xff] }
 0x71c   :  { %v5226_v8 = vadd.f32 %v5225_v22, %v5224_v14  ;;  %v12080_v14 = vld [vmem:[#allocation38_spill] sm:$0xff] }
 0x71e   :  { %v5227_v54 = vrot.slane %v5226_v8, 4 }
 0x720   :  { %v5228_v6 = vadd.f32 %v5227_v54, %v5226_v8  ;;  %v12082_v54 = vld [vmem:[#allocation40_spill] sm:$0xff] }
 0x722   :  { %v5229_v27 = vrot.slane %v5228_v6, 2 }
 0x724   :  { %v5230_v18 = vadd.f32 %v5229_v27, %v5228_v6  ;;  %v12072_v6 = vld [vmem:[#allocation42_spill] sm:$0xff]  ;;  %v12074_v27 = vld [vmem:[#allocation21_spill] sm:$0xff] }
 0x726   :  { %v5231_v35 = vrot.slane %v5230_v18, 1 }
 0x728   :  { %v5232_v47 = vadd.f32 %v5231_v35, %v5230_v18  ;;  %v12070_v18 = vld [vmem:[#allocation34_spill] sm:$0xff] }
 0x72a   :  { %v10533_v36 = vmul.f32 0.001953125, %v5232_v47 }
 0x72c   :  { %v10537_v42 = vsub.f32 %v10279_v56, %v10533_v36  ;;  %v10541_v45 = vsub.f32 %v10283_v52, %v10533_v36  ;;  %v10545_v48 = vsub.f32 %v10277_v1, %v10533_v36  ;;  %v10549_v22 = vsub.f32 %v10281_v28, %v10533_v36 }
 0x72d   :  { %v10553_v35 = vsub.f32 %v10295_v15, %v10533_v36  ;;  %v10557_v56 = vsub.f32 %v10301_v63, %v10533_v36  ;;  %v10561_v52 = vsub.f32 %v10293_v55, %v10533_v36  ;;  %v10565_v1 = vsub.f32 %v10299_v3, %v10533_v36 }
 0x72e   :  { %12065 = vst [vmem:[#allocation27_spill] sm:$0xff] %v10537_v42  ;;  %12066 = vst [vmem:[#allocation24_spill] sm:$0xff] %v10541_v45  ;;  %v10569_v28 = vsub.f32 %v10311_v5, %v10533_v36  ;;  %v10573_v15 = vsub.f32 %v10317_v62, %v10533_v36  ;;  %v10577_v63 = vsub.f32 %v10309_v10, %v10533_v36 }
 0x72f   :  { %12067 = vst [vmem:[#allocation23_spill] sm:$0xff] %v10545_v48  ;;  %12068 = vst [vmem:[#allocation25_spill] sm:$0xff] %v10549_v22  ;;  %v10581_v55 = vsub.f32 %v10315_v19, %v10533_v36  ;;  %v10585_v3 = vsub.f32 %v10327_v0, %v10533_v36  ;;  %v10589_v5 = vsub.f32 %v10333_v25, %v10533_v36 }
 0x730   :  { %v10593_v62 = vsub.f32 %v10325_v59, %v10533_v36  ;;  %v10597_v10 = vsub.f32 %v10331_v43, %v10533_v36  ;;  %v10601_v19 = vsub.f32 %v10343_v31, %v10533_v36  ;;  %v10605_v0 = vsub.f32 %v10349_v9, %v10533_v36 }
 0x731   :  { %v10609_v25 = vsub.f32 %v10341_v37, %v10533_v36  ;;  %v10613_v59 = vsub.f32 %v10347_v57, %v10533_v36  ;;  %v10617_v43 = vsub.f32 %v10359_v20, %v10533_v36  ;;  %v10621_v31 = vsub.f32 %v10365_v16, %v10533_v36 }
 0x732   :  { %v10625_v9 = vsub.f32 %v10357_v4, %v10533_v36  ;;  %v10629_v37 = vsub.f32 %v10363_v2, %v10533_v36  ;;  %v10633_v57 = vsub.f32 %v10375_v24, %v10533_v36  ;;  %v10637_v20 = vsub.f32 %v10381_v11, %v10533_v36 }
 0x733   :  { %v10641_v16 = vsub.f32 %v10373_v51, %v10533_v36  ;;  %v10645_v4 = vsub.f32 %v10379_v23, %v10533_v36  ;;  %v10649_v2 = vsub.f32 %v10391_v58, %v10533_v36  ;;  %v10653_v24 = vsub.f32 %v10397_v34, %v10533_v36 }
 0x734   :  { %v10657_v11 = vsub.f32 %v10389_v30, %v10533_v36  ;;  %v10661_v51 = vsub.f32 %v10395_v40, %v10533_v36  ;;  %v10665_v23 = vsub.f32 %v10407_v39, %v10533_v36  ;;  %v10669_v58 = vsub.f32 %v10413_v53, %v10533_v36 }
 0x735   :  { %v10673_v34 = vsub.f32 %v10405_v61, %v10533_v36  ;;  %v10677_v30 = vsub.f32 %v10411_v21, %v10533_v36  ;;  %v10681_v40 = vsub.f32 %v10423_v13, %v10533_v36  ;;  %v10685_v39 = vsub.f32 %v10429_v60, %v10533_v36 }
 0x736   :  { %v10689_v53 = vsub.f32 %v10421_v44, %v10533_v36  ;;  %v10693_v61 = vsub.f32 %v10427_v26, %v10533_v36  ;;  %v10697_v21 = vsub.f32 %v10439_v29, %v10533_v36  ;;  %v10701_v13 = vsub.f32 %v10445_v49, %v10533_v36 }
 0x737   :  { %v10705_v60 = vsub.f32 %v10437_v12, %v10533_v36  ;;  %v10709_v44 = vsub.f32 %v10443_v7, %v10533_v36  ;;  %v10713_v26 = vsub.f32 %v10455_v50, %v10533_v36  ;;  %v10717_v29 = vsub.f32 %v10461_v32, %v10533_v36 }
 0x738   :  { %v10721_v49 = vsub.f32 %v10453_v17, %v10533_v36  ;;  %v10725_v12 = vsub.f32 %v12070_v18, %v10533_v36  ;;  %v10729_v7 = vsub.f32 %v12072_v6, %v10533_v36  ;;  %v10733_v50 = vsub.f32 %v12074_v27, %v10533_v36  ;;  %v12084_v18 = vld [vmem:[#allocation22_spill] sm:$0xff]  ;;  %v12086_v27 = vld [vmem:[#allocation39_spill] sm:$0xff] }
 0x739   :  { %v10737_v32 = vsub.f32 %v12076_v33, %v10533_v36  ;;  %v10741_v17 = vsub.f32 %v12078_v46, %v10533_v36  ;;  %v10745_v8 = vsub.f32 %v12080_v14, %v10533_v36  ;;  %v10749_v47 = vsub.f32 %v12082_v54, %v10533_v36 }
 0x73a   :  { %12069 = vst [vmem:[#allocation31_spill] sm:$0xff] %v10721_v49  ;;  %12071 = vst [vmem:[#allocation28_spill] sm:$0xff] %v10725_v12  ;;  %v10753_v6 = vsub.f32 %v12084_v18, %v10533_v36  ;;  %v10757_v33 = vsub.f32 %v12086_v27, %v10533_v36 }
 0x73b   :  { %12073 = vst [vmem:[#allocation26_spill] sm:$0xff] %v10729_v7  ;;  %12075 = vst [vmem:[#allocation29_spill] sm:$0xff] %v10733_v50 }
 0x73c   :  { %12077 = vst [vmem:[#allocation33_spill] sm:$0xff] %v10737_v32  ;;  %12079 = vst [vmem:[#allocation35_spill] sm:$0xff] %v10741_v17  ;;  %v12088_v32 = vld [vmem:[#allocation45_spill] sm:$0xff]  ;;  %v12090_v17 = vld [vmem:[#allocation48_spill] sm:$0xff] }
 0x73d   :  { %12081 = vst [vmem:[#allocation44_spill] sm:$0xff] %v10745_v8  ;;  %12083 = vst [vmem:[#allocation30_spill] sm:$0xff] %v10749_v47  ;;  %v10761_v46 = vsub.f32 %v12088_v32, %v10533_v36  ;;  %v10765_v14 = vsub.f32 %v12090_v17, %v10533_v36  ;;  %v12092_v8 = vld [vmem:[#allocation41_spill] sm:$0xff]  ;;  %v12094_v47 = vld [vmem:[#allocation46_spill] sm:$0xff]  ;;  %v10785_v17 = vsub.f32 %v10517_v41, %v10533_v36 }
 0x73e   :  { %12085 = vst [vmem:[#allocation32_spill] sm:$0xff] %v10753_v6  ;;  %12087 = vst [vmem:[#allocation34_spill] sm:$0xff] %v10757_v33  ;;  %v10769_v54 = vsub.f32 %v12092_v8, %v10533_v36  ;;  %v10773_v18 = vsub.f32 %v12094_v47, %v10533_v36  ;;  %v12096_v6 = vld [vmem:[#allocation49_spill] sm:$0xff]  ;;  %v12098_v33 = vld [vmem:[#allocation47_spill] sm:$0xff]  ;;  %v10789_v8 = vsub.f32 %v10523_v38, %v10533_v36 }
 0x73f   :  { %12089 = vst [vmem:[#allocation42_spill] sm:$0xff] %v10761_v46  ;;  %12091 = vst [vmem:[#allocation21_spill] sm:$0xff] %v10765_v14  ;;  %v10777_v27 = vsub.f32 %v12096_v6, %v10533_v36  ;;  %v10781_v32 = vsub.f32 %v12098_v33, %v10533_v36  ;;  %v5298_v47 = vmul.f32 %v10537_v42, %v10537_v42 }
 0x740   :  { %12093 = vst [vmem:[#allocation36_spill] sm:$0xff] %v10769_v54  ;;  %12095 = vst [vmem:[#allocation43_spill] sm:$0xff] %v10773_v18  ;;  %v5299_v18 = vmul.f32 %v10541_v45, %v10541_v45  ;;  %v5300_v6 = vmul.f32 %v10545_v48, %v10545_v48  ;;  %v5301_v33 = vmul.f32 %v10549_v22, %v10549_v22 }
 0x741   :  { %12097 = vst [vmem:[#allocation38_spill] sm:$0xff] %v10777_v27  ;;  %12099 = vst [vmem:[#allocation40_spill] sm:$0xff] %v10781_v32  ;;  %v5362_v32 = vsel %vm509_vm6, %v5298_v47, 0.0  ;;  %v5302_v38 = vmul.f32 %v10553_v35, %v10553_v35  ;;  %v5303_v45 = vmul.f32 %v10557_v56, %v10557_v56  ;;  %v5304_v22 = vmul.f32 %v10561_v52, %v10561_v52 }
 0x742   :  { %12100 = vst [vmem:[#allocation22_spill] sm:$0xff] %v10785_v17  ;;  %12101 = vst [vmem:[#allocation39_spill] sm:$0xff] %v10789_v8  ;;  %v5363_v41 = vsel %vm509_vm6, %v5299_v18, 0.0  ;;  %v5365_v36 = vsel %vm509_vm6, %v5300_v6, 0.0  ;;  %v5367_v8 = vsel %vm509_vm6, %v5301_v33, 0.0  ;;  %v5305_v18 = vmul.f32 %v10565_v1, %v10565_v1 }
 0x743   :  { %v5364_v17 = vadd.f32 %v5363_v41, %v5362_v32  ;;  %v5369_v47 = vsel %vm509_vm6, %v5302_v38, 0.0  ;;  %v5371_v32 = vsel %vm509_vm6, %v5303_v45, 0.0  ;;  %v5373_v6 = vsel %vm509_vm6, %v5304_v22, 0.0 }
 0x744   :  { %v5309_v45 = vmul.f32 %v10581_v55, %v10581_v55  ;;  %v5310_v22 = vmul.f32 %v10585_v3, %v10585_v3 }
 0x745   :  { %v5366_v42 = vadd.f32 %v5365_v36, %v5364_v17  ;;  %v5306_v17 = vmul.f32 %v10569_v28, %v10569_v28 }
 0x747   :  { %v5368_v48 = vadd.f32 %v5367_v8, %v5366_v42  ;;  %v5307_v42 = vmul.f32 %v10573_v15, %v10573_v15  ;;  %v5375_v8 = vsel %vm509_vm6, %v5305_v18, 0.0  ;;  %v5377_v38 = vsel %vm509_vm6, %v5306_v17, 0.0 }
 0x748   :  { %v5311_v18 = vmul.f32 %v10589_v5, %v10589_v5  ;;  %v5312_v17 = vmul.f32 %v10593_v62, %v10593_v62 }
 0x749   :  { %v5370_v27 = vadd.f32 %v5369_v47, %v5368_v48  ;;  %v5308_v48 = vmul.f32 %v10577_v63, %v10577_v63 }
 0x74b   :  { %v5372_v41 = vadd.f32 %v5371_v32, %v5370_v27  ;;  %v5379_v27 = vsel %vm509_vm6, %v5307_v42, 0.0  ;;  %v5313_v42 = vmul.f32 %v10597_v10, %v10597_v10 }
 0x74d   :  { %v5374_v36 = vadd.f32 %v5373_v6, %v5372_v41  ;;  %v5381_v41 = vsel %vm509_vm6, %v5308_v48, 0.0  ;;  %v5314_v48 = vmul.f32 %v10601_v19, %v10601_v19 }
 0x74f   :  { %v5376_v33 = vadd.f32 %v5375_v8, %v5374_v36  ;;  %v5383_v36 = vsel %vm509_vm6, %v5309_v45, 0.0  ;;  %v5315_v45 = vmul.f32 %v10605_v0, %v10605_v0 }
 0x751   :  { %v5378_v47 = vadd.f32 %v5377_v38, %v5376_v33  ;;  %v5385_v33 = vsel %vm509_vm6, %v5310_v22, 0.0  ;;  %v5316_v22 = vmul.f32 %v10609_v25, %v10609_v25 }
 0x753   :  { %v5380_v32 = vadd.f32 %v5379_v27, %v5378_v47  ;;  %v5387_v47 = vsel %vm509_vm6, %v5311_v18, 0.0  ;;  %v5317_v18 = vmul.f32 %v10613_v59, %v10613_v59 }
 0x755   :  { %v5382_v6 = vadd.f32 %v5381_v41, %v5380_v32  ;;  %v5389_v32 = vsel %vm509_vm6, %v5312_v17, 0.0  ;;  %v5318_v17 = vmul.f32 %v10617_v43, %v10617_v43 }
 0x757   :  { %v5384_v8 = vadd.f32 %v5383_v36, %v5382_v6  ;;  %v5391_v6 = vsel %vm509_vm6, %v5313_v42, 0.0  ;;  %v5319_v42 = vmul.f32 %v10621_v31, %v10621_v31 }
 0x759   :  { %v5386_v38 = vadd.f32 %v5385_v33, %v5384_v8  ;;  %v5393_v8 = vsel %vm509_vm6, %v5314_v48, 0.0  ;;  %v5320_v48 = vmul.f32 %v10625_v9, %v10625_v9 }
 0x75b   :  { %v5388_v27 = vadd.f32 %v5387_v47, %v5386_v38  ;;  %v5395_v38 = vsel %vm509_vm6, %v5315_v45, 0.0  ;;  %v5321_v45 = vmul.f32 %v10629_v37, %v10629_v37 }
 0x75d   :  { %v5390_v41 = vadd.f32 %v5389_v32, %v5388_v27  ;;  %v5397_v27 = vsel %vm509_vm6, %v5316_v22, 0.0  ;;  %v5322_v22 = vmul.f32 %v10633_v57, %v10633_v57 }
 0x75f   :  { %v5392_v36 = vadd.f32 %v5391_v6, %v5390_v41  ;;  %v5399_v41 = vsel %vm509_vm6, %v5317_v18, 0.0  ;;  %v5323_v18 = vmul.f32 %v10637_v20, %v10637_v20 }
 0x761   :  { %v5394_v33 = vadd.f32 %v5393_v8, %v5392_v36  ;;  %v5401_v36 = vsel %vm509_vm6, %v5318_v17, 0.0  ;;  %v5324_v17 = vmul.f32 %v10641_v16, %v10641_v16 }
 0x763   :  { %v5396_v47 = vadd.f32 %v5395_v38, %v5394_v33  ;;  %v5403_v33 = vsel %vm509_vm6, %v5319_v42, 0.0  ;;  %v5325_v42 = vmul.f32 %v10645_v4, %v10645_v4 }
 0x765   :  { %v5398_v32 = vadd.f32 %v5397_v27, %v5396_v47  ;;  %v5405_v47 = vsel %vm509_vm6, %v5320_v48, 0.0  ;;  %v5326_v48 = vmul.f32 %v10649_v2, %v10649_v2 }
 0x767   :  { %v5400_v6 = vadd.f32 %v5399_v41, %v5398_v32  ;;  %v5407_v32 = vsel %vm509_vm6, %v5321_v45, 0.0  ;;  %v5327_v45 = vmul.f32 %v10653_v24, %v10653_v24 }
 0x769   :  { %v5402_v8 = vadd.f32 %v5401_v36, %v5400_v6  ;;  %v5409_v6 = vsel %vm509_vm6, %v5322_v22, 0.0  ;;  %v5328_v22 = vmul.f32 %v10657_v11, %v10657_v11 }
 0x76b   :  { %v5404_v38 = vadd.f32 %v5403_v33, %v5402_v8  ;;  %v5411_v8 = vsel %vm509_vm6, %v5323_v18, 0.0  ;;  %v5329_v18 = vmul.f32 %v10661_v51, %v10661_v51 }
 0x76d   :  { %v5406_v27 = vadd.f32 %v5405_v47, %v5404_v38  ;;  %v5413_v38 = vsel %vm509_vm6, %v5324_v17, 0.0  ;;  %v5330_v17 = vmul.f32 %v10665_v23, %v10665_v23 }
 0x76f   :  { %v5408_v41 = vadd.f32 %v5407_v32, %v5406_v27  ;;  %v5415_v27 = vsel %vm509_vm6, %v5325_v42, 0.0  ;;  %v5331_v42 = vmul.f32 %v10669_v58, %v10669_v58 }
 0x771   :  { %v5410_v36 = vadd.f32 %v5409_v6, %v5408_v41  ;;  %v5417_v41 = vsel %vm509_vm6, %v5326_v48, 0.0  ;;  %v5332_v48 = vmul.f32 %v10673_v34, %v10673_v34 }
 0x773   :  { %v5412_v33 = vadd.f32 %v5411_v8, %v5410_v36  ;;  %v5419_v36 = vsel %vm509_vm6, %v5327_v45, 0.0  ;;  %v5333_v45 = vmul.f32 %v10677_v30, %v10677_v30 }
 0x775   :  { %v5414_v47 = vadd.f32 %v5413_v38, %v5412_v33  ;;  %v5421_v33 = vsel %vm509_vm6, %v5328_v22, 0.0  ;;  %v5334_v22 = vmul.f32 %v10681_v40, %v10681_v40 }
 0x777   :  { %v5416_v32 = vadd.f32 %v5415_v27, %v5414_v47  ;;  %v5423_v47 = vsel %vm509_vm6, %v5329_v18, 0.0  ;;  %v5335_v18 = vmul.f32 %v10685_v39, %v10685_v39 }
 0x779   :  { %v5418_v6 = vadd.f32 %v5417_v41, %v5416_v32  ;;  %v5425_v32 = vsel %vm509_vm6, %v5330_v17, 0.0  ;;  %v5336_v17 = vmul.f32 %v10689_v53, %v10689_v53 }
 0x77b   :  { %v5420_v8 = vadd.f32 %v5419_v36, %v5418_v6  ;;  %v5427_v6 = vsel %vm509_vm6, %v5331_v42, 0.0  ;;  %v5337_v42 = vmul.f32 %v10693_v61, %v10693_v61 }
 0x77d   :  { %v5422_v38 = vadd.f32 %v5421_v33, %v5420_v8  ;;  %v5429_v8 = vsel %vm509_vm6, %v5332_v48, 0.0  ;;  %v5338_v48 = vmul.f32 %v10697_v21, %v10697_v21 }
 0x77f   :  { %v5424_v27 = vadd.f32 %v5423_v47, %v5422_v38  ;;  %v5431_v38 = vsel %vm509_vm6, %v5333_v45, 0.0  ;;  %v5339_v45 = vmul.f32 %v10701_v13, %v10701_v13 }
 0x781   :  { %v5426_v41 = vadd.f32 %v5425_v32, %v5424_v27  ;;  %v5433_v27 = vsel %vm509_vm6, %v5334_v22, 0.0  ;;  %v5340_v22 = vmul.f32 %v10705_v60, %v10705_v60 }
 0x783   :  { %v5428_v36 = vadd.f32 %v5427_v6, %v5426_v41  ;;  %v5435_v41 = vsel %vm509_vm6, %v5335_v18, 0.0  ;;  %v5341_v18 = vmul.f32 %v10709_v44, %v10709_v44 }
 0x785   :  { %v5430_v33 = vadd.f32 %v5429_v8, %v5428_v36  ;;  %v5437_v36 = vsel %vm509_vm6, %v5336_v17, 0.0  ;;  %v5342_v17 = vmul.f32 %v10713_v26, %v10713_v26 }
 0x787   :  { %v5432_v47 = vadd.f32 %v5431_v38, %v5430_v33  ;;  %v5439_v33 = vsel %vm509_vm6, %v5337_v42, 0.0  ;;  %v5343_v42 = vmul.f32 %v10717_v29, %v10717_v29 }
 0x789   :  { %v5434_v32 = vadd.f32 %v5433_v27, %v5432_v47  ;;  %v5441_v47 = vsel %vm509_vm6, %v5338_v48, 0.0  ;;  %v5344_v48 = vmul.f32 %v10721_v49, %v10721_v49 }
 0x78b   :  { %v5436_v6 = vadd.f32 %v5435_v41, %v5434_v32  ;;  %v5443_v32 = vsel %vm509_vm6, %v5339_v45, 0.0  ;;  %v5345_v45 = vmul.f32 %v10725_v12, %v10725_v12 }
 0x78d   :  { %v5438_v8 = vadd.f32 %v5437_v36, %v5436_v6  ;;  %v5445_v6 = vsel %vm509_vm6, %v5340_v22, 0.0  ;;  %v5346_v22 = vmul.f32 %v10729_v7, %v10729_v7 }
 0x78f   :  { %v5440_v38 = vadd.f32 %v5439_v33, %v5438_v8  ;;  %v5447_v8 = vsel %vm509_vm6, %v5341_v18, 0.0  ;;  %v5347_v18 = vmul.f32 %v10733_v50, %v10733_v50 }
 0x791   :  { %v5442_v27 = vadd.f32 %v5441_v47, %v5440_v38  ;;  %v5449_v38 = vsel %vm509_vm6, %v5342_v17, 0.0  ;;  %v12102_v17 = vld [vmem:[#allocation33_spill] sm:$0xff] }
 0x793   :  { %v5444_v41 = vadd.f32 %v5443_v32, %v5442_v27  ;;  %v5451_v27 = vsel %vm509_vm6, %v5343_v42, 0.0  ;;  %v12103_v42 = vld [vmem:[#allocation35_spill] sm:$0xff] }
 0x795   :  { %v5446_v36 = vadd.f32 %v5445_v6, %v5444_v41  ;;  %v5453_v41 = vsel %vm509_vm6, %v5344_v48, 0.0  ;;  %v12104_v48 = vld [vmem:[#allocation44_spill] sm:$0xff] }
 0x797   :  { %v5448_v33 = vadd.f32 %v5447_v8, %v5446_v36  ;;  %v5455_v36 = vsel %vm509_vm6, %v5345_v45, 0.0  ;;  %v12105_v45 = vld [vmem:[#allocation30_spill] sm:$0xff] }
 0x799   :  { %v5450_v47 = vadd.f32 %v5449_v38, %v5448_v33  ;;  %v5348_v33 = vmul.f32 %v12102_v17, %v12102_v17  ;;  %v5457_v38 = vsel %vm509_vm6, %v5346_v22, 0.0  ;;  %v12106_v22 = vld [vmem:[#allocation32_spill] sm:$0xff] }
 0x79b   :  { %v5452_v32 = vadd.f32 %v5451_v27, %v5450_v47  ;;  %v5349_v47 = vmul.f32 %v12103_v42, %v12103_v42  ;;  %v5459_v27 = vsel %vm509_vm6, %v5347_v18, 0.0  ;;  %v12107_v18 = vld [vmem:[#allocation34_spill] sm:$0xff] }
 0x79d   :  { %v5454_v6 = vadd.f32 %v5453_v41, %v5452_v32  ;;  %v5350_v32 = vmul.f32 %v12104_v48, %v12104_v48  ;;  %v5461_v41 = vsel %vm509_vm6, %v5348_v33, 0.0 }
 0x79f   :  { %v5456_v8 = vadd.f32 %v5455_v36, %v5454_v6  ;;  %v5351_v6 = vmul.f32 %v12105_v45, %v12105_v45  ;;  %v5463_v36 = vsel %vm509_vm6, %v5349_v47, 0.0 }
 0x7a1   :  { %v5458_v12 = vadd.f32 %v5457_v38, %v5456_v8  ;;  %v5352_v8 = vmul.f32 %v12106_v22, %v12106_v22  ;;  %v5465_v38 = vsel %vm509_vm6, %v5350_v32, 0.0 }
 0x7a3   :  { %v5460_v7 = vadd.f32 %v5459_v27, %v5458_v12  ;;  %v5353_v12 = vmul.f32 %v12107_v18, %v12107_v18  ;;  %v5467_v27 = vsel %vm509_vm6, %v5351_v6, 0.0  ;;  %v5469_v33 = vsel %vm509_vm6, %v5352_v8, 0.0  ;;  %v12108_v6 = vld [vmem:[#allocation43_spill] sm:$0xff]  ;;  %v12109_v8 = vld [vmem:[#allocation38_spill] sm:$0xff] }
 0x7a5   :  { %v5462_v50 = vadd.f32 %v5461_v41, %v5460_v7  ;;  %v5354_v7 = vmul.f32 %v10761_v46, %v10761_v46  ;;  %v5471_v47 = vsel %vm509_vm6, %v5353_v12, 0.0  ;;  %v12110_v12 = vld [vmem:[#allocation40_spill] sm:$0xff] }
 0x7a7   :  { %v5464_v17 = vadd.f32 %v5463_v36, %v5462_v50  ;;  %v5355_v50 = vmul.f32 %v10765_v14, %v10765_v14  ;;  %v5473_v32 = vsel %vm509_vm6, %v5354_v7, 0.0  ;;  %v12111_v7 = vld [vmem:[#allocation22_spill] sm:$0xff] }
 0x7a9   :  { %v5466_v42 = vadd.f32 %v5465_v38, %v5464_v17  ;;  %v5356_v17 = vmul.f32 %v10769_v54, %v10769_v54 }
 0x7ab   :  { %v5468_v48 = vadd.f32 %v5467_v27, %v5466_v42  ;;  %v5357_v42 = vmul.f32 %v12108_v6, %v12108_v6  ;;  %v5475_v27 = vsel %vm509_vm6, %v5355_v50, 0.0  ;;  %v12112_v50 = vld [vmem:[#allocation39_spill] sm:$0xff] }
 0x7ad   :  { %v5470_v41 = vadd.f32 %v5469_v33, %v5468_v48  ;;  %v5358_v48 = vmul.f32 %v12109_v8, %v12109_v8  ;;  %v5477_v33 = vsel %vm509_vm6, %v5356_v17, 0.0 }
 0x7af   :  { %v5472_v36 = vadd.f32 %v5471_v47, %v5470_v41  ;;  %v5359_v41 = vmul.f32 %v12110_v12, %v12110_v12  ;;  %v5479_v47 = vsel %vm509_vm6, %v5357_v42, 0.0 }
 0x7b1   :  { %v5474_v38 = vadd.f32 %v5473_v32, %v5472_v36  ;;  %v5360_v36 = vmul.f32 %v12111_v7, %v12111_v7  ;;  %v5481_v32 = vsel %vm509_vm6, %v5358_v48, 0.0 }
 0x7b3   :  { %v5476_v46 = vadd.f32 %v5475_v27, %v5474_v38  ;;  %v5361_v38 = vmul.f32 %v12112_v50, %v12112_v50  ;;  %v5483_v27 = vsel %vm509_vm6, %v5359_v41, 0.0  ;;  %v12113_v41 = vld [vmem:[#allocation37_spill] sm:$0xff] }
 0x7b5   :  { %v5478_v14 = vadd.f32 %v5477_v33, %v5476_v46  ;;  %v5485_v46 = vsel %vm509_vm6, %v5360_v36, 0.0  ;;  %v5487_v33 = vsel %vm509_vm6, %v5361_v38, 0.0 }
 0x7b7   :  { %v5480_v54 = vadd.f32 %v5479_v47, %v5478_v14 }
 0x7b9   :  { %v5482_v6 = vadd.f32 %v5481_v32, %v5480_v54  ;;  %v5496_v32 = vld [vmem:[#allocation12] sm:$0x1] }
 0x7bb   :  { %v5484_v8 = vadd.f32 %v5483_v27, %v5482_v6  ;;  %v12114_v6 = vsub.s32 0, %v12113_v41  ;;  %v12119_v41 = vld [vmem:[#allocation31_spill] sm:$0xff] }
 0x7bd   :  { %v5486_v17 = vadd.f32 %v5485_v46, %v5484_v8  ;;  %v10987_v8 = vld [vmem:[#allocation14] ss:$0 sm:$0xff]  ;;  %v5702_v46 = vld [vmem:[#allocation3 + $0x1e8] sm:$0xff] }
 0x7bf   :  { %v5488_v18 = vadd.f32 %v5487_v33, %v5486_v17 }
 0x7c1   :  { %v5489_v42 = vrot.slane %v5488_v18, 4 }
 0x7c3   :  { %v5490_v14 = vadd.f32 %v5489_v42, %v5488_v18  ;;  %v12115_v18 = vld [vmem:[#allocation27_spill] sm:$0xff] }
 0x7c5   :  { %v5491_v47 = vrot.slane %v5490_v14, 2 }
 0x7c7   :  { %v5492_v22 = vadd.f32 %v5491_v47, %v5490_v14 }
 0x7c9   :  { %v5493_v7 = vrot.slane %v5492_v22, 1 }
 0x7cb   :  { %v5494_v45 = vadd.f32 %v5493_v7, %v5492_v22  ;;  %v12116_v22 = vld [vmem:[#allocation24_spill] sm:$0xff]  ;;  %v12117_v7 = vld [vmem:[#allocation23_spill] sm:$0xff] }
 0x7cd   :  { %v5495_v48 = vmul.f32 0.001953125, %v5494_v45 }
 0x7cf   :  { %v5497_v54 = vadd.f32 1e-05, %v5495_v48 }
 0x7d1   :  { %6994 = vrsqrt.f32 %v5497_v54 }
 0x7db   :  { %v6995_v50 = vpop.eup %6994 }
 0x7dc   :  { %v5499_v49 = vmul.f32 %v6995_v50, %v5496_v32 }
 0x7de   :  { %v10985_v27 = vrot.slane %v5499_v49, %v12114_v6  ;;  %v12118_v49 = vld [vmem:[#allocation25_spill] sm:$0xff]  ;;  %v12120_v6 = vld [vmem:[#allocation28_spill] sm:$0xff] }
 0x7e0   :  { %v5567_v36 = vmul.f32 %v10985_v27, %v12110_v12  ;;  %v10993_v38 = vmul.f32 %v10985_v27, %v12115_v18  ;;  %v10997_v45 = vmul.f32 %v10985_v27, %v12116_v22  ;;  %v11001_v50 = vmul.f32 %v10985_v27, %v12117_v7  ;;  %v12122_v18 = vld [vmem:[#allocation29_spill] sm:$0xff]  ;;  %v12124_v7 = vld [vmem:[#allocation35_spill] sm:$0xff] }
 0x7e1   :  { %v11005_v17 = vmul.f32 %v10985_v27, %v12118_v49  ;;  %v11009_v12 = vmul.f32 %v10985_v27, %v10553_v35  ;;  %v11013_v33 = vmul.f32 %v10985_v27, %v10557_v56  ;;  %v11017_v42 = vmul.f32 %v10985_v27, %v10561_v52  ;;  %v12123_v22 = vld [vmem:[#allocation33_spill] sm:$0xff]  ;;  %v12126_v49 = vld [vmem:[#allocation44_spill] sm:$0xff] }
 0x7e2   :  { %v5638_v14 = vadd.f32 %v10987_v8, %v5567_v36  ;;  %v11022_v47 = vmul.f32 %v10985_v27, %v10565_v1  ;;  %v11026_v48 = vmul.f32 %v10985_v27, %v10569_v28  ;;  %v11030_v35 = vmul.f32 %v10985_v27, %v10573_v15  ;;  %v12121_v36 = vld [vmem:[#allocation26_spill] sm:$0xff] }
 0x7e3   :  { %v11034_v56 = vmul.f32 %v10985_v27, %v10577_v63  ;;  %v11038_v52 = vmul.f32 %v10985_v27, %v10581_v55  ;;  %v11042_v1 = vmul.f32 %v10985_v27, %v10585_v3  ;;  %v11046_v28 = vmul.f32 %v10985_v27, %v10589_v5 }
 0x7e4   :  { %v5766_v54 = vadd.f32 %v5702_v46, %v5638_v14  ;;  %v11050_v15 = vmul.f32 %v10985_v27, %v10593_v62  ;;  %v11054_v63 = vmul.f32 %v10985_v27, %v10597_v10  ;;  %v11058_v55 = vmul.f32 %v10985_v27, %v10601_v19 }
 0x7e5   :  { %v11062_v3 = vmul.f32 %v10985_v27, %v10605_v0  ;;  %v11066_v5 = vmul.f32 %v10985_v27, %v10609_v25  ;;  %v11070_v62 = vmul.f32 %v10985_v27, %v10613_v59  ;;  %v11074_v10 = vmul.f32 %v10985_v27, %v10617_v43 }
 0x7e6   :  { %v5830_v32 = vmax.f32 %v5766_v54, 0.0  ;;  %v11078_v19 = vmul.f32 %v10985_v27, %v10621_v31  ;;  %v11082_v0 = vmul.f32 %v10985_v27, %v10625_v9  ;;  %v11086_v25 = vmul.f32 %v10985_v27, %v10629_v37  ;;  %v12128_v54 = vld [vmem:[#allocation30_spill] sm:$0xff] }
 0x7e7   :  { %v11090_v59 = vmul.f32 %v10985_v27, %v10633_v57  ;;  %v11094_v43 = vmul.f32 %v10985_v27, %v10637_v20  ;;  %v11098_v31 = vmul.f32 %v10985_v27, %v10641_v16  ;;  %v11102_v9 = vmul.f32 %v10985_v27, %v10645_v4 }
 0x7e8   :  { %5894 = vst.msk [vmem:[#allocation15 + $0x1e8] sm:$0xff] %vm509_vm6, %v5830_v32  ;;  %v11107_v37 = vmul.f32 %v10985_v27, %v10649_v2  ;;  %v11111_v57 = vmul.f32 %v10985_v27, %v10653_v24  ;;  %v11115_v20 = vmul.f32 %v10985_v27, %v10657_v11  ;;  %v11119_v16 = vmul.f32 %v10985_v27, %v10661_v51 }
 0x7e9   :  { %v11123_v4 = vmul.f32 %v10985_v27, %v10665_v23  ;;  %v11127_v2 = vmul.f32 %v10985_v27, %v10669_v58  ;;  %v11131_v24 = vmul.f32 %v10985_v27, %v10673_v34  ;;  %v11135_v11 = vmul.f32 %v10985_v27, %v10677_v30 }
 0x7ea   :  { %v11139_v51 = vmul.f32 %v10985_v27, %v10681_v40  ;;  %v11143_v23 = vmul.f32 %v10985_v27, %v10685_v39  ;;  %v11147_v58 = vmul.f32 %v10985_v27, %v10689_v53  ;;  %v11151_v34 = vmul.f32 %v10985_v27, %v10693_v61 }
 0x7eb   :  { %v11155_v30 = vmul.f32 %v10985_v27, %v10697_v21  ;;  %v11159_v40 = vmul.f32 %v10985_v27, %v10701_v13  ;;  %v11163_v39 = vmul.f32 %v10985_v27, %v10705_v60  ;;  %v11167_v53 = vmul.f32 %v10985_v27, %v10709_v44 }
 0x7ec   :  { %v11171_v61 = vmul.f32 %v10985_v27, %v10713_v26  ;;  %v11175_v21 = vmul.f32 %v10985_v27, %v10717_v29  ;;  %v11179_v13 = vmul.f32 %v10985_v27, %v12119_v41  ;;  %v11183_v60 = vmul.f32 %v10985_v27, %v12120_v6  ;;  %v12130_v41 = vld [vmem:[#allocation32_spill] sm:$0xff] }
 0x7ed   :  { %v11187_v44 = vmul.f32 %v10985_v27, %v12121_v36  ;;  %v11191_v26 = vmul.f32 %v10985_v27, %v12122_v18  ;;  %v11195_v29 = vmul.f32 %v10985_v27, %v12123_v22  ;;  %v11199_v46 = vmul.f32 %v10985_v27, %v12124_v7  ;;  %v12132_v36 = vld [vmem:[#allocation34_spill] sm:$0xff] }
 0x7ee   :  { %v11203_v14 = vmul.f32 %v10985_v27, %v12126_v49  ;;  %v11207_v32 = vmul.f32 %v10985_v27, %v12128_v54  ;;  %v11211_v6 = vmul.f32 %v10985_v27, %v12130_v41  ;;  %v11215_v18 = vmul.f32 %v10985_v27, %v12132_v36  ;;  %v12134_v22 = vld [vmem:[#allocation42_spill] sm:$0xff] }
 0x7ef   :  { %12125 = vst [vmem:[#allocation45_spill] sm:$0xff] %v11199_v46  ;;  %v11219_v7 = vmul.f32 %v10985_v27, %v12134_v22  ;;  %v12136_v46 = vld [vmem:[#allocation21_spill] sm:$0xff] }
 0x7f0   :  { %12127 = vst [vmem:[#allocation48_spill] sm:$0xff] %v11203_v14  ;;  %12129 = vst [vmem:[#allocation41_spill] sm:$0xff] %v11207_v32  ;;  %v11223_v49 = vmul.f32 %v10985_v27, %v12136_v46  ;;  %v12137_v14 = vld [vmem:[#allocation36_spill] sm:$0xff]  ;;  %v12138_v32 = vld [vmem:[#allocation43_spill] sm:$0xff] }
 0x7f1   :  { %12131 = vst [vmem:[#allocation46_spill] sm:$0xff] %v11211_v6  ;;  %12133 = vst [vmem:[#allocation49_spill] sm:$0xff] %v11215_v18  ;;  %v11227_v54 = vmul.f32 %v10985_v27, %v12137_v14  ;;  %v11231_v41 = vmul.f32 %v10985_v27, %v12138_v32  ;;  %v12139_v6 = vld [vmem:[#allocation38_spill] sm:$0xff]  ;;  %v11247_v14 = vadd.f32 %v10987_v8, %v10993_v38 }
 0x7f2   :  { %12135 = vst [vmem:[#allocation47_spill] sm:$0xff] %v11219_v7  ;;  %v11235_v36 = vmul.f32 %v10985_v27, %v12139_v6  ;;  %v12140_v18 = vld [vmem:[#allocation22_spill] sm:$0xff]  ;;  %v12141_v7 = vld [vmem:[#allocation39_spill] sm:$0xff]  ;;  %v11251_v32 = vadd.f32 %v10987_v8, %v10997_v45  ;;  %v11255_v6 = vadd.f32 %v10987_v8, %v11001_v50  ;;  %v11267_v38 = vadd.f32 %v10987_v8, %v11013_v33 }
 0x7f3   :  { %v11239_v22 = vmul.f32 %v10985_v27, %v12140_v18  ;;  %v11243_v46 = vmul.f32 %v10985_v27, %v12141_v7  ;;  %v11259_v18 = vadd.f32 %v10987_v8, %v11005_v17  ;;  %v11263_v27 = vadd.f32 %v10987_v8, %v11009_v12  ;;  %v5643_v7 = vld [vmem:[#allocation3 + $0x10] sm:$0xff] }
 0x7f4   :  { %v11271_v45 = vadd.f32 %v10987_v8, %v11017_v42  ;;  %v11275_v50 = vadd.f32 %v10987_v8, %v11022_v47  ;;  %v11279_v17 = vadd.f32 %v10987_v8, %v11026_v48  ;;  %v11283_v12 = vadd.f32 %v10987_v8, %v11030_v35 }
 0x7f5   :  { %v11287_v33 = vadd.f32 %v10987_v8, %v11034_v56  ;;  %v11291_v42 = vadd.f32 %v10987_v8, %v11038_v52  ;;  %v11295_v47 = vadd.f32 %v10987_v8, %v11042_v1  ;;  %v11299_v48 = vadd.f32 %v10987_v8, %v11046_v28 }
 0x7f6   :  { %v11303_v35 = vadd.f32 %v10987_v8, %v11050_v15  ;;  %v11307_v56 = vadd.f32 %v10987_v8, %v11054_v63  ;;  %v11311_v52 = vadd.f32 %v10987_v8, %v11058_v55  ;;  %v11315_v1 = vadd.f32 %v10987_v8, %v11062_v3 }
 0x7f7   :  { %v11319_v28 = vadd.f32 %v10987_v8, %v11066_v5  ;;  %v11323_v15 = vadd.f32 %v10987_v8, %v11070_v62  ;;  %v11327_v63 = vadd.f32 %v10987_v8, %v11074_v10  ;;  %v11331_v55 = vadd.f32 %v10987_v8, %v11078_v19 }
 0x7f8   :  { %v11335_v3 = vadd.f32 %v10987_v8, %v11082_v0  ;;  %v11339_v5 = vadd.f32 %v10987_v8, %v11086_v25  ;;  %v11343_v62 = vadd.f32 %v10987_v8, %v11090_v59  ;;  %v11347_v10 = vadd.f32 %v10987_v8, %v11094_v43 }
 0x7f9   :  { %v11351_v19 = vadd.f32 %v10987_v8, %v11098_v31  ;;  %v11355_v0 = vadd.f32 %v10987_v8, %v11102_v9  ;;  %v11359_v25 = vadd.f32 %v10987_v8, %v11107_v37  ;;  %v11363_v59 = vadd.f32 %v10987_v8, %v11111_v57 }
 0x7fa   :  { %v11367_v43 = vadd.f32 %v10987_v8, %v11115_v20  ;;  %v11371_v31 = vadd.f32 %v10987_v8, %v11119_v16  ;;  %v11375_v9 = vadd.f32 %v10987_v8, %v11123_v4  ;;  %v11379_v37 = vadd.f32 %v10987_v8, %v11127_v2 }
 0x7fb   :  { %v11383_v57 = vadd.f32 %v10987_v8, %v11131_v24  ;;  %v11387_v20 = vadd.f32 %v10987_v8, %v11135_v11  ;;  %v11391_v16 = vadd.f32 %v10987_v8, %v11139_v51  ;;  %v11395_v4 = vadd.f32 %v10987_v8, %v11143_v23 }
 0x7fc   :  { %12142 = vst [vmem:[#allocation40_spill] sm:$0xff] %v11375_v9  ;;  %12143 = vst [vmem:[#allocation37_spill] sm:$0xff] %v11379_v37  ;;  %v11399_v2 = vadd.f32 %v10987_v8, %v11147_v58  ;;  %v11403_v24 = vadd.f32 %v10987_v8, %v11151_v34  ;;  %v11407_v11 = vadd.f32 %v10987_v8, %v11155_v30  ;;  %v5644_v30 = vld [vmem:[#allocation3 + $0x18] sm:$0xff]  ;;  %v5654_v37 = vld [vmem:[#allocation3 + $0x68] sm:$0xff] }
 0x7fd   :  { %12144 = vst [vmem:[#allocation27_spill] sm:$0xff] %v11383_v57  ;;  %12145 = vst [vmem:[#allocation24_spill] sm:$0xff] %v11387_v20  ;;  %v11411_v51 = vadd.f32 %v10987_v8, %v11159_v40  ;;  %v11415_v23 = vadd.f32 %v10987_v8, %v11163_v39  ;;  %v11419_v58 = vadd.f32 %v10987_v8, %v11167_v53  ;;  %v5653_v20 = vld [vmem:[#allocation3 + $0x60] sm:$0xff]  ;;  %v5656_v57 = vld [vmem:[#allocation3 + $0x78] sm:$0xff] }
 0x7fe   :  { %12146 = vst [vmem:[#allocation23_spill] sm:$0xff] %v11391_v16  ;;  %12147 = vst [vmem:[#allocation25_spill] sm:$0xff] %v11395_v4  ;;  %v11423_v34 = vadd.f32 %v10987_v8, %v11171_v61  ;;  %v11427_v40 = vadd.f32 %v10987_v8, %v11175_v21  ;;  %v11431_v39 = vadd.f32 %v10987_v8, %v11179_v13  ;;  %v5650_v4 = vld [vmem:[#allocation3 + $0x48] sm:$0xff]  ;;  %v12165_v16 = vld [vmem:[#allocation41_spill] sm:$0xff] }
 0x7ff   :  { %12148 = vst [vmem:[#allocation31_spill] sm:$0xff] %v11399_v2  ;;  %12149 = vst [vmem:[#allocation28_spill] sm:$0xff] %v11403_v24  ;;  %v5641_v24 = vld [vmem:[#allocation3] sm:$0xff]  ;;  %v11435_v53 = vadd.f32 %v10987_v8, %v11183_v60  ;;  %v11439_v61 = vadd.f32 %v10987_v8, %v11187_v44  ;;  %v11443_v21 = vadd.f32 %v10987_v8, %v11191_v26  ;;  %v5652_v2 = vld [vmem:[#allocation3 + $0x58] sm:$0xff] }
 0x800   :  { %12150 = vst [vmem:[#allocation26_spill] sm:$0xff] %v11407_v11  ;;  %12151 = vst [vmem:[#allocation29_spill] sm:$0xff] %v11411_v51  ;;  %v5642_v11 = vld [vmem:[#allocation3 + $0x8] sm:$0xff]  ;;  %v11447_v13 = vadd.f32 %v10987_v8, %v11195_v29  ;;  %v11459_v26 = vadd.f32 %v10987_v8, %v12165_v16  ;;  %v11475_v16 = vadd.f32 %v10987_v8, %v11223_v49 }
 0x801   :  { %12152 = vst [vmem:[#allocation33_spill] sm:$0xff] %v11415_v23  ;;  %12153 = vst [vmem:[#allocation35_spill] sm:$0xff] %v11419_v58  ;;  %v5645_v58 = vld [vmem:[#allocation3 + $0x20] sm:$0xff]  ;;  %v5648_v23 = vld [vmem:[#allocation3 + $0x38] sm:$0xff]  ;;  %v11491_v49 = vadd.f32 %v10987_v8, %v11239_v22  ;;  %v11504_v9 = vadd.f32 %v5643_v7, %v11255_v6  ;;  %v11507_v22 = vadd.f32 %v5644_v30, %v11259_v18 }
 0x802   :  { %12154 = vst [vmem:[#allocation44_spill] sm:$0xff] %v11423_v34  ;;  %12155 = vst [vmem:[#allocation30_spill] sm:$0xff] %v11427_v40  ;;  %v5647_v34 = vld [vmem:[#allocation3 + $0x30] sm:$0xff]  ;;  %v5646_v51 = vld [vmem:[#allocation3 + $0x28] sm:$0xff]  ;;  %v11525_v18 = vadd.f32 %v5650_v4, %v11283_v12  ;;  %v11531_v30 = vadd.f32 %v5652_v2, %v11291_v42 }
 0x803   :  { %12156 = vst [vmem:[#allocation32_spill] sm:$0xff] %v11431_v39  ;;  %12157 = vst [vmem:[#allocation34_spill] sm:$0xff] %v11435_v53  ;;  %v12161_v39 = vld [vmem:[#allocation45_spill] sm:$0xff]  ;;  %v12163_v53 = vld [vmem:[#allocation48_spill] sm:$0xff] }
 0x804   :  { %12158 = vst [vmem:[#allocation42_spill] sm:$0xff] %v11439_v61  ;;  %12159 = vst [vmem:[#allocation21_spill] sm:$0xff] %v11443_v21  ;;  %v11451_v60 = vadd.f32 %v10987_v8, %v12161_v39  ;;  %v11455_v44 = vadd.f32 %v10987_v8, %v12163_v53  ;;  %v5651_v61 = vld [vmem:[#allocation3 + $0x50] sm:$0xff]  ;;  %v5649_v40 = vld [vmem:[#allocation3 + $0x40] sm:$0xff] }
 0x805   :  { %12160 = vst [vmem:[#allocation36_spill] sm:$0xff] %v11447_v13  ;;  %12166 = vst [vmem:[#allocation22_spill] sm:$0xff] %v11459_v26  ;;  %v12167_v21 = vld [vmem:[#allocation46_spill] sm:$0xff]  ;;  %v12169_v13 = vld [vmem:[#allocation49_spill] sm:$0xff]  ;;  %v11522_v6 = vadd.f32 %v5649_v40, %v11279_v17  ;;  %v11528_v7 = vadd.f32 %v5651_v61, %v11287_v33  ;;  %v11543_v40 = vadd.f32 %v5656_v57, %v11307_v56 }
 0x806   :  { %12162 = vst [vmem:[#allocation43_spill] sm:$0xff] %v11451_v60  ;;  %12164 = vst [vmem:[#allocation38_spill] sm:$0xff] %v11455_v44  ;;  %v11463_v29 = vadd.f32 %v10987_v8, %v12167_v21  ;;  %v11467_v39 = vadd.f32 %v10987_v8, %v12169_v13  ;;  %v12171_v60 = vld [vmem:[#allocation47_spill] sm:$0xff]  ;;  %v5655_v44 = vld [vmem:[#allocation3 + $0x70] sm:$0xff]  ;;  %v11479_v21 = vadd.f32 %v10987_v8, %v11227_v54 }
 0x807   :  { %v11471_v53 = vadd.f32 %v10987_v8, %v12171_v60  ;;  %12173 = vst [vmem:[#allocation41_spill] sm:$0xff] %v11475_v16  ;;  %v11483_v13 = vadd.f32 %v10987_v8, %v11231_v41  ;;  %v11487_v60 = vadd.f32 %v10987_v8, %v11235_v36  ;;  %v5658_v26 = vld [vmem:[#allocation3 + $0x88] sm:$0xff]  ;;  %12177 = vst [vmem:[#allocation50_spill] sm:$0xff] %v11491_v49  ;;  %v5663_v36 = vld [vmem:[#allocation3 + $0xb0] sm:$0xff] }
 0x808   :  { %12168 = vst [vmem:[#allocation39_spill] sm:$0xff] %v11463_v29  ;;  %12170 = vst [vmem:[#allocation45_spill] sm:$0xff] %v11467_v39  ;;  %v5657_v39 = vld [vmem:[#allocation3 + $0x80] sm:$0xff]  ;;  %v5660_v29 = vld [vmem:[#allocation3 + $0x98] sm:$0xff]  ;;  %v11495_v54 = vadd.f32 %v10987_v8, %v11243_v46  ;;  %v11501_v41 = vadd.f32 %v5642_v11, %v11251_v32  ;;  %v11510_v49 = vadd.f32 %v5645_v58, %v11263_v27 }
 0x809   :  { %12172 = vst [vmem:[#allocation48_spill] sm:$0xff] %v11471_v53  ;;  %12174 = vst [vmem:[#allocation46_spill] sm:$0xff] %v11479_v21  ;;  %v5659_v53 = vld [vmem:[#allocation3 + $0x90] sm:$0xff]  ;;  %v11498_v21 = vadd.f32 %v5641_v24, %v11247_v14  ;;  %v5662_v16 = vld [vmem:[#allocation3 + $0xa8] sm:$0xff]  ;;  %v11513_v8 = vadd.f32 %v5646_v51, %v11267_v38  ;;  %v11516_v11 = vadd.f32 %v5647_v34, %v11271_v45 }
 0x80a   :  { %12175 = vst [vmem:[#allocation49_spill] sm:$0xff] %v11483_v13  ;;  %12176 = vst [vmem:[#allocation47_spill] sm:$0xff] %v11487_v60  ;;  %v5661_v60 = vld [vmem:[#allocation3 + $0xa0] sm:$0xff]  ;;  %v5664_v13 = vld [vmem:[#allocation3 + $0xb8] sm:$0xff]  ;;  %v11534_v45 = vadd.f32 %v5653_v20, %v11295_v47  ;;  %v11540_v34 = vadd.f32 %v5655_v44, %v11303_v35  ;;  %v11546_v33 = vadd.f32 %v5657_v39, %v11311_v52 }
 0x80b   :  { %12178 = vst [vmem:[#allocation51_spill] sm:$0xff] %v11501_v41  ;;  %v5667_v46 = vld [vmem:[#allocation3 + $0xd0] sm:$0xff]  ;;  %v5665_v14 = vld [vmem:[#allocation3 + $0xc0] sm:$0xff]  ;;  %v5668_v32 = vld [vmem:[#allocation3 + $0xd8] sm:$0xff]  ;;  %v11519_v41 = vadd.f32 %v5648_v23, %v11275_v50  ;;  %v11537_v50 = vadd.f32 %v5654_v37, %v11299_v48  ;;  %v11549_v42 = vadd.f32 %v5658_v26, %v11315_v1  ;;  %v11552_v2 = vadd.f32 %v5659_v53, %v11319_v28 }
 0x80c   :  { %v5666_v24 = vld [vmem:[#allocation3 + $0xc8] sm:$0xff]  ;;  %v5671_v27 = vld [vmem:[#allocation3 + $0xf0] sm:$0xff]  ;;  %v5669_v58 = vld [vmem:[#allocation3 + $0xe0] sm:$0xff]  ;;  %v11555_v61 = vadd.f32 %v5660_v29, %v11323_v15  ;;  %v11558_v35 = vadd.f32 %v5661_v60, %v11327_v63  ;;  %v11561_v56 = vadd.f32 %v5662_v16, %v11331_v55  ;;  %v11564_v26 = vadd.f32 %v5663_v36, %v11335_v3 }
 0x80d   :  { %v5672_v38 = vld [vmem:[#allocation3 + $0xf8] sm:$0xff]  ;;  %v5670_v51 = vld [vmem:[#allocation3 + $0xe8] sm:$0xff]  ;;  %v5675_v17 = vld [vmem:[#allocation3 + $0x110] sm:$0xff]  ;;  %v11567_v39 = vadd.f32 %v5664_v13, %v11339_v5  ;;  %v11570_v28 = vadd.f32 %v5665_v14, %v11343_v62  ;;  %v11573_v15 = vadd.f32 %v5666_v24, %v11347_v10  ;;  %v11576_v53 = vadd.f32 %v5667_v46, %v11351_v19 }
 0x80e   :  { %v5673_v23 = vld [vmem:[#allocation3 + $0x100] sm:$0xff]  ;;  %v5676_v12 = vld [vmem:[#allocation3 + $0x118] sm:$0xff]  ;;  %v5674_v4 = vld [vmem:[#allocation3 + $0x108] sm:$0xff]  ;;  %v11579_v16 = vadd.f32 %v5668_v32, %v11355_v0  ;;  %v11582_v3 = vadd.f32 %v5669_v58, %v11359_v25  ;;  %v11585_v5 = vadd.f32 %v5670_v51, %v11363_v59  ;;  %v11588_v10 = vadd.f32 %v5671_v27, %v11367_v43 }
 0x80f   :  { %v5679_v47 = vld [vmem:[#allocation3 + $0x130] sm:$0xff]  ;;  %v5677_v20 = vld [vmem:[#allocation3 + $0x120] sm:$0xff]  ;;  %v5680_v48 = vld [vmem:[#allocation3 + $0x138] sm:$0xff]  ;;  %v11591_v36 = vadd.f32 %v5672_v38, %v11371_v31 }
 0x810   :  { %v5678_v37 = vld [vmem:[#allocation3 + $0x128] sm:$0xff]  ;;  %v5683_v52 = vld [vmem:[#allocation3 + $0x150] sm:$0xff]  ;;  %v5681_v57 = vld [vmem:[#allocation3 + $0x140] sm:$0xff]  ;;  %12179 = vst [vmem:[#allocation52_spill] sm:$0xff] %v11585_v5 }
 0x811   :  { %v5684_v1 = vld [vmem:[#allocation3 + $0x158] sm:$0xff]  ;;  %v5682_v44 = vld [vmem:[#allocation3 + $0x148] sm:$0xff]  ;;  %v5687_v63 = vld [vmem:[#allocation3 + $0x170] sm:$0xff]  ;;  %12180 = vst [vmem:[#allocation53_spill] sm:$0xff] %v11591_v36 }
 0x812   :  { %v5685_v29 = vld [vmem:[#allocation3 + $0x160] sm:$0xff]  ;;  %v5688_v55 = vld [vmem:[#allocation3 + $0x178] sm:$0xff]  ;;  %v5686_v62 = vld [vmem:[#allocation3 + $0x168] sm:$0xff] }
 0x813   :  { %v5691_v13 = vld [vmem:[#allocation3 + $0x190] sm:$0xff]  ;;  %v5689_v60 = vld [vmem:[#allocation3 + $0x180] sm:$0xff]  ;;  %v12183_v0 = vld [vmem:[#allocation37_spill] sm:$0xff] }
 0x814   :  { %v12181_v19 = vld [vmem:[#allocation40_spill] sm:$0xff]  ;;  %v11597_v14 = vadd.f32 %v5674_v4, %v12183_v0  ;;  %v5692_v25 = vld [vmem:[#allocation3 + $0x198] sm:$0xff]  ;;  %v5690_v32 = vld [vmem:[#allocation3 + $0x188] sm:$0xff] }
 0x815   :  { %v11594_v46 = vadd.f32 %v5673_v23, %v12181_v19  ;;  %v5695_v24 = vld [vmem:[#allocation3 + $0x1b0] sm:$0xff]  ;;  %v12185_v59 = vld [vmem:[#allocation27_spill] sm:$0xff]  ;;  %v12190_v31 = vld [vmem:[#allocation25_spill] sm:$0xff] }
 0x816   :  { %12184 = vst [vmem:[#allocation37_spill] sm:$0xff] %v11597_v14  ;;  %v11600_v58 = vadd.f32 %v5675_v17, %v12185_v59  ;;  %v12186_v51 = vld [vmem:[#allocation24_spill] sm:$0xff]  ;;  %v12188_v43 = vld [vmem:[#allocation23_spill] sm:$0xff]  ;;  %v11609_v38 = vadd.f32 %v5678_v37, %v12190_v31  ;;  %v5693_v23 = vld [vmem:[#allocation3 + $0x1a0] sm:$0xff] }
 0x817   :  { %12182 = vst [vmem:[#allocation40_spill] sm:$0xff] %v11594_v46  ;;  %v11603_v5 = vadd.f32 %v5676_v12, %v12186_v51  ;;  %v11606_v27 = vadd.f32 %v5677_v20, %v12188_v43  ;;  %v5696_v19 = vld [vmem:[#allocation3 + $0x1b8] sm:$0xff]  ;;  %v5694_v46 = vld [vmem:[#allocation3 + $0x1a8] sm:$0xff]  ;;  %v12193_v14 = vld [vmem:[#allocation28_spill] sm:$0xff] }
 0x818   :  { %12191 = vst [vmem:[#allocation23_spill] sm:$0xff] %v11609_v38  ;;  %v12192_v4 = vld [vmem:[#allocation31_spill] sm:$0xff]  ;;  %v11615_v36 = vadd.f32 %v5680_v48, %v12193_v14  ;;  %v12195_v17 = vld [vmem:[#allocation26_spill] sm:$0xff]  ;;  %v12197_v12 = vld [vmem:[#allocation29_spill] sm:$0xff] }
 0x819   :  { %12187 = vst [vmem:[#allocation27_spill] sm:$0xff] %v11603_v5  ;;  %12189 = vst [vmem:[#allocation24_spill] sm:$0xff] %v11606_v27  ;;  %v11612_v0 = vadd.f32 %v5679_v47, %v12192_v4  ;;  %v11618_v59 = vadd.f32 %v5681_v57, %v12195_v17  ;;  %v11621_v51 = vadd.f32 %v5682_v44, %v12197_v12  ;;  %v5699_v20 = vld [vmem:[#allocation3 + $0x1d0] sm:$0xff]  ;;  %v5697_v43 = vld [vmem:[#allocation3 + $0x1c0] sm:$0xff] }
 0x81a   :  { %12194 = vst [vmem:[#allocation25_spill] sm:$0xff] %v11615_v36  ;;  %v5698_v27 = vld [vmem:[#allocation3 + $0x1c8] sm:$0xff]  ;;  %v12199_v37 = vld [vmem:[#allocation33_spill] sm:$0xff]  ;;  %v12202_v47 = vld [vmem:[#allocation44_spill] sm:$0xff] }
 0x81b   :  { %12196 = vst [vmem:[#allocation31_spill] sm:$0xff] %v11618_v59  ;;  %12198 = vst [vmem:[#allocation28_spill] sm:$0xff] %v11621_v51  ;;  %v11624_v31 = vadd.f32 %v5683_v52, %v12199_v37  ;;  %v12200_v38 = vld [vmem:[#allocation35_spill] sm:$0xff]  ;;  %v11630_v4 = vadd.f32 %v5685_v29, %v12202_v47  ;;  %v12204_v48 = vld [vmem:[#allocation30_spill] sm:$0xff] }
 0x81c   :  { %v11627_v5 = vadd.f32 %v5684_v1, %v12200_v38  ;;  %v11633_v14 = vadd.f32 %v5686_v62, %v12204_v48  ;;  %v5700_v57 = vld [vmem:[#allocation3 + $0x1d8] sm:$0xff]  ;;  %v5703_v17 = vld [vmem:[#allocation3 + $0x1f0] sm:$0xff]  ;;  %v5701_v59 = vld [vmem:[#allocation3 + $0x1e0] sm:$0xff] }
 0x81d   :  { %12203 = vst [vmem:[#allocation29_spill] sm:$0xff] %v11630_v4  ;;  %v12206_v44 = vld [vmem:[#allocation32_spill] sm:$0xff]  ;;  %v12207_v51 = vld [vmem:[#allocation34_spill] sm:$0xff]  ;;  %v12209_v1 = vld [vmem:[#allocation21_spill] sm:$0xff] }
 0x81e   :  { %12201 = vst [vmem:[#allocation26_spill] sm:$0xff] %v11627_v5  ;;  %12205 = vst [vmem:[#allocation33_spill] sm:$0xff] %v11633_v14  ;;  %v11636_v12 = vadd.f32 %v5687_v63, %v12206_v44  ;;  %v11639_v36 = vadd.f32 %v5688_v55, %v12207_v51  ;;  %v12208_v52 = vld [vmem:[#allocation42_spill] sm:$0xff]  ;;  %v11645_v38 = vadd.f32 %v5690_v32, %v12209_v1  ;;  %v5704_v29 = vld [vmem:[#allocation3 + $0x1f8] sm:$0xff] }
 0x81f   :  { %v11642_v37 = vadd.f32 %v5689_v60, %v12208_v52  ;;  %v12210_v47 = vld [vmem:[#allocation36_spill] sm:$0xff]  ;;  %v12211_v62 = vld [vmem:[#allocation43_spill] sm:$0xff]  ;;  %v12212_v14 = vld [vmem:[#allocation38_spill] sm:$0xff] }
 0x820   :  { %v11648_v4 = vadd.f32 %v5691_v13, %v12210_v47  ;;  %v11651_v48 = vadd.f32 %v5692_v25, %v12211_v62  ;;  %v11654_v5 = vadd.f32 %v5693_v23, %v12212_v14  ;;  %v12213_v63 = vld [vmem:[#allocation22_spill] sm:$0xff]  ;;  %v12214_v55 = vld [vmem:[#allocation39_spill] sm:$0xff]  ;;  %v12215_v60 = vld [vmem:[#allocation45_spill] sm:$0xff] }
 0x821   :  { %v11657_v44 = vadd.f32 %v5694_v46, %v12213_v63  ;;  %v11660_v51 = vadd.f32 %v5695_v24, %v12214_v55  ;;  %v11663_v52 = vadd.f32 %v5696_v19, %v12215_v60  ;;  %v12216_v32 = vld [vmem:[#allocation48_spill] sm:$0xff]  ;;  %v12217_v13 = vld [vmem:[#allocation41_spill] sm:$0xff]  ;;  %v12218_v25 = vld [vmem:[#allocation46_spill] sm:$0xff]  ;;  %v11684_v19 = vadd.f32 %v5704_v29, %v11495_v54 }
 0x822   :  { %v11666_v1 = vadd.f32 %v5697_v43, %v12216_v32  ;;  %v11669_v47 = vadd.f32 %v5698_v27, %v12217_v13  ;;  %v11672_v62 = vadd.f32 %v5699_v20, %v12218_v25  ;;  %v12219_v23 = vld [vmem:[#allocation49_spill] sm:$0xff]  ;;  %v12220_v46 = vld [vmem:[#allocation47_spill] sm:$0xff]  ;;  %v12221_v24 = vld [vmem:[#allocation50_spill] sm:$0xff]  ;;  %v5769_v43 = vmax.f32 %v11498_v21, 0.0 }
 0x823   :  { %v11675_v14 = vadd.f32 %v5700_v57, %v12219_v23  ;;  %v11678_v63 = vadd.f32 %v5701_v59, %v12220_v46  ;;  %v11681_v55 = vadd.f32 %v5703_v17, %v12221_v24  ;;  %v12222_v60 = vld [vmem:[#allocation51_spill] sm:$0xff]  ;;  %v5771_v32 = vmax.f32 %v11504_v9, 0.0  ;;  %v12226_v29 = vld [vmem:[#allocation37_spill] sm:$0xff]  ;;  %v12228_v46 = vld [vmem:[#allocation24_spill] sm:$0xff] }
 0x824   :  { %v5770_v27 = vmax.f32 %v12222_v60, 0.0  ;;  %v5772_v20 = vmax.f32 %v11507_v22, 0.0  ;;  %v5773_v57 = vmax.f32 %v11510_v49, 0.0  ;;  %v5774_v13 = vmax.f32 %v11513_v8, 0.0  ;;  %5833 = vst.msk [vmem:[#allocation15] sm:$0xff] %vm509_vm6, %v5769_v43  ;;  %v12229_v43 = vld [vmem:[#allocation23_spill] sm:$0xff] }
 0x825   :  { %v5775_v59 = vmax.f32 %v11516_v11, 0.0  ;;  %v5776_v17 = vmax.f32 %v11519_v41, 0.0  ;;  %v5777_v25 = vmax.f32 %v11522_v6, 0.0  ;;  %v5778_v54 = vmax.f32 %v11525_v18, 0.0  ;;  %5835 = vst.msk [vmem:[#allocation15 + $0x10] sm:$0xff] %vm509_vm6, %v5771_v32 }
 0x826   :  { %v5779_v21 = vmax.f32 %v11528_v7, 0.0  ;;  %5834 = vst.msk [vmem:[#allocation15 + $0x8] sm:$0xff] %vm509_vm6, %v5770_v27  ;;  %v5780_v9 = vmax.f32 %v11531_v30, 0.0  ;;  %v5781_v49 = vmax.f32 %v11534_v45, 0.0  ;;  %v5782_v22 = vmax.f32 %v11537_v50, 0.0  ;;  %5836 = vst.msk [vmem:[#allocation15 + $0x18] sm:$0xff] %vm509_vm6, %v5772_v20 }
 0x827   :  { %v5783_v41 = vmax.f32 %v11540_v34, 0.0  ;;  %5837 = vst.msk [vmem:[#allocation15 + $0x20] sm:$0xff] %vm509_vm6, %v5773_v57  ;;  %5838 = vst.msk [vmem:[#allocation15 + $0x28] sm:$0xff] %vm509_vm6, %v5774_v13  ;;  %v5784_v8 = vmax.f32 %v11543_v40, 0.0  ;;  %v5785_v11 = vmax.f32 %v11546_v33, 0.0  ;;  %v5786_v6 = vmax.f32 %v11549_v42, 0.0 }
 0x828   :  { %5839 = vst.msk [vmem:[#allocation15 + $0x30] sm:$0xff] %vm509_vm6, %v5775_v59  ;;  %v5787_v18 = vmax.f32 %v11552_v2, 0.0  ;;  %5840 = vst.msk [vmem:[#allocation15 + $0x38] sm:$0xff] %vm509_vm6, %v5776_v17  ;;  %v5788_v7 = vmax.f32 %v11555_v61, 0.0  ;;  %v5789_v30 = vmax.f32 %v11558_v35, 0.0  ;;  %v5790_v45 = vmax.f32 %v11561_v56, 0.0 }
 0x829   :  { %5841 = vst.msk [vmem:[#allocation15 + $0x40] sm:$0xff] %vm509_vm6, %v5777_v25  ;;  %5842 = vst.msk [vmem:[#allocation15 + $0x48] sm:$0xff] %vm509_vm6, %v5778_v54  ;;  %v5791_v50 = vmax.f32 %v11564_v26, 0.0  ;;  %v5792_v34 = vmax.f32 %v11567_v39, 0.0  ;;  %v5793_v40 = vmax.f32 %v11570_v28, 0.0  ;;  %v5794_v33 = vmax.f32 %v11573_v15, 0.0 }
 0x82a   :  { %5843 = vst.msk [vmem:[#allocation15 + $0x50] sm:$0xff] %vm509_vm6, %v5779_v21  ;;  %5844 = vst.msk [vmem:[#allocation15 + $0x58] sm:$0xff] %vm509_vm6, %v5780_v9  ;;  %v5795_v42 = vmax.f32 %v11576_v53, 0.0  ;;  %v5796_v2 = vmax.f32 %v11579_v16, 0.0  ;;  %v5797_v61 = vmax.f32 %v11582_v3, 0.0  ;;  %v12223_v35 = vld [vmem:[#allocation52_spill] sm:$0xff] }
 0x82b   :  { %5845 = vst.msk [vmem:[#allocation15 + $0x60] sm:$0xff] %vm509_vm6, %v5781_v49  ;;  %5846 = vst.msk [vmem:[#allocation15 + $0x68] sm:$0xff] %vm509_vm6, %v5782_v22  ;;  %v5798_v56 = vmax.f32 %v12223_v35, 0.0  ;;  %v5799_v26 = vmax.f32 %v11588_v10, 0.0  ;;  %v12224_v39 = vld [vmem:[#allocation53_spill] sm:$0xff]  ;;  %v12225_v15 = vld [vmem:[#allocation40_spill] sm:$0xff] }
 0x82c   :  { %5847 = vst.msk [vmem:[#allocation15 + $0x70] sm:$0xff] %vm509_vm6, %v5783_v41  ;;  %5848 = vst.msk [vmem:[#allocation15 + $0x78] sm:$0xff] %vm509_vm6, %v5784_v8  ;;  %v5800_v28 = vmax.f32 %v12224_v39, 0.0  ;;  %v5801_v53 = vmax.f32 %v12225_v15, 0.0  ;;  %v5802_v16 = vmax.f32 %v12226_v29, 0.0  ;;  %v5803_v3 = vmax.f32 %v11600_v58, 0.0 }
 0x82d   :  { %5849 = vst.msk [vmem:[#allocation15 + $0x80] sm:$0xff] %vm509_vm6, %v5785_v11  ;;  %5850 = vst.msk [vmem:[#allocation15 + $0x88] sm:$0xff] %vm509_vm6, %v5786_v6  ;;  %v12227_v10 = vld [vmem:[#allocation27_spill] sm:$0xff]  ;;  %v5805_v24 = vmax.f32 %v12228_v46, 0.0  ;;  %v5806_v60 = vmax.f32 %v12229_v43, 0.0  ;;  %v5807_v27 = vmax.f32 %v11612_v0, 0.0 }
 0x82e   :  { %5851 = vst.msk [vmem:[#allocation15 + $0x90] sm:$0xff] %vm509_vm6, %v5787_v18  ;;  %5852 = vst.msk [vmem:[#allocation15 + $0x98] sm:$0xff] %vm509_vm6, %v5788_v7  ;;  %v5804_v23 = vmax.f32 %v12227_v10, 0.0  ;;  %v12230_v58 = vld [vmem:[#allocation25_spill] sm:$0xff]  ;;  %v12231_v20 = vld [vmem:[#allocation31_spill] sm:$0xff]  ;;  %v5811_v17 = vmax.f32 %v11624_v31, 0.0 }
 0x82f   :  { %5853 = vst.msk [vmem:[#allocation15 + $0xa0] sm:$0xff] %vm509_vm6, %v5789_v30  ;;  %5854 = vst.msk [vmem:[#allocation15 + $0xa8] sm:$0xff] %vm509_vm6, %v5790_v45  ;;  %v5808_v32 = vmax.f32 %v12230_v58, 0.0  ;;  %v5809_v57 = vmax.f32 %v12231_v20, 0.0  ;;  %v12232_v13 = vld [vmem:[#allocation28_spill] sm:$0xff]  ;;  %v12233_v0 = vld [vmem:[#allocation26_spill] sm:$0xff] }
 0x830   :  { %5855 = vst.msk [vmem:[#allocation15 + $0xb0] sm:$0xff] %vm509_vm6, %v5791_v50  ;;  %5856 = vst.msk [vmem:[#allocation15 + $0xb8] sm:$0xff] %vm509_vm6, %v5792_v34  ;;  %v5810_v59 = vmax.f32 %v12232_v13, 0.0  ;;  %v5812_v25 = vmax.f32 %v12233_v0, 0.0  ;;  %v12234_v54 = vld [vmem:[#allocation29_spill] sm:$0xff]  ;;  %v5815_v22 = vmax.f32 %v11636_v12, 0.0 }
 0x831   :  { %5857 = vst.msk [vmem:[#allocation15 + $0xc0] sm:$0xff] %vm509_vm6, %v5793_v40  ;;  %5858 = vst.msk [vmem:[#allocation15 + $0xc8] sm:$0xff] %vm509_vm6, %v5794_v33  ;;  %v5813_v21 = vmax.f32 %v12234_v54, 0.0  ;;  %v12235_v9 = vld [vmem:[#allocation33_spill] sm:$0xff]  ;;  %v5816_v31 = vmax.f32 %v11639_v36, 0.0  ;;  %v5817_v41 = vmax.f32 %v11642_v37, 0.0 }
 0x832   :  { %5859 = vst.msk [vmem:[#allocation15 + $0xd0] sm:$0xff] %vm509_vm6, %v5795_v42  ;;  %5860 = vst.msk [vmem:[#allocation15 + $0xd8] sm:$0xff] %vm509_vm6, %v5796_v2  ;;  %v5814_v49 = vmax.f32 %v12235_v9, 0.0  ;;  %v5818_v8 = vmax.f32 %v11645_v38, 0.0  ;;  %v5819_v11 = vmax.f32 %v11648_v4, 0.0  ;;  %v5820_v12 = vmax.f32 %v11651_v48, 0.0 }
 0x833   :  { %5861 = vst.msk [vmem:[#allocation15 + $0xe0] sm:$0xff] %vm509_vm6, %v5797_v61  ;;  %5862 = vst.msk [vmem:[#allocation15 + $0xe8] sm:$0xff] %vm509_vm6, %v5798_v56  ;;  %v5821_v36 = vmax.f32 %v11654_v5, 0.0  ;;  %v5822_v37 = vmax.f32 %v11657_v44, 0.0  ;;  %v5823_v38 = vmax.f32 %v11660_v51, 0.0  ;;  %v5824_v4 = vmax.f32 %v11663_v52, 0.0 }
 0x834   :  { %5863 = vst.msk [vmem:[#allocation15 + $0xf0] sm:$0xff] %vm509_vm6, %v5799_v26  ;;  %5864 = vst.msk [vmem:[#allocation15 + $0xf8] sm:$0xff] %vm509_vm6, %v5800_v28  ;;  %v5825_v6 = vmax.f32 %v11666_v1, 0.0  ;;  %v5826_v48 = vmax.f32 %v11669_v47, 0.0  ;;  %v5827_v5 = vmax.f32 %v11672_v62, 0.0  ;;  %v5828_v44 = vmax.f32 %v11675_v14, 0.0 }
 0x835   :  { %5865 = vst.msk [vmem:[#allocation15 + $0x100] sm:$0xff] %vm509_vm6, %v5801_v53  ;;  %5866 = vst.msk [vmem:[#allocation15 + $0x108] sm:$0xff] %vm509_vm6, %v5802_v16  ;;  %v5829_v51 = vmax.f32 %v11678_v63, 0.0  ;;  %v5831_v52 = vmax.f32 %v11681_v55, 0.0  ;;  %v5832_v1 = vmax.f32 %v11684_v19, 0.0 }
 0x836   :  { %5867 = vst.msk [vmem:[#allocation15 + $0x110] sm:$0xff] %vm509_vm6, %v5803_v3  ;;  %5868 = vst.msk [vmem:[#allocation15 + $0x118] sm:$0xff] %vm509_vm6, %v5804_v23 }
 0x837   :  { %5869 = vst.msk [vmem:[#allocation15 + $0x120] sm:$0xff] %vm509_vm6, %v5805_v24  ;;  %5870 = vst.msk [vmem:[#allocation15 + $0x128] sm:$0xff] %vm509_vm6, %v5806_v60 }
 0x838   :  { %5871 = vst.msk [vmem:[#allocation15 + $0x130] sm:$0xff] %vm509_vm6, %v5807_v27  ;;  %5872 = vst.msk [vmem:[#allocation15 + $0x138] sm:$0xff] %vm509_vm6, %v5808_v32 }
 0x839   :  { %5873 = vst.msk [vmem:[#allocation15 + $0x140] sm:$0xff] %vm509_vm6, %v5809_v57  ;;  %5874 = vst.msk [vmem:[#allocation15 + $0x148] sm:$0xff] %vm509_vm6, %v5810_v59 }
 0x83a   :  { %5875 = vst.msk [vmem:[#allocation15 + $0x150] sm:$0xff] %vm509_vm6, %v5811_v17  ;;  %5876 = vst.msk [vmem:[#allocation15 + $0x158] sm:$0xff] %vm509_vm6, %v5812_v25 }
 0x83b   :  { %5877 = vst.msk [vmem:[#allocation15 + $0x160] sm:$0xff] %vm509_vm6, %v5813_v21  ;;  %5878 = vst.msk [vmem:[#allocation15 + $0x168] sm:$0xff] %vm509_vm6, %v5814_v49 }
 0x83c   :  { %5879 = vst.msk [vmem:[#allocation15 + $0x170] sm:$0xff] %vm509_vm6, %v5815_v22  ;;  %5880 = vst.msk [vmem:[#allocation15 + $0x178] sm:$0xff] %vm509_vm6, %v5816_v31 }
 0x83d   :  { %5881 = vst.msk [vmem:[#allocation15 + $0x180] sm:$0xff] %vm509_vm6, %v5817_v41  ;;  %5882 = vst.msk [vmem:[#allocation15 + $0x188] sm:$0xff] %vm509_vm6, %v5818_v8 }
 0x83e   :  { %5883 = vst.msk [vmem:[#allocation15 + $0x190] sm:$0xff] %vm509_vm6, %v5819_v11  ;;  %5884 = vst.msk [vmem:[#allocation15 + $0x198] sm:$0xff] %vm509_vm6, %v5820_v12 }
 0x83f   :  { %5885 = vst.msk [vmem:[#allocation15 + $0x1a0] sm:$0xff] %vm509_vm6, %v5821_v36  ;;  %5886 = vst.msk [vmem:[#allocation15 + $0x1a8] sm:$0xff] %vm509_vm6, %v5822_v37 }
 0x840   :  { %5887 = vst.msk [vmem:[#allocation15 + $0x1b0] sm:$0xff] %vm509_vm6, %v5823_v38  ;;  %5888 = vst.msk [vmem:[#allocation15 + $0x1b8] sm:$0xff] %vm509_vm6, %v5824_v4 }
 0x841   :  { %5889 = vst.msk [vmem:[#allocation15 + $0x1c0] sm:$0xff] %vm509_vm6, %v5825_v6  ;;  %5890 = vst.msk [vmem:[#allocation15 + $0x1c8] sm:$0xff] %vm509_vm6, %v5826_v48 }
 0x842   :  { %5891 = vst.msk [vmem:[#allocation15 + $0x1d0] sm:$0xff] %vm509_vm6, %v5827_v5  ;;  %5892 = vst.msk [vmem:[#allocation15 + $0x1d8] sm:$0xff] %vm509_vm6, %v5828_v44 }
 0x843   :  { %5893 = vst.msk [vmem:[#allocation15 + $0x1e0] sm:$0xff] %vm509_vm6, %v5829_v51  ;;  %5895 = vst.msk [vmem:[#allocation15 + $0x1f0] sm:$0xff] %vm509_vm6, %v5831_v52 }
 0x844   :  { %5896 = vst.msk [vmem:[#allocation15 + $0x1f8] sm:$0xff] %vm509_vm6, %v5832_v1 }
 0x845   :  { %7161 = shalt.err (!%p7158_p4)
}
 0x846   :  { %s7162_s23 = scalar_lea.hbm %s11834_s7, 8192 }
 0x847   :  { %p7163_p5 = scmp.ne.s32.totalorder %s11834_s7, %s7162_s23  ;;  %p7166_p6 = scmp.lt.u32.totalorder %s7162_s23, %s11834_s7 }
 0x849   :  { %p7168_p7 = pnand %p7166_p6, %p7163_p5 }
 0x84b   :  { %7171 = shalt.err (!%p7168_p7)
}
 0x84c   :  { %5908 = dma.vmem_to_hbm [thread:$0]  %s5903_s12, 8192, %s11834_s7, [#allocation5], %s7188_s5, %s7188_s5, %s7189_s18  }
 0x84d   :  { %7180 = dma.done.wait [#allocation5], 8192  }
 0x84e   :  { %7181 = vsyncadd [#allocation5], 4294959104 }
 0x84f   :  { %5912 = vsyncpa [#allocation4], 1 }
 0x850   :  { %5913 = vsyncpa [#allocation7], 1 }
 0x851   :  { %5914 = vsyncpa [#allocation10], 1 }
 0x852   :  { %5915 = vsyncpa [#allocation13], 1 }
 0x853   :  { %5916 = vsyncpa [#allocation5], 1 }

</bundles_post_ra>
